<compile_context>
chip_gen: v6e
topology: v6e:2x2x1
jax: 0.10.0
libtpu: 0.0.40
codegen_flags: <defaults>
</compile_context>

<pallas_src>
import functools

import numpy as np
import jax
import jax.numpy as jnp
from jax.experimental import pallas as pl
from jax.experimental.pallas import tpu as pltpu

# ---- synthetic config (mirrors cfg.FAST_RCNN.*) -----------------------------
CONV_HEAD_DIM = 32          # cfg.FAST_RCNN.CONV_HEAD_DIM
NUM_STACKED_CONVS = 2       # cfg.FAST_RCNN.NUM_STACKED_CONVS
MLP_HEAD_DIM = 64           # cfg.FAST_RCNN.MLP_HEAD_DIM
ROI_XFORM_RESOLUTION = 8    # cfg.FAST_RCNN.ROI_XFORM_RESOLUTION

MATMUL_DTYPE = jnp.bfloat16  # MXU operand dtype (accumulation stays f32)
ROI_BLOCK = 64               # ROIs per grid step (tunable 64-128)


def _round_up(v, m):
    return ((v + m - 1) // m) * m


def _lane_base(x, W, C):
    """Lane offset of padded spatial column x in the (w, c) lane layout.

    Interior columns x=1..W sit at lanes [0, W*C); the left halo (x=0) and the
    right halo (x=W+1) are appended after the interior so the hot interior
    stores/loads start at lane 0 (128-aligned)."""
    if 1 <= x <= W:
        return (x - 1) * C
    if x == 0:
        return W * C
    return (W + 1) * C


# ---- fused kernel body -------------------------------------------------------
def _make_fused_kernel(num_convs, H, W, B, C, CW, IW):
    DT = MATMUL_DTYPE

    def kernel(x_ref, *refs):
        conv_refs = refs[:2 * num_convs]
        wfc_ref, bfc_ref, out_ref, pad_ref = refs[2 * num_convs:]

        # -- zero only the conv halo (no full memset) --------------------------
        pad_ref[0, :, :] = jnp.zeros((B, CW), DT)            # top row
        pad_ref[H + 1, :, :] = jnp.zeros((B, CW), DT)        # bottom row
        pad_ref[1:H + 1, :, IW:CW] = jnp.zeros((H, B, CW - IW), DT)  # l/r halo

        # -- input block (already channel-padded + bf16, (H, B, W*C)) ----------
        pad_ref[1:H + 1, :, 0:IW] = x_ref[...]

        # -- stacked 3x3 convs: 3 block-banded MXU matmuls per layer -----------
        for i in range(num_convs):
            w_ref = conv_refs[2 * i]          # (3, CW, IW) bf16
            b_ref = conv_refs[2 * i + 1]      # (1, IW) f32
            acc = jnp.dot(pad_ref[0:H, :, :].reshape(H * B, CW), w_ref[0],
                          preferred_element_type=jnp.float32)
            acc = acc + jnp.dot(pad_ref[1:H + 1, :, :].reshape(H * B, CW),
                                w_ref[1], preferred_element_type=jnp.float32)
            acc = acc + jnp.dot(pad_ref[2:H + 2, :, :].reshape(H * B, CW),
                                w_ref[2], preferred_element_type=jnp.float32)
            act = jnp.maximum(acc + b_ref[...], 0.0)          # (H*B, IW) f32
            # write back into the interior (lane 0-aligned, full width)
            pad_ref[1:H + 1, :, 0:IW] = act.reshape(H, B, IW).astype(DT)

        # -- fc + ReLU: sum over spatial rows, read straight from scratch ------
        y = bfc_ref[...]                                      # (1, F_pad) f32
        for h in range(H):
            y = y + jnp.dot(pad_ref[1 + h, :, 0:IW], wfc_ref[h],
                            preferred_element_type=jnp.float32)
        out_ref[...] = jnp.maximum(y, 0.0)                    # lane-dense store

    return kernel


# ---- one-time host-side weight repacking ------------------------------------
def prepare_params(conv_ws_oihw, conv_bs, fc_w, fc_b, roi_size):
    """Repack PyTorch-layout weights for the fused kernel (runs once)."""
    H = W = roi_size
    dims = [int(conv_ws_oihw[0].shape[1])] + [int(w.shape[0]) for w in conv_ws_oihw]
    C = max(dims)                      # channel lane stride inside the kernel
    IW = W * C                         # interior lane width
    CW = _round_up((W + 2) * C, 128)   # full lane width (interior + halo + pad)

    conv_w_k, conv_b_k = [], []
    for w, b in zip(conv_ws_oihw, conv_bs):          # w: (Cout, Cin, 3, 3)
        w_np = np.asarray(w, np.float32)
        b_np = np.asarray(b, np.float32)
        cout, cin, kh, kw = w_np.shape
        assert (kh, kw) == (3, 3)
        wk = np.zeros((3, CW, IW), np.float32)       # block-banded per dy
        for dy in range(3):
            for wo in range(W):
                for dx in range(3):
                    base = _lane_base(wo + dx, W, C)
                    wk[dy, base:base + cin, wo * C:wo * C + cout] = \
                        w_np[:, :, dy, dx].T
        conv_w_k.append(jnp.asarray(wk, MATMUL_DTYPE))
        bk = np.zeros((1, IW), np.float32)
        for wo in range(W):
            bk[0, wo * C:wo * C + cout] = b_np
        conv_b_k.append(jnp.asarray(bk, jnp.float32))

    F, K = np.asarray(fc_w).shape
    cl = dims[-1]
    assert K == cl * H * W
    F_pad = _round_up(F, 128)
    # PyTorch flattens the conv output in (c, h, w) order; the kernel's act
    # lanes are (w, c) per row h -> permute the FC weight columns once.
    t = np.asarray(fc_w, np.float32).reshape(F, cl, H, W).transpose(2, 3, 1, 0)
    wfc = np.zeros((H, W, C, F_pad), np.float32)
    wfc[:, :, :cl, :F] = t                            # zero rows for padded c
    wfc = wfc.reshape(H, IW, F_pad)
    bfc = np.zeros((1, F_pad), np.float32)
    bfc[0, :F] = np.asarray(fc_b, np.float32)

    return dict(conv_w=conv_w_k, conv_b=conv_b_k,
                fc_w=jnp.asarray(wfc, MATMUL_DTYPE),
                fc_b=jnp.asarray(bfc, jnp.float32))


# ---- module forward (post roi_xform) ----------------------------------------
@functools.partial(jax.jit, static_argnames=("fc_dim",))
def roi_xconv1fc_head_forward(x_nchw, params, *, fc_dim):
    """x_nchw: (N, dim_in, R, R) ROI-pooled features (output of roi_xform)."""
    conv_w, conv_b = params["conv_w"], params["conv_b"]
    wfc, bfc = params["fc_w"], params["fc_b"]

    N, cin0, H, W = x_nchw.shape
    num_convs = len(conv_w)
    IW = int(conv_b[0].shape[1])       # W * C
    C = IW // W
    CW = int(conv_w[0].shape[1])
    F_pad = int(wfc.shape[2])
    assert cin0 <= C and wfc.shape[:2] == (H, IW)

    # ROI block: large enough to fill the MXU M dim, clamped for tiny N.
    # (With realistic N this gives >= 2 grid blocks so both v7x cores work.)
    B = min(ROI_BLOCK, _round_up(max(N, 1), 8))
    n_pad = _round_up(N, B)
    n_blocks = n_pad // B

    # one-time glue: NCHW -> (H, ROI, W*C) dense bf16 slab
    xk = jnp.transpose(x_nchw, (2, 0, 3, 1))                  # (H, N, W, cin)
    xk = jnp.pad(xk, ((0, 0), (0, n_pad - N), (0, 0), (0, C - cin0)))
    xk = xk.reshape(H, n_pad, W * C).astype(MATMUL_DTYPE)

    kernel = _make_fused_kernel(num_convs, H, W, B, C, CW, IW)

    in_specs = [pl.BlockSpec((H, B, W * C), lambda n: (0, n, 0))]
    args = [xk]
    for w, b in zip(conv_w, conv_b):
        in_specs.append(pl.BlockSpec(w.shape, lambda n: (0, 0, 0)))
        in_specs.append(pl.BlockSpec(b.shape, lambda n: (0, 0)))
        args += [w, b]
    in_specs.append(pl.BlockSpec(wfc.shape, lambda n: (0, 0, 0)))
    in_specs.append(pl.BlockSpec(bfc.shape, lambda n: (0, 0)))
    args += [wfc, bfc]

    out = pl.pallas_call(
        kernel,
        out_shape=jax.ShapeDtypeStruct((n_pad, F_pad), jnp.float32),
        grid=(n_blocks,),
        in_specs=in_specs,
        out_specs=pl.BlockSpec((B, F_pad), lambda n: (n, 0)),
        scratch_shapes=[
            pltpu.VMEM((H + 2, B, CW), MATMUL_DTYPE),   # padded activations
        ],
        compiler_params=pltpu.CompilerParams(
            dimension_semantics=("parallel",),
            vmem_limit_bytes=32 * 1024 * 1024),
    )(*args)

    return out[:N, :fc_dim]


# ---- pure-JAX f32 reference (mirrors the PyTorch module) ---------------------
def reference_forward(x_nchw, conv_ws_oihw, conv_bs, fc_w, fc_b):
    y = x_nchw
    for w, b in zip(conv_ws_oihw, conv_bs):
        y = jax.lax.conv_general_dilated(
            y, w, window_strides=(1, 1), padding=((1, 1), (1, 1)),
            dimension_numbers=("NCHW", "OIHW", "NCHW"))
        y = jnp.maximum(y + b.reshape(1, -1, 1, 1), 0.0)
    y = y.reshape(y.shape[0], -1)
    return jnp.maximum(y @ fc_w.T + fc_b, 0.0)


if __name__ == "__main__":
    key = jax.random.PRNGKey(0)
    N, dim_in, R = 2, 4, ROI_XFORM_RESOLUTION
    keys = jax.random.split(key, NUM_STACKED_CONVS + 2)

    # TODO(synk): roi_xform (RoIAlign over rpn_ret['rois']) is an external
    # callable injected into the PyTorch module; its pooled output is taken as
    # the kernel input directly.
    x = jax.random.normal(keys[0], (N, dim_in, R, R), jnp.float32)

    # deterministic synthetic weights in PyTorch layouts
    # (MSRAFill-like for convs, Xavier-like for the FC, zero biases)
    conv_ws, conv_bs = [], []
    cin = dim_in
    for i in range(NUM_STACKED_CONVS):
        cout = CONV_HEAD_DIM
        fan_out = cout * 3 * 3
        w = (jax.random.normal(keys[1 + i], (cout, cin, 3, 3), jnp.float32)
             * jnp.sqrt(2.0 / fan_out))
        conv_ws.append(w)                                    # (Cout, Cin, 3, 3)
        conv_bs.append(jnp.zeros((cout,), jnp.float32))
        cin = cout

    K = cin * R * R
    fc_w = (jax.random.normal(keys[-1], (MLP_HEAD_DIM, K), jnp.float32)
            * jnp.sqrt(2.0 / (K + MLP_HEAD_DIM)))            # (fc_dim, K)
    fc_b = jnp.zeros((MLP_HEAD_DIM,), jnp.float32)

    params = prepare_params(conv_ws, conv_bs, fc_w, fc_b, roi_size=R)
    out = roi_xconv1fc_head_forward(x, params, fc_dim=MLP_HEAD_DIM)
    out = jax.block_until_ready(out)

    assert out.shape == (N, MLP_HEAD_DIM) and out.dtype == jnp.float32
    ref = reference_forward(x, conv_ws, conv_bs, fc_w, fc_b)
    err = float(jnp.max(jnp.abs(out - ref)))
    assert err < 1e-1, f"max abs error vs f32 reference too large: {err}"
    print("KERNEL_OK")
</pallas_src>

<mosaic_0001>
module attributes {stable_mosaic.version = 11 : i64} {
  func.func @kernel(%arg0: i32, %arg1: memref<8x8x256xbf16, #tpu.memory_space<vmem>>, %arg2: memref<3x384x256xbf16, #tpu.memory_space<vmem>>, %arg3: memref<1x256xf32, #tpu.memory_space<vmem>>, %arg4: memref<3x384x256xbf16, #tpu.memory_space<vmem>>, %arg5: memref<1x256xf32, #tpu.memory_space<vmem>>, %arg6: memref<8x256x128xbf16, #tpu.memory_space<vmem>>, %arg7: memref<1x128xf32, #tpu.memory_space<vmem>>, %arg8: memref<8x128xf32, #tpu.memory_space<vmem>>, %arg9: memref<10x8x384xbf16, #tpu.memory_space<vmem>>) attributes {dimension_semantics = [#tpu.dimension_semantics<parallel>], iteration_bounds = array<i64: 1>, scalar_prefetch = 0 : i64, scratch_operands = 1 : i64, tpu.core_type = #tpu.core_type<tc>, window_params = [{transform_indices = @transform_0, window_bounds = array<i64: 8, 8, 256>}, {pipeline_mode = #tpu.pipeline_mode<synchronous>, transform_indices = @transform_1, window_bounds = array<i64: 3, 384, 256>}, {pipeline_mode = #tpu.pipeline_mode<synchronous>, transform_indices = @transform_2, window_bounds = array<i64: 1, 256>}, {pipeline_mode = #tpu.pipeline_mode<synchronous>, transform_indices = @transform_3, window_bounds = array<i64: 3, 384, 256>}, {pipeline_mode = #tpu.pipeline_mode<synchronous>, transform_indices = @transform_4, window_bounds = array<i64: 1, 256>}, {pipeline_mode = #tpu.pipeline_mode<synchronous>, transform_indices = @transform_5, window_bounds = array<i64: 8, 256, 128>}, {pipeline_mode = #tpu.pipeline_mode<synchronous>, transform_indices = @transform_6, window_bounds = array<i64: 1, 128>}, {transform_indices = @transform_7, window_bounds = array<i64: 8, 128>}]} {
    %cst = arith.constant 0.000000e+00 : bf16
    %0 = vector.broadcast %cst : bf16 to vector<8x384xbf16>
    %c0 = arith.constant 0 : index
    %c0_0 = arith.constant 0 : index
    %c0_1 = arith.constant 0 : index
    %1 = vector.load %arg9[%c0, %c0_0, %c0_1] : memref<10x8x384xbf16, #tpu.memory_space<vmem>>, vector<1x8x384xbf16>
    %2 = vector.shape_cast %1 : vector<1x8x384xbf16> to vector<8x384xbf16>
    %3 = vector.shape_cast %0 : vector<8x384xbf16> to vector<1x8x384xbf16>
    tpu.vector_store %arg9[%c0, %c0_0, %c0_1], %3 {strides = array<i32>} : memref<10x8x384xbf16, #tpu.memory_space<vmem>>, vector<1x8x384xbf16>,
    %cst_2 = arith.constant 0.000000e+00 : bf16
    %4 = vector.broadcast %cst_2 : bf16 to vector<8x384xbf16>
    %c9 = arith.constant 9 : index
    %c0_3 = arith.constant 0 : index
    %c0_4 = arith.constant 0 : index
    %5 = vector.load %arg9[%c9, %c0_3, %c0_4] : memref<10x8x384xbf16, #tpu.memory_space<vmem>>, vector<1x8x384xbf16>
    %6 = vector.shape_cast %5 : vector<1x8x384xbf16> to vector<8x384xbf16>
    %7 = vector.shape_cast %4 : vector<8x384xbf16> to vector<1x8x384xbf16>
    tpu.vector_store %arg9[%c9, %c0_3, %c0_4], %7 {strides = array<i32>} : memref<10x8x384xbf16, #tpu.memory_space<vmem>>, vector<1x8x384xbf16>,
    %cst_5 = arith.constant 0.000000e+00 : bf16
    %8 = vector.broadcast %cst_5 : bf16 to vector<8x8x128xbf16>
    %c1 = arith.constant 1 : index
    %c0_6 = arith.constant 0 : index
    %c256 = arith.constant 256 : index
    %9 = vector.load %arg9[%c1, %c0_6, %c256] : memref<10x8x384xbf16, #tpu.memory_space<vmem>>, vector<8x8x128xbf16>
    tpu.vector_store %arg9[%c1, %c0_6, %c256], %8 {strides = array<i32>} : memref<10x8x384xbf16, #tpu.memory_space<vmem>>, vector<8x8x128xbf16>,
    %c0_7 = arith.constant 0 : index
    %c0_8 = arith.constant 0 : index
    %c0_9 = arith.constant 0 : index
    %10 = vector.load %arg1[%c0_7, %c0_8, %c0_9] : memref<8x8x256xbf16, #tpu.memory_space<vmem>>, vector<8x8x256xbf16>
    %c1_10 = arith.constant 1 : index
    %c0_11 = arith.constant 0 : index
    %c0_12 = arith.constant 0 : index
    %11 = vector.load %arg9[%c1_10, %c0_11, %c0_12] : memref<10x8x384xbf16, #tpu.memory_space<vmem>>, vector<8x8x256xbf16>
    tpu.vector_store %arg9[%c1_10, %c0_11, %c0_12], %10 {strides = array<i32>} : memref<10x8x384xbf16, #tpu.memory_space<vmem>>, vector<8x8x256xbf16>,
    %c0_13 = arith.constant 0 : index
    %c0_14 = arith.constant 0 : index
    %c0_15 = arith.constant 0 : index
    %12 = vector.load %arg9[%c0_13, %c0_14, %c0_15] : memref<10x8x384xbf16, #tpu.memory_space<vmem>>, vector<8x8x384xbf16>
    %13 = vector.shape_cast %12 : vector<8x8x384xbf16> to vector<64x384xbf16>
    %c0_16 = arith.constant 0 : index
    %c0_17 = arith.constant 0 : index
    %c0_18 = arith.constant 0 : index
    %14 = vector.load %arg2[%c0_16, %c0_17, %c0_18] : memref<3x384x256xbf16, #tpu.memory_space<vmem>>, vector<1x384x256xbf16>
    %15 = vector.shape_cast %14 : vector<1x384x256xbf16> to vector<384x256xbf16>
    %cst_19 = arith.constant dense<0.000000e+00> : vector<64x256xf32>
    %16 = tpu.matmul %13, %15, %cst_19 {dimension_numbers = #tpu.dot_dimension_numbers<[1], [0], [0], [1], [0, 0, 1, 1], [], []>} : vector<64x384xbf16>, vector<384x256xbf16>, vector<64x256xf32> -> vector<64x256xf32>
    %c1_20 = arith.constant 1 : index
    %c0_21 = arith.constant 0 : index
    %c0_22 = arith.constant 0 : index
    %17 = vector.load %arg9[%c1_20, %c0_21, %c0_22] : memref<10x8x384xbf16, #tpu.memory_space<vmem>>, vector<8x8x384xbf16>
    %18 = vector.shape_cast %17 : vector<8x8x384xbf16> to vector<64x384xbf16>
    %c1_23 = arith.constant 1 : index
    %c0_24 = arith.constant 0 : index
    %c0_25 = arith.constant 0 : index
    %19 = vector.load %arg2[%c1_23, %c0_24, %c0_25] : memref<3x384x256xbf16, #tpu.memory_space<vmem>>, vector<1x384x256xbf16>
    %20 = vector.shape_cast %19 : vector<1x384x256xbf16> to vector<384x256xbf16>
    %cst_26 = arith.constant dense<0.000000e+00> : vector<64x256xf32>
    %21 = tpu.matmul %18, %20, %cst_26 {dimension_numbers = #tpu.dot_dimension_numbers<[1], [0], [0], [1], [0, 0, 1, 1], [], []>} : vector<64x384xbf16>, vector<384x256xbf16>, vector<64x256xf32> -> vector<64x256xf32>
    %22 = arith.addf %16, %21 : vector<64x256xf32>
    %c2 = arith.constant 2 : index
    %c0_27 = arith.constant 0 : index
    %c0_28 = arith.constant 0 : index
    %23 = vector.load %arg9[%c2, %c0_27, %c0_28] : memref<10x8x384xbf16, #tpu.memory_space<vmem>>, vector<8x8x384xbf16>
    %24 = vector.shape_cast %23 : vector<8x8x384xbf16> to vector<64x384xbf16>
    %c2_29 = arith.constant 2 : index
    %c0_30 = arith.constant 0 : index
    %c0_31 = arith.constant 0 : index
    %25 = vector.load %arg2[%c2_29, %c0_30, %c0_31] : memref<3x384x256xbf16, #tpu.memory_space<vmem>>, vector<1x384x256xbf16>
    %26 = vector.shape_cast %25 : vector<1x384x256xbf16> to vector<384x256xbf16>
    %cst_32 = arith.constant dense<0.000000e+00> : vector<64x256xf32>
    %27 = tpu.matmul %24, %26, %cst_32 {dimension_numbers = #tpu.dot_dimension_numbers<[1], [0], [0], [1], [0, 0, 1, 1], [], []>} : vector<64x384xbf16>, vector<384x256xbf16>, vector<64x256xf32> -> vector<64x256xf32>
    %28 = arith.addf %22, %27 : vector<64x256xf32>
    %c0_33 = arith.constant 0 : index
    %c0_34 = arith.constant 0 : index
    %29 = vector.load %arg3[%c0_33, %c0_34] : memref<1x256xf32, #tpu.memory_space<vmem>>, vector<1x256xf32>
    %30 = vector.broadcast %29 : vector<1x256xf32> to vector<64x256xf32>
    %31 = arith.addf %28, %30 : vector<64x256xf32>
    %cst_35 = arith.constant 0.000000e+00 : f32
    %32 = vector.broadcast %cst_35 : f32 to vector<64x256xf32>
    %33 = arith.maximumf %31, %32 : vector<64x256xf32>
    %34 = vector.shape_cast %33 : vector<64x256xf32> to vector<8x8x256xf32>
    %35 = arith.truncf %34 : vector<8x8x256xf32> to vector<8x8x256xbf16>
    %c1_36 = arith.constant 1 : index
    %c0_37 = arith.constant 0 : index
    %c0_38 = arith.constant 0 : index
    %36 = vector.load %arg9[%c1_36, %c0_37, %c0_38] : memref<10x8x384xbf16, #tpu.memory_space<vmem>>, vector<8x8x256xbf16>
    tpu.vector_store %arg9[%c1_36, %c0_37, %c0_38], %35 {strides = array<i32>} : memref<10x8x384xbf16, #tpu.memory_space<vmem>>, vector<8x8x256xbf16>,
    %c0_39 = arith.constant 0 : index
    %c0_40 = arith.constant 0 : index
    %c0_41 = arith.constant 0 : index
    %37 = vector.load %arg9[%c0_39, %c0_40, %c0_41] : memref<10x8x384xbf16, #tpu.memory_space<vmem>>, vector<8x8x384xbf16>
    %38 = vector.shape_cast %37 : vector<8x8x384xbf16> to vector<64x384xbf16>
    %c0_42 = arith.constant 0 : index
    %c0_43 = arith.constant 0 : index
    %c0_44 = arith.constant 0 : index
    %39 = vector.load %arg4[%c0_42, %c0_43, %c0_44] : memref<3x384x256xbf16, #tpu.memory_space<vmem>>, vector<1x384x256xbf16>
    %40 = vector.shape_cast %39 : vector<1x384x256xbf16> to vector<384x256xbf16>
    %cst_45 = arith.constant dense<0.000000e+00> : vector<64x256xf32>
    %41 = tpu.matmul %38, %40, %cst_45 {dimension_numbers = #tpu.dot_dimension_numbers<[1], [0], [0], [1], [0, 0, 1, 1], [], []>} : vector<64x384xbf16>, vector<384x256xbf16>, vector<64x256xf32> -> vector<64x256xf32>
    %c1_46 = arith.constant 1 : index
    %c0_47 = arith.constant 0 : index
    %c0_48 = arith.constant 0 : index
    %42 = vector.load %arg9[%c1_46, %c0_47, %c0_48] : memref<10x8x384xbf16, #tpu.memory_space<vmem>>, vector<8x8x384xbf16>
    %43 = vector.shape_cast %42 : vector<8x8x384xbf16> to vector<64x384xbf16>
    %c1_49 = arith.constant 1 : index
    %c0_50 = arith.constant 0 : index
    %c0_51 = arith.constant 0 : index
    %44 = vector.load %arg4[%c1_49, %c0_50, %c0_51] : memref<3x384x256xbf16, #tpu.memory_space<vmem>>, vector<1x384x256xbf16>
    %45 = vector.shape_cast %44 : vector<1x384x256xbf16> to vector<384x256xbf16>
    %cst_52 = arith.constant dense<0.000000e+00> : vector<64x256xf32>
    %46 = tpu.matmul %43, %45, %cst_52 {dimension_numbers = #tpu.dot_dimension_numbers<[1], [0], [0], [1], [0, 0, 1, 1], [], []>} : vector<64x384xbf16>, vector<384x256xbf16>, vector<64x256xf32> -> vector<64x256xf32>
    %47 = arith.addf %41, %46 : vector<64x256xf32>
    %c2_53 = arith.constant 2 : index
    %c0_54 = arith.constant 0 : index
    %c0_55 = arith.constant 0 : index
    %48 = vector.load %arg9[%c2_53, %c0_54, %c0_55] : memref<10x8x384xbf16, #tpu.memory_space<vmem>>, vector<8x8x384xbf16>
    %49 = vector.shape_cast %48 : vector<8x8x384xbf16> to vector<64x384xbf16>
    %c2_56 = arith.constant 2 : index
    %c0_57 = arith.constant 0 : index
    %c0_58 = arith.constant 0 : index
    %50 = vector.load %arg4[%c2_56, %c0_57, %c0_58] : memref<3x384x256xbf16, #tpu.memory_space<vmem>>, vector<1x384x256xbf16>
    %51 = vector.shape_cast %50 : vector<1x384x256xbf16> to vector<384x256xbf16>
    %cst_59 = arith.constant dense<0.000000e+00> : vector<64x256xf32>
    %52 = tpu.matmul %49, %51, %cst_59 {dimension_numbers = #tpu.dot_dimension_numbers<[1], [0], [0], [1], [0, 0, 1, 1], [], []>} : vector<64x384xbf16>, vector<384x256xbf16>, vector<64x256xf32> -> vector<64x256xf32>
    %53 = arith.addf %47, %52 : vector<64x256xf32>
    %c0_60 = arith.constant 0 : index
    %c0_61 = arith.constant 0 : index
    %54 = vector.load %arg5[%c0_60, %c0_61] : memref<1x256xf32, #tpu.memory_space<vmem>>, vector<1x256xf32>
    %55 = vector.broadcast %54 : vector<1x256xf32> to vector<64x256xf32>
    %56 = arith.addf %53, %55 : vector<64x256xf32>
    %cst_62 = arith.constant 0.000000e+00 : f32
    %57 = vector.broadcast %cst_62 : f32 to vector<64x256xf32>
    %58 = arith.maximumf %56, %57 : vector<64x256xf32>
    %59 = vector.shape_cast %58 : vector<64x256xf32> to vector<8x8x256xf32>
    %60 = arith.truncf %59 : vector<8x8x256xf32> to vector<8x8x256xbf16>
    %c1_63 = arith.constant 1 : index
    %c0_64 = arith.constant 0 : index
    %c0_65 = arith.constant 0 : index
    %61 = vector.load %arg9[%c1_63, %c0_64, %c0_65] : memref<10x8x384xbf16, #tpu.memory_space<vmem>>, vector<8x8x256xbf16>
    tpu.vector_store %arg9[%c1_63, %c0_64, %c0_65], %60 {strides = array<i32>} : memref<10x8x384xbf16, #tpu.memory_space<vmem>>, vector<8x8x256xbf16>,
    %c0_66 = arith.constant 0 : index
    %c0_67 = arith.constant 0 : index
    %62 = vector.load %arg7[%c0_66, %c0_67] : memref<1x128xf32, #tpu.memory_space<vmem>>, vector<1x128xf32>
    %c1_68 = arith.constant 1 : index
    %c0_69 = arith.constant 0 : index
    %c0_70 = arith.constant 0 : index
    %63 = vector.load %arg9[%c1_68, %c0_69, %c0_70] : memref<10x8x384xbf16, #tpu.memory_space<vmem>>, vector<1x8x256xbf16>
    %64 = vector.shape_cast %63 : vector<1x8x256xbf16> to vector<8x256xbf16>
    %c0_71 = arith.constant 0 : index
    %c0_72 = arith.constant 0 : index
    %c0_73 = arith.constant 0 : index
    %65 = vector.load %arg6[%c0_71, %c0_72, %c0_73] : memref<8x256x128xbf16, #tpu.memory_space<vmem>>, vector<1x256x128xbf16>
    %66 = vector.shape_cast %65 : vector<1x256x128xbf16> to vector<256x128xbf16>
    %cst_74 = arith.constant dense<0.000000e+00> : vector<8x128xf32>
    %67 = tpu.matmul %64, %66, %cst_74 {dimension_numbers = #tpu.dot_dimension_numbers<[1], [0], [0], [1], [0, 0, 1, 1], [], []>} : vector<8x256xbf16>, vector<256x128xbf16>, vector<8x128xf32> -> vector<8x128xf32>
    %68 = vector.broadcast %62 : vector<1x128xf32> to vector<8x128xf32>
    %69 = arith.addf %68, %67 : vector<8x128xf32>
    %c2_75 = arith.constant 2 : index
    %c0_76 = arith.constant 0 : index
    %c0_77 = arith.constant 0 : index
    %70 = vector.load %arg9[%c2_75, %c0_76, %c0_77] : memref<10x8x384xbf16, #tpu.memory_space<vmem>>, vector<1x8x256xbf16>
    %71 = vector.shape_cast %70 : vector<1x8x256xbf16> to vector<8x256xbf16>
    %c1_78 = arith.constant 1 : index
    %c0_79 = arith.constant 0 : index
    %c0_80 = arith.constant 0 : index
    %72 = vector.load %arg6[%c1_78, %c0_79, %c0_80] : memref<8x256x128xbf16, #tpu.memory_space<vmem>>, vector<1x256x128xbf16>
    %73 = vector.shape_cast %72 : vector<1x256x128xbf16> to vector<256x128xbf16>
    %cst_81 = arith.constant dense<0.000000e+00> : vector<8x128xf32>
    %74 = tpu.matmul %71, %73, %cst_81 {dimension_numbers = #tpu.dot_dimension_numbers<[1], [0], [0], [1], [0, 0, 1, 1], [], []>} : vector<8x256xbf16>, vector<256x128xbf16>, vector<8x128xf32> -> vector<8x128xf32>
    %75 = arith.addf %69, %74 : vector<8x128xf32>
    %c3 = arith.constant 3 : index
    %c0_82 = arith.constant 0 : index
    %c0_83 = arith.constant 0 : index
    %76 = vector.load %arg9[%c3, %c0_82, %c0_83] : memref<10x8x384xbf16, #tpu.memory_space<vmem>>, vector<1x8x256xbf16>
    %77 = vector.shape_cast %76 : vector<1x8x256xbf16> to vector<8x256xbf16>
    %c2_84 = arith.constant 2 : index
    %c0_85 = arith.constant 0 : index
    %c0_86 = arith.constant 0 : index
    %78 = vector.load %arg6[%c2_84, %c0_85, %c0_86] : memref<8x256x128xbf16, #tpu.memory_space<vmem>>, vector<1x256x128xbf16>
    %79 = vector.shape_cast %78 : vector<1x256x128xbf16> to vector<256x128xbf16>
    %cst_87 = arith.constant dense<0.000000e+00> : vector<8x128xf32>
    %80 = tpu.matmul %77, %79, %cst_87 {dimension_numbers = #tpu.dot_dimension_numbers<[1], [0], [0], [1], [0, 0, 1, 1], [], []>} : vector<8x256xbf16>, vector<256x128xbf16>, vector<8x128xf32> -> vector<8x128xf32>
    %81 = arith.addf %75, %80 : vector<8x128xf32>
    %c4 = arith.constant 4 : index
    %c0_88 = arith.constant 0 : index
    %c0_89 = arith.constant 0 : index
    %82 = vector.load %arg9[%c4, %c0_88, %c0_89] : memref<10x8x384xbf16, #tpu.memory_space<vmem>>, vector<1x8x256xbf16>
    %83 = vector.shape_cast %82 : vector<1x8x256xbf16> to vector<8x256xbf16>
    %c3_90 = arith.constant 3 : index
    %c0_91 = arith.constant 0 : index
    %c0_92 = arith.constant 0 : index
    %84 = vector.load %arg6[%c3_90, %c0_91, %c0_92] : memref<8x256x128xbf16, #tpu.memory_space<vmem>>, vector<1x256x128xbf16>
    %85 = vector.shape_cast %84 : vector<1x256x128xbf16> to vector<256x128xbf16>
    %cst_93 = arith.constant dense<0.000000e+00> : vector<8x128xf32>
    %86 = tpu.matmul %83, %85, %cst_93 {dimension_numbers = #tpu.dot_dimension_numbers<[1], [0], [0], [1], [0, 0, 1, 1], [], []>} : vector<8x256xbf16>, vector<256x128xbf16>, vector<8x128xf32> -> vector<8x128xf32>
    %87 = arith.addf %81, %86 : vector<8x128xf32>
    %c5 = arith.constant 5 : index
    %c0_94 = arith.constant 0 : index
    %c0_95 = arith.constant 0 : index
    %88 = vector.load %arg9[%c5, %c0_94, %c0_95] : memref<10x8x384xbf16, #tpu.memory_space<vmem>>, vector<1x8x256xbf16>
    %89 = vector.shape_cast %88 : vector<1x8x256xbf16> to vector<8x256xbf16>
    %c4_96 = arith.constant 4 : index
    %c0_97 = arith.constant 0 : index
    %c0_98 = arith.constant 0 : index
    %90 = vector.load %arg6[%c4_96, %c0_97, %c0_98] : memref<8x256x128xbf16, #tpu.memory_space<vmem>>, vector<1x256x128xbf16>
    %91 = vector.shape_cast %90 : vector<1x256x128xbf16> to vector<256x128xbf16>
    %cst_99 = arith.constant dense<0.000000e+00> : vector<8x128xf32>
    %92 = tpu.matmul %89, %91, %cst_99 {dimension_numbers = #tpu.dot_dimension_numbers<[1], [0], [0], [1], [0, 0, 1, 1], [], []>} : vector<8x256xbf16>, vector<256x128xbf16>, vector<8x128xf32> -> vector<8x128xf32>
    %93 = arith.addf %87, %92 : vector<8x128xf32>
    %c6 = arith.constant 6 : index
    %c0_100 = arith.constant 0 : index
    %c0_101 = arith.constant 0 : index
    %94 = vector.load %arg9[%c6, %c0_100, %c0_101] : memref<10x8x384xbf16, #tpu.memory_space<vmem>>, vector<1x8x256xbf16>
    %95 = vector.shape_cast %94 : vector<1x8x256xbf16> to vector<8x256xbf16>
    %c5_102 = arith.constant 5 : index
    %c0_103 = arith.constant 0 : index
    %c0_104 = arith.constant 0 : index
    %96 = vector.load %arg6[%c5_102, %c0_103, %c0_104] : memref<8x256x128xbf16, #tpu.memory_space<vmem>>, vector<1x256x128xbf16>
    %97 = vector.shape_cast %96 : vector<1x256x128xbf16> to vector<256x128xbf16>
    %cst_105 = arith.constant dense<0.000000e+00> : vector<8x128xf32>
    %98 = tpu.matmul %95, %97, %cst_105 {dimension_numbers = #tpu.dot_dimension_numbers<[1], [0], [0], [1], [0, 0, 1, 1], [], []>} : vector<8x256xbf16>, vector<256x128xbf16>, vector<8x128xf32> -> vector<8x128xf32>
    %99 = arith.addf %93, %98 : vector<8x128xf32>
    %c7 = arith.constant 7 : index
    %c0_106 = arith.constant 0 : index
    %c0_107 = arith.constant 0 : index
    %100 = vector.load %arg9[%c7, %c0_106, %c0_107] : memref<10x8x384xbf16, #tpu.memory_space<vmem>>, vector<1x8x256xbf16>
    %101 = vector.shape_cast %100 : vector<1x8x256xbf16> to vector<8x256xbf16>
    %c6_108 = arith.constant 6 : index
    %c0_109 = arith.constant 0 : index
    %c0_110 = arith.constant 0 : index
    %102 = vector.load %arg6[%c6_108, %c0_109, %c0_110] : memref<8x256x128xbf16, #tpu.memory_space<vmem>>, vector<1x256x128xbf16>
    %103 = vector.shape_cast %102 : vector<1x256x128xbf16> to vector<256x128xbf16>
    %cst_111 = arith.constant dense<0.000000e+00> : vector<8x128xf32>
    %104 = tpu.matmul %101, %103, %cst_111 {dimension_numbers = #tpu.dot_dimension_numbers<[1], [0], [0], [1], [0, 0, 1, 1], [], []>} : vector<8x256xbf16>, vector<256x128xbf16>, vector<8x128xf32> -> vector<8x128xf32>
    %105 = arith.addf %99, %104 : vector<8x128xf32>
    %c8 = arith.constant 8 : index
    %c0_112 = arith.constant 0 : index
    %c0_113 = arith.constant 0 : index
    %106 = vector.load %arg9[%c8, %c0_112, %c0_113] : memref<10x8x384xbf16, #tpu.memory_space<vmem>>, vector<1x8x256xbf16>
    %107 = vector.shape_cast %106 : vector<1x8x256xbf16> to vector<8x256xbf16>
    %c7_114 = arith.constant 7 : index
    %c0_115 = arith.constant 0 : index
    %c0_116 = arith.constant 0 : index
    %108 = vector.load %arg6[%c7_114, %c0_115, %c0_116] : memref<8x256x128xbf16, #tpu.memory_space<vmem>>, vector<1x256x128xbf16>
    %109 = vector.shape_cast %108 : vector<1x256x128xbf16> to vector<256x128xbf16>
    %cst_117 = arith.constant dense<0.000000e+00> : vector<8x128xf32>
    %110 = tpu.matmul %107, %109, %cst_117 {dimension_numbers = #tpu.dot_dimension_numbers<[1], [0], [0], [1], [0, 0, 1, 1], [], []>} : vector<8x256xbf16>, vector<256x128xbf16>, vector<8x128xf32> -> vector<8x128xf32>
    %111 = arith.addf %105, %110 : vector<8x128xf32>
    %cst_118 = arith.constant 0.000000e+00 : f32
    %112 = vector.broadcast %cst_118 : f32 to vector<8x128xf32>
    %113 = arith.maximumf %111, %112 : vector<8x128xf32>
    %c0_119 = arith.constant 0 : index
    %c0_120 = arith.constant 0 : index
    %114 = vector.load %arg8[%c0_119, %c0_120] : memref<8x128xf32, #tpu.memory_space<vmem>>, vector<8x128xf32>
    tpu.vector_store %arg8[%c0_119, %c0_120], %113 {strides = array<i32>} : memref<8x128xf32, #tpu.memory_space<vmem>>, vector<8x128xf32>,
    return
  }
  func.func @transform_0(%arg0: i32) -> (i32, i32, i32) {
    %c0_i32 = arith.constant 0 : i32
    %c0_i32_0 = arith.constant 0 : i32
    %c0_i32_1 = arith.constant 0 : i32
    return %c0_i32, %arg0, %c0_i32_0 : i32, i32, i32
  }
  func.func @transform_1(%arg0: i32) -> (i32, i32, i32) {
    %c0_i32 = arith.constant 0 : i32
    %c0_i32_0 = arith.constant 0 : i32
    %c0_i32_1 = arith.constant 0 : i32
    %c0_i32_2 = arith.constant 0 : i32
    return %c0_i32, %c0_i32_0, %c0_i32_1 : i32, i32, i32
  }
  func.func @transform_2(%arg0: i32) -> (i32, i32) {
    %c0_i32 = arith.constant 0 : i32
    %c0_i32_0 = arith.constant 0 : i32
    %c0_i32_1 = arith.constant 0 : i32
    return %c0_i32, %c0_i32_0 : i32, i32
  }
  func.func @transform_3(%arg0: i32) -> (i32, i32, i32) {
    %c0_i32 = arith.constant 0 : i32
    %c0_i32_0 = arith.constant 0 : i32
    %c0_i32_1 = arith.constant 0 : i32
    %c0_i32_2 = arith.constant 0 : i32
    return %c0_i32, %c0_i32_0, %c0_i32_1 : i32, i32, i32
  }
  func.func @transform_4(%arg0: i32) -> (i32, i32) {
    %c0_i32 = arith.constant 0 : i32
    %c0_i32_0 = arith.constant 0 : i32
    %c0_i32_1 = arith.constant 0 : i32
    return %c0_i32, %c0_i32_0 : i32, i32
  }
  func.func @transform_5(%arg0: i32) -> (i32, i32, i32) {
    %c0_i32 = arith.constant 0 : i32
    %c0_i32_0 = arith.constant 0 : i32
    %c0_i32_1 = arith.constant 0 : i32
    %c0_i32_2 = arith.constant 0 : i32
    return %c0_i32, %c0_i32_0, %c0_i32_1 : i32, i32, i32
  }
  func.func @transform_6(%arg0: i32) -> (i32, i32) {
    %c0_i32 = arith.constant 0 : i32
    %c0_i32_0 = arith.constant 0 : i32
    %c0_i32_1 = arith.constant 0 : i32
    return %c0_i32, %c0_i32_0 : i32, i32
  }
  func.func @transform_7(%arg0: i32) -> (i32, i32) {
    %c0_i32 = arith.constant 0 : i32
    %c0_i32_0 = arith.constant 0 : i32
    return %arg0, %c0_i32 : i32, i32
  }
}

</mosaic_0001>

<bundles_post_ra>
// kernel: roi_xconv1fc_head_forward.1
= control target key start
LH: loop header
LB: loop body
LE: loop exit
PB: predicated region body
PF: predicated region fallthrough
CT: control target
= control target key end

     0   :  { %12 = vsyncpa [#allocation4], 0  ;;  %s7065_s0 = inlined_call_operand.vmem [shape: bf16[8,8,256], index: 0, kind: input, shape index: {}]   ;;  %s7066_s1 = inlined_call_operand.hbm [shape: bf16[3,384,256], index: 1, kind: input, shape index: {}]   ;;  %s7067_s2 = inlined_call_operand.vmem [shape: f32[1,256], index: 2, kind: input, shape index: {}]   ;;  %s7068_s3 = inlined_call_operand.hbm [shape: bf16[3,384,256], index: 3, kind: input, shape index: {}]   ;;  %s7069_s4 = inlined_call_operand.vmem [shape: f32[1,256], index: 4, kind: input, shape index: {}]   ;;  %s7070_s5 = inlined_call_operand.hbm [shape: bf16[8,256,128], index: 5, kind: input, shape index: {}]   ;;  %s7071_s6 = inlined_call_operand.vmem [shape: f32[1,128], index: 6, kind: input, shape index: {}]   ;;  %s7072_s7 = inlined_call_operand.vmem [shape: f32[8,128], index: 7, kind: output, shape index: {}]  }
   0x1   :  { %13 = vsyncpa [#allocation6], 0  ;;  %s6310_s24 = smov [#allocation5]   ;;  %s6311_s26 = smov [#allocation3]  }
   0x2   :  { %s35_s25 = sshll.u32 %s6310_s24, 4  ;;  %s21_s27 = sshll.u32 %s6311_s26, 4  ;;  %s36_s25 = int_to_ptr.vmem [resolvable:$true] %s35_s25  ;;  %s22_s27 = int_to_ptr.vmem [resolvable:$true] %s21_s27 }
   0x3   :  { %s6254_s28 = scalar_lea.vmem %s36_s25, 18432  ;;  %p6259_p1 = scmp.lt.s32.totalorder %s36_s25, %s36_s25 }
   0x4   :  { %p6255_p0 = scmp.ne.s32.totalorder %s36_s25, %s6254_s28  ;;  %p6260_p2 = scmp.lt.s32.totalorder %s6254_s28, %s6254_s28 }
   0x6   :  { %p6261_p3 = por %p6260_p2, %p6259_p1 }
   0x8   :  { %p6262_p4 = pnand %p6261_p3, %p6255_p0 }
   0xa   :  { %6265 = shalt.err (!%p6262_p4)
}
   0xb   :  { %s6312_s29 = smov 128   ;;  %s6313_s30 = smov 8  }
   0xc   :  { %41 = dma.hbm_to_vmem [thread:$0]  %s7068_s3, 18432, %s36_s25, [#allocation6], %s6312_s29, %s6312_s29, %s6313_s30  }
   0xd   :  { %s6274_s10 = scalar_lea.vmem %s22_s27, 18432  ;;  %p6279_p6 = scmp.lt.s32.totalorder %s22_s27, %s22_s27 }
   0xe   :  { %p6275_p5 = scmp.ne.s32.totalorder %s22_s27, %s6274_s10  ;;  %p6280_p7 = scmp.lt.s32.totalorder %s6274_s10, %s6274_s10 }
  0x10   :  { %p6281_p8 = por %p6280_p7, %p6279_p6 }
  0x12   :  { %p6282_p9 = pnand %p6281_p8, %p6275_p5 }
  0x14   :  { %6285 = shalt.err (!%p6282_p9)
}
  0x15   :  { %27 = dma.hbm_to_vmem [thread:$0]  %s7066_s1, 18432, %s22_s27, [#allocation4], %s6312_s29, %s6312_s29, %s6313_s30  }
  0x16   :  { %s6314_s13 = smov [#allocation7]  }
  0x17   :  { %s49_s14 = sshll.u32 %s6314_s13, 4  ;;  %s50_s14 = int_to_ptr.vmem [resolvable:$true] %s49_s14 }
  0x18   :  { %s6294_s15 = scalar_lea.vmem %s50_s14, 16384  ;;  %p6299_p11 = scmp.lt.s32.totalorder %s50_s14, %s50_s14 }
  0x19   :  { %p6295_p10 = scmp.ne.s32.totalorder %s50_s14, %s6294_s15  ;;  %p6300_p12 = scmp.lt.s32.totalorder %s6294_s15, %s6294_s15 }
  0x1b   :  { %p6301_p13 = por %p6300_p12, %p6299_p11 }
  0x1d   :  { %p6302_p0 = pnand %p6301_p13, %p6295_p10 }
  0x1f   :  { %6305 = shalt.err (!%p6302_p0)
}
  0x20   :  { %s6315_s3 = smov 64   ;;  %s6316_s16 = smov 4  }
  0x21   :  { %55 = dma.hbm_to_vmem [thread:$0]  %s7070_s5, 16384, %s50_s14, [#allocation6], %s6315_s3, %s6315_s3, %s6316_s16  }
  0x22   :  { %6306 = dma.done.wait [#allocation4], 18432  }
  0x23   :  { %6307 = vsyncadd [#allocation4], 4294948864 }
  0x24   :  { %6308 = dma.done.wait [#allocation6], 34816  }
  0x25   :  { %6309 = vsyncadd [#allocation6], 4294932480  ;;  %v6317_v0 = vmov 0   ;;  %v5616_v1 = vld [vmem:[#allocation3 + $0x1f4] ss:$8 sps:$4 sm:$0xff]   ;;  %v6383_v50 = vld [vmem:[%s7065_s0] sm:$0xff] }
  0x26   :  { %636 = vmatprep.mubr.bf16.mxu1 %v6317_v0  ;;  %68 = vst [vmem:[#allocation2] sm:$0xff] %v6317_v0  ;;  %69 = vst [vmem:[#allocation2 + $0x8] sm:$0xf] %v6317_v0  ;;  %v5618_v2 = vld [vmem:[#allocation3 + $0x2f4] ss:$8 sps:$4 sm:$0xff]   ;;  %531 = vmatprep.subr.bf16.mxu0 %v5616_v1 }
  0x27   :  { %72 = vst [vmem:[#allocation2 + $0x74] sm:$0xf] %v6317_v0  ;;  %74 = vst [vmem:[#allocation2 + $0x14] sm:$0xf] %v6317_v0  ;;  %v5620_v3 = vld [vmem:[#allocation3 + $0x1f0] ss:$8 sps:$4 sm:$0xff]   ;;  %604 = vmatprep.subr.bf16.mxu1 %v5618_v2 }
  0x28   :  { %75 = vst [vmem:[#allocation2 + $0x20] sm:$0xf] %v6317_v0  ;;  %76 = vst [vmem:[#allocation2 + $0x2c] sm:$0xf] %v6317_v0  ;;  %v5621_v4 = vld [vmem:[#allocation3 + $0x2f0] ss:$8 sps:$4 sm:$0xff]   ;;  %532 = vmatpush1.bf16.msra.mxu0 %v5620_v3 }
  0x29   :  { %77 = vst [vmem:[#allocation2 + $0x38] sm:$0xf] %v6317_v0  ;;  %78 = vst [vmem:[#allocation2 + $0x44] sm:$0xf] %v6317_v0  ;;  %v5622_v5 = vld [vmem:[#allocation3 + $0x1e4] ss:$8 sps:$4 sm:$0xff]   ;;  %605 = vmatpush1.bf16.msra.mxu1 %v5621_v4 }
  0x2a   :  { %79 = vst [vmem:[#allocation2 + $0x50] sm:$0xf] %v6317_v0  ;;  %80 = vst [vmem:[#allocation2 + $0x5c] sm:$0xf] %v6317_v0  ;;  %v5624_v6 = vld [vmem:[#allocation3 + $0x2e4] ss:$8 sps:$4 sm:$0xff]   ;;  %533 = vmatprep.subr.bf16.mxu0 %v5622_v5 }
  0x2b   :  { %81 = vst [vmem:[#allocation2 + $0x68] sm:$0xf] %v6317_v0  ;;  %v5626_v7 = vld [vmem:[#allocation3 + $0x1e0] ss:$8 sps:$4 sm:$0xff]   ;;  %606 = vmatprep.subr.bf16.mxu1 %v5624_v6  ;;  %v5628_v9 = vld [vmem:[#allocation3 + $0x1d4] ss:$8 sps:$4 sm:$0xff]  }
  0x2c   :  { %v5627_v8 = vld [vmem:[#allocation3 + $0x2e0] ss:$8 sps:$4 sm:$0xff]   ;;  %v5630_v10 = vld [vmem:[#allocation3 + $0x2d4] ss:$8 sps:$4 sm:$0xff]   ;;  %v5632_v11 = vld [vmem:[#allocation3 + $0x1d0] ss:$8 sps:$4 sm:$0xff]   ;;  %534 = vmatpush1.bf16.msra.mxu0 %v5626_v7 }
  0x2d   :  { %v5633_v12 = vld [vmem:[#allocation3 + $0x2d0] ss:$8 sps:$4 sm:$0xff]   ;;  %607 = vmatpush1.bf16.msra.mxu1 %v5627_v8  ;;  %v5634_v13 = vld [vmem:[#allocation3 + $0x1c4] ss:$8 sps:$4 sm:$0xff]   ;;  %535 = vmatprep.subr.bf16.mxu0 %v5628_v9  ;;  %v5638_v15 = vld [vmem:[#allocation3 + $0x1c0] ss:$8 sps:$4 sm:$0xff]  }
  0x2e   :  { %608 = vmatprep.subr.bf16.mxu1 %v5630_v10  ;;  %v5636_v14 = vld [vmem:[#allocation3 + $0x2c4] ss:$8 sps:$4 sm:$0xff]   ;;  %v5639_v16 = vld [vmem:[#allocation3 + $0x2c0] ss:$8 sps:$4 sm:$0xff]   ;;  %v5640_v17 = vld [vmem:[#allocation3 + $0x1b4] ss:$8 sps:$4 sm:$0xff]  }
  0x2f   :  { %v5642_v18 = vld [vmem:[#allocation3 + $0x2b4] ss:$8 sps:$4 sm:$0xff]   ;;  %v5644_v19 = vld [vmem:[#allocation3 + $0x1b0] ss:$8 sps:$4 sm:$0xff]   ;;  %v5646_v21 = vld [vmem:[#allocation3 + $0x1a4] ss:$8 sps:$4 sm:$0xff]  }
  0x30   :  { %536 = vmatpush1.bf16.msra.mxu0 %v5632_v11  ;;  %v5645_v20 = vld [vmem:[#allocation3 + $0x2b0] ss:$8 sps:$4 sm:$0xff]   ;;  %v5648_v22 = vld [vmem:[#allocation3 + $0x2a4] ss:$8 sps:$4 sm:$0xff]   ;;  %v5650_v23 = vld [vmem:[#allocation3 + $0x1a0] ss:$8 sps:$4 sm:$0xff]  }
  0x31   :  { %609 = vmatpush1.bf16.msra.mxu1 %v5633_v12  ;;  %537 = vmatprep.subr.bf16.mxu0 %v5634_v13  ;;  %v5651_v24 = vld [vmem:[#allocation3 + $0x2a0] ss:$8 sps:$4 sm:$0xff]   ;;  %v5652_v25 = vld [vmem:[#allocation3 + $0x194] ss:$8 sps:$4 sm:$0xff]   ;;  %v5656_v27 = vld [vmem:[#allocation3 + $0x190] ss:$8 sps:$4 sm:$0xff]  }
  0x32   :  { %610 = vmatprep.subr.bf16.mxu1 %v5636_v14  ;;  %v5654_v26 = vld [vmem:[#allocation3 + $0x294] ss:$8 sps:$4 sm:$0xff]   ;;  %v5657_v28 = vld [vmem:[#allocation3 + $0x290] ss:$8 sps:$4 sm:$0xff]   ;;  %v5658_v29 = vld [vmem:[#allocation3 + $0x184] ss:$8 sps:$4 sm:$0xff]  }
  0x33   :  { %v5660_v30 = vld [vmem:[#allocation3 + $0x284] ss:$8 sps:$4 sm:$0xff]   ;;  %v5662_v31 = vld [vmem:[#allocation3 + $0x180] ss:$8 sps:$4 sm:$0xff]   ;;  %v5664_v33 = vld [vmem:[#allocation3 + $0x274] ss:$8 sps:$4 sm:$0xff]  }
  0x34   :  { %538 = vmatpush1.bf16.msra.mxu0 %v5638_v15  ;;  %v5663_v32 = vld [vmem:[#allocation3 + $0x280] ss:$8 sps:$4 sm:$0xff]   ;;  %v5668_v34 = vld [vmem:[#allocation3 + $0x74] ss:$8 sps:$4 sm:$0xff]   ;;  %v5666_v36 = vld [vmem:[#allocation3 + $0x70] ss:$8 sps:$4 sm:$0xff]  }
  0x35   :  { %611 = vmatpush1.bf16.msra.mxu1 %v5639_v16  ;;  %539 = vmatprep.subr.bf16.mxu0 %v5640_v17  ;;  %v5670_v35 = vld [vmem:[#allocation2 + $0x14] ss:$12 sps:$4 sm:$0xff]   ;;  %v5669_v37 = vld [vmem:[#allocation3 + $0x270] ss:$8 sps:$4 sm:$0xff]   ;;  %v5671_v38 = vld [vmem:[#allocation3 + $0x264] ss:$8 sps:$4 sm:$0xff]  }
  0x36   :  { %612 = vmatprep.subr.bf16.mxu1 %v5642_v18  ;;  %v5675_v39 = vld [vmem:[#allocation3 + $0x64] ss:$8 sps:$4 sm:$0xff]   ;;  %v5673_v40 = vld [vmem:[#allocation3 + $0x60] ss:$8 sps:$4 sm:$0xff]   ;;  %v5677_v42 = vld [vmem:[#allocation3 + $0x254] ss:$8 sps:$4 sm:$0xff]  }
  0x37   :  { %v5676_v41 = vld [vmem:[#allocation3 + $0x260] ss:$8 sps:$4 sm:$0xff]   ;;  %v5681_v43 = vld [vmem:[#allocation3 + $0x54] ss:$8 sps:$4 sm:$0xff]   ;;  %v5679_v44 = vld [vmem:[#allocation3 + $0x50] ss:$8 sps:$4 sm:$0xff]  }
  0x38   :  { %540 = vmatpush1.bf16.msra.mxu0 %v5644_v19  ;;  %v5682_v45 = vld [vmem:[#allocation3 + $0x250] ss:$8 sps:$4 sm:$0xff]   ;;  %v5683_v46 = vld [vmem:[#allocation3 + $0x244] ss:$8 sps:$4 sm:$0xff]   ;;  %v5685_v48 = vld [vmem:[#allocation3 + $0x40] ss:$8 sps:$4 sm:$0xff]  }
  0x39   :  { %613 = vmatpush1.bf16.msra.mxu1 %v5645_v20  ;;  %541 = vmatprep.subr.bf16.mxu0 %v5646_v21  ;;  %v5687_v47 = vld [vmem:[#allocation3 + $0x44] ss:$8 sps:$4 sm:$0xff]   ;;  %v5688_v49 = vld [vmem:[#allocation3 + $0x240] ss:$8 sps:$4 sm:$0xff]   ;;  %v6388_v51 = vld [vmem:[%s7065_s0 + $0x8] sm:$0xff]  ;;  %v4956_v21 = vcombine.high %v6317_v0, %v6383_v50 }
  0x3a   :  { %614 = vmatprep.subr.bf16.mxu1 %v5648_v22  ;;  %v5689_v52 = vld [vmem:[#allocation3 + $0x234] ss:$8 sps:$4 sm:$0xff]   ;;  %v4896_v54 = vcombine.high %v6383_v50, %v6388_v51  ;;  %v5691_v55 = vld [vmem:[#allocation3 + $0x30] ss:$8 sps:$4 sm:$0xff]   ;;  %v5695_v57 = vld [vmem:[#allocation3 + $0x224] ss:$8 sps:$4 sm:$0xff]   ;;  %v4895_v11 = vcombine.low %v6383_v50, %v6388_v51 }
  0x3b   :  { %v5693_v53 = vld [vmem:[#allocation3 + $0x34] ss:$8 sps:$4 sm:$0xff]   ;;  %v5694_v56 = vld [vmem:[#allocation3 + $0x230] ss:$8 sps:$4 sm:$0xff]   ;;  %v5699_v58 = vld [vmem:[#allocation3 + $0x24] ss:$8 sps:$4 sm:$0xff]  }
  0x3c   :  { %542 = vmatpush1.bf16.msra.mxu0 %v5650_v23  ;;  %563 = vmatprep.mubr.bf16.mxu0 %v4896_v54  ;;  %v5729_v59 = vld [vmem:[#allocation2 + $0x2c] ss:$12 sps:$4 sm:$0xff]   ;;  %v5703_v1 = vld [vmem:[#allocation3 + $0x10] ss:$8 sps:$4 sm:$0xff]   ;;  %v5707_v3 = vld [vmem:[#allocation3 + $0x204] ss:$8 sps:$4 sm:$0xff]  }
  0x3d   :  { %615 = vmatpush1.bf16.msra.mxu1 %v5651_v24  ;;  %543 = vmatprep.subr.bf16.mxu0 %v5652_v25  ;;  %v5697_v60 = vld [vmem:[#allocation3 + $0x20] ss:$8 sps:$4 sm:$0xff]   ;;  %v5701_v62 = vld [vmem:[#allocation3 + $0x214] ss:$8 sps:$4 sm:$0xff]   ;;  %v5706_v2 = vld [vmem:[#allocation3 + $0x210] ss:$8 sps:$4 sm:$0xff]  }
  0x3e   :  { %616 = vmatprep.subr.bf16.mxu1 %v5654_v26  ;;  %v5700_v61 = vld [vmem:[#allocation3 + $0x220] ss:$8 sps:$4 sm:$0xff]   ;;  %v5705_v63 = vld [vmem:[#allocation3 + $0x14] ss:$8 sps:$4 sm:$0xff]   ;;  %v5711_v4 = vld [vmem:[#allocation3 + $0x4] ss:$8 sps:$4 sm:$0xff]  }
  0x3f   :  { %v5744_v5 = vld [vmem:[#allocation2 + $0x44] ss:$12 sps:$4 sm:$0xff]   ;;  %v5709_v6 = vld [vmem:[#allocation3] ss:$8 sps:$4 sm:$0xff]   ;;  %v5717_v8 = vld [vmem:[#allocation3 + $0xf4] ss:$8 sps:$4 sm:$0xff]  }
  0x40   :  { %544 = vmatpush1.bf16.msra.mxu0 %v5656_v27  ;;  %v5712_v7 = vld [vmem:[#allocation3 + $0x200] ss:$8 sps:$4 sm:$0xff]   ;;  %v5720_v9 = vld [vmem:[#allocation3 + $0x174] ss:$8 sps:$4 sm:$0xff]   ;;  %v5715_v10 = vld [vmem:[#allocation3 + $0xf0] ss:$8 sps:$4 sm:$0xff]  }
  0x41   :  { %617 = vmatpush1.bf16.msra.mxu1 %v5657_v28  ;;  %545 = vmatprep.subr.bf16.mxu0 %v5658_v29  ;;  %v5718_v12 = vld [vmem:[#allocation3 + $0x170] ss:$8 sps:$4 sm:$0xff]   ;;  %v6403_v14 = vld [vmem:[%s7065_s0 + $0x18] sm:$0xff]  ;;  %v5732_v22 = vld [vmem:[#allocation3 + $0xd4] ss:$8 sps:$4 sm:$0xff]  }
  0x42   :  { %618 = vmatprep.subr.bf16.mxu1 %v5660_v30  ;;  %v6398_v13 = vld [vmem:[%s7065_s0 + $0x10] sm:$0xff]  ;;  %v5723_v15 = vld [vmem:[#allocation3 + $0xe4] ss:$8 sps:$4 sm:$0xff]   ;;  %v5721_v19 = vld [vmem:[#allocation3 + $0xe0] ss:$8 sps:$4 sm:$0xff]  }
  0x43   :  { %v5726_v16 = vld [vmem:[#allocation3 + $0x164] ss:$8 sps:$4 sm:$0xff]   ;;  %v4899_v17 = vcombine.high %v6398_v13, %v6403_v14  ;;  %v5724_v20 = vld [vmem:[#allocation3 + $0x160] ss:$8 sps:$4 sm:$0xff]   ;;  %v5735_v23 = vld [vmem:[#allocation3 + $0x154] ss:$8 sps:$4 sm:$0xff]   ;;  %v4898_v26 = vcombine.low %v6398_v13, %v6403_v14 }
  0x44   :  { %546 = vmatpush1.bf16.msra.mxu0 %v5662_v31  ;;  %v5759_v18 = vld [vmem:[#allocation2 + $0x5c] ss:$12 sps:$4 sm:$0xff]   ;;  %v6413_v25 = vld [vmem:[%s7065_s0 + $0x20] sm:$0xff] }
  0x45   :  { %619 = vmatpush1.bf16.msra.mxu1 %v5663_v32  ;;  %547 = vmatprep.subr.bf16.mxu0 %v5664_v33  ;;  %v5730_v24 = vld [vmem:[#allocation3 + $0xd0] ss:$8 sps:$4 sm:$0xff]   ;;  %v5738_v29 = vld [vmem:[#allocation3 + $0xc4] ss:$8 sps:$4 sm:$0xff]   ;;  %v5736_v32 = vld [vmem:[#allocation3 + $0xc0] ss:$8 sps:$4 sm:$0xff]  }
  0x46   :  { %981 = vmatprep.subr.bf16.mxu1 %v5668_v34  ;;  %v6420_v27 = vld [vmem:[%s7065_s0 + $0x28] sm:$0xff]  ;;  %v5741_v30 = vld [vmem:[#allocation3 + $0x144] ss:$8 sps:$4 sm:$0xff]   ;;  %v5739_v33 = vld [vmem:[#allocation3 + $0x140] ss:$8 sps:$4 sm:$0xff]  }
  0x47   :  { %v5733_v28 = vld [vmem:[#allocation3 + $0x150] ss:$8 sps:$4 sm:$0xff]   ;;  %v4902_v31 = vcombine.high %v6413_v25, %v6420_v27  ;;  %v5747_v34 = vld [vmem:[#allocation3 + $0xb4] ss:$8 sps:$4 sm:$0xff]   ;;  %v5771_v54 = vld [vmem:[#allocation3 + $0x104] ss:$8 sps:$4 sm:$0xff]  }
  0x48   :  { %637 = vmatmul.mubr.bf16.vlgmr.msra.gmra.mxu1 %v5670_v35  ;;  %548 = vmatpush2.bf16.msra.mxu0 %v5669_v37  ;;  %v5750_v35 = vld [vmem:[#allocation3 + $0x134] ss:$8 sps:$4 sm:$0xff]  }
  0x49   :  { %982 = vmatpush1.bf16.msra.mxu1 %v5666_v36  ;;  %549 = vmatprep.subr.bf16.mxu0 %v5671_v38  ;;  %v5745_v36 = vld [vmem:[#allocation3 + $0xb0] ss:$8 sps:$4 sm:$0xff]   ;;  %v4901_v38 = vcombine.low %v6413_v25, %v6420_v27 }
  0x4a   :  { %983 = vmatprep.subr.bf16.mxu1 %v5675_v39  ;;  %646 = vmatprep.mubr.bf16.mxu1 %v6317_v0  ;;  %v6427_v37 = vld [vmem:[%s7065_s0 + $0x30] sm:$0xff]  ;;  %v6434_v39 = vld [vmem:[%s7065_s0 + $0x38] sm:$0xff] }
  0x4c   :  { %550 = vmatpush2.bf16.msra.mxu0 %v5676_v41  ;;  %v5753_v41 = vld [vmem:[#allocation3 + $0xa4] ss:$8 sps:$4 sm:$0xff]  }
  0x4d   :  { %984 = vmatpush1.bf16.msra.mxu1 %v5673_v40  ;;  %551 = vmatprep.subr.bf16.mxu0 %v5677_v42  ;;  %v5748_v40 = vld [vmem:[#allocation3 + $0x130] ss:$8 sps:$4 sm:$0xff]   ;;  %v5756_v42 = vld [vmem:[#allocation3 + $0x124] ss:$8 sps:$4 sm:$0xff]  }
  0x4e   :  { %985 = vmatprep.subr.bf16.mxu1 %v5681_v43  ;;  %v5751_v43 = vld [vmem:[#allocation3 + $0xa0] ss:$8 sps:$4 sm:$0xff]  }
  0x50   :  { %552 = vmatpush2.bf16.msra.mxu0 %v5682_v45  ;;  %647 = vmatmul.mubr.bf16.gmra.mxu1 %v5729_v59  ;;  %v5754_v45 = vld [vmem:[#allocation3 + $0x120] ss:$8 sps:$4 sm:$0xff]   ;;  %v4955_v59 = vcombine.low %v6317_v0, %v6383_v50  ;;  %v5783_v50 = vld [vmem:[#allocation3 + $0x354] ss:$8 sps:$4 sm:$0xff]  }
  0x51   :  { %986 = vmatpush1.bf16.msra.mxu1 %v5679_v44  ;;  %553 = vmatprep.subr.bf16.mxu0 %v5683_v46  ;;  %v4905_v44 = vcombine.high %v6427_v37, %v6434_v39  ;;  %v5762_v46 = vld [vmem:[#allocation3 + $0x94] ss:$8 sps:$4 sm:$0xff]  }
  0x52   :  { %987 = vmatprep.subr.bf16.mxu1 %v5687_v47  ;;  %656 = vmatprep.mubr.bf16.mxu1 %v6317_v0  ;;  %v5765_v47 = vld [vmem:[#allocation3 + $0x114] ss:$8 sps:$4 sm:$0xff]  }
  0x54   :  { %554 = vmatpush2.bf16.msra.mxu0 %v5688_v49  ;;  %v5760_v49 = vld [vmem:[#allocation3 + $0x90] ss:$8 sps:$4 sm:$0xff]  }
  0x55   :  { %988 = vmatpush1.bf16.msra.mxu1 %v5685_v48  ;;  %555 = vmatprep.subr.bf16.mxu0 %v5689_v52  ;;  %v4904_v48 = vcombine.low %v6427_v37, %v6434_v39  ;;  %v5763_v52 = vld [vmem:[#allocation3 + $0x110] ss:$8 sps:$4 sm:$0xff]  }
  0x56   :  { %989 = vmatprep.subr.bf16.mxu1 %v5693_v53  ;;  %v5768_v53 = vld [vmem:[#allocation3 + $0x84] ss:$8 sps:$4 sm:$0xff]  }
  0x58   :  { %556 = vmatpush2.bf16.msra.mxu0 %v5694_v56  ;;  %657 = vmatmul.mubr.bf16.gmra.mxu1 %v5744_v5  ;;  %v5769_v56 = vld [vmem:[#allocation3 + $0x100] ss:$8 sps:$4 sm:$0xff]   ;;  %v6451_v5 = vcombine.low %v6388_v51, %v6398_v13 }
  0x59   :  { %990 = vmatpush1.bf16.msra.mxu1 %v5691_v55  ;;  %557 = vmatprep.subr.bf16.mxu0 %v5695_v57  ;;  %v5766_v55 = vld [vmem:[#allocation3 + $0x80] ss:$8 sps:$4 sm:$0xff]   ;;  %v5775_v57 = vld [vmem:[#allocation3 + $0x374] ss:$8 sps:$4 sm:$0xff]  }
  0x5a   :  { %991 = vmatprep.subr.bf16.mxu1 %v5699_v58  ;;  %666 = vmatprep.mubr.bf16.mxu1 %v6317_v0  ;;  %v5805_v58 = vld [vmem:[#allocation3 + $0x474] ss:$8 sps:$4 sm:$0xff]  }
  0x5c   :  { %558 = vmatpush2.bf16.msra.mxu0 %v5700_v61  ;;  %v5773_v61 = vld [vmem:[#allocation3 + $0x370] ss:$8 sps:$4 sm:$0xff]  }
  0x5d   :  { %992 = vmatpush1.bf16.msra.mxu1 %v5697_v60  ;;  %559 = vmatprep.subr.bf16.mxu0 %v5701_v62  ;;  %v5772_v60 = vld [vmem:[#allocation2 + $0x8] ss:$12 sps:$4 sm:$0xff]   ;;  %v6445_v62 = vcombine.high %v6388_v51, %v6398_v13  ;;  %v5823_v51 = vld [vmem:[#allocation3 + $0x444] ss:$8 sps:$4 sm:$0xff]  }
  0x5e   :  { %993 = vmatprep.subr.bf16.mxu1 %v5705_v63  ;;  %v5778_v63 = vld [vmem:[#allocation3 + $0x364] ss:$8 sps:$4 sm:$0xff]   ;;  %v5792_v13 = vld [vmem:[#allocation3 + $0x334] ss:$8 sps:$4 sm:$0xff]  }
  0x60   :  { %560 = vmatpush2.bf16.msra.mxu0 %v5706_v2  ;;  %667 = vmatmul.mubr.bf16.gmra.mxu1 %v5759_v18  ;;  %v5811_v2 = vld [vmem:[#allocation3 + $0x464] ss:$8 sps:$4 sm:$0xff]  }
  0x61   :  { %994 = vmatpush1.bf16.msra.mxu1 %v5703_v1  ;;  %561 = vmatprep.subr.bf16.mxu0 %v5707_v3  ;;  %v5803_v1 = vld [vmem:[#allocation3 + $0x470] ss:$8 sps:$4 sm:$0xff]   ;;  %v5776_v3 = vld [vmem:[#allocation3 + $0x360] ss:$8 sps:$4 sm:$0xff]   ;;  %v5796_v18 = vld [vmem:[#allocation3 + $0x324] ss:$8 sps:$4 sm:$0xff]  }
  0x62   :  { %995 = vmatprep.subr.bf16.mxu1 %v5711_v4  ;;  %1013 = vmatprep.mubr.bf16.mxu1 %v4956_v21  ;;  %v5809_v4 = vld [vmem:[#allocation3 + $0x460] ss:$8 sps:$4 sm:$0xff]   ;;  %v5829_v21 = vld [vmem:[#allocation3 + $0x434] ss:$8 sps:$4 sm:$0xff]  }
  0x64   :  { %562 = vmatpush2.bf16.msra.mxu0 %v5712_v7  ;;  %v5781_v7 = vld [vmem:[#allocation3 + $0x350] ss:$8 sps:$4 sm:$0xff]  }
  0x65   :  { %996 = vmatpush1.bf16.msra.mxu1 %v5709_v6  ;;  %1054 = vmatprep.subr.bf16.mxu0 %v5720_v9  ;;  %v5784_v6 = vld [vmem:[#allocation2 + $0x20] ss:$12 sps:$4 sm:$0xff]   ;;  %v5787_v9 = vld [vmem:[#allocation3 + $0x344] ss:$8 sps:$4 sm:$0xff]  }
  0x66   :  { %997 = vmatprep.subr.bf16.mxu1 %v5717_v8  ;;  %v6455_v8 = vcombine.high %v6403_v14, %v6413_v25 }
  0x67   :  { %564 = vmatmul.mubr.bf16.vlgmr.msra.gmra.mxu0 %v4895_v11  ;;  %v5785_v11 = vld [vmem:[#allocation3 + $0x340] ss:$8 sps:$4 sm:$0xff]  }
  0x68   :  { %1055 = vmatpush1.bf16.msra.mxu0 %v5718_v12  ;;  %573 = vmatprep.mubr.bf16.mxu0 %v4899_v17  ;;  %v5815_v12 = vld [vmem:[#allocation3 + $0x450] ss:$8 sps:$4 sm:$0xff]   ;;  %v6462_v17 = vcombine.low %v6403_v14, %v6413_v25 }
  0x69   :  { %998 = vmatpush2.bf16.msra.mxu1 %v5715_v10  ;;  %1056 = vmatprep.subr.bf16.mxu0 %v5726_v16  ;;  %v5817_v10 = vld [vmem:[#allocation3 + $0x454] ss:$8 sps:$4 sm:$0xff]   ;;  %v5793_v16 = vld [vmem:[#allocation2 + $0x38] ss:$12 sps:$4 sm:$0xff]   ;;  %v5827_v14 = vld [vmem:[#allocation3 + $0x430] ss:$8 sps:$4 sm:$0xff]  }
  0x6a   :  { %999 = vmatprep.subr.bf16.mxu1 %v5723_v15  ;;  %v5790_v15 = vld [vmem:[#allocation3 + $0x330] ss:$8 sps:$4 sm:$0xff]  }
  0x6b   :  { %v5799_v25 = vld [vmem:[#allocation3 + $0x310] ss:$8 sps:$4 sm:$0xff]  }
  0x6c   :  { %1057 = vmatpush1.bf16.msra.mxu0 %v5724_v20  ;;  %v5821_v20 = vld [vmem:[#allocation3 + $0x440] ss:$8 sps:$4 sm:$0xff]  }
  0x6d   :  { %1000 = vmatpush2.bf16.msra.mxu1 %v5721_v19  ;;  %1058 = vmatprep.subr.bf16.mxu0 %v5735_v23  ;;  %v6466_v19 = vcombine.high %v6420_v27, %v6427_v37  ;;  %v5801_v23 = vld [vmem:[#allocation3 + $0x314] ss:$8 sps:$4 sm:$0xff]  }
  0x6e   :  { %1001 = vmatprep.subr.bf16.mxu1 %v5732_v22  ;;  %v5794_v22 = vld [vmem:[#allocation3 + $0x320] ss:$8 sps:$4 sm:$0xff]  }
  0x6f   :  { %574 = vmatmul.mubr.bf16.gmra.mxu0 %v4898_v26  ;;  %v5835_v26 = vld [vmem:[#allocation3 + $0x424] ss:$8 sps:$4 sm:$0xff]  }
  0x70   :  { %1059 = vmatpush1.bf16.msra.mxu0 %v5733_v28  ;;  %583 = vmatprep.mubr.bf16.mxu0 %v4902_v31  ;;  %v6473_v28 = vcombine.low %v6420_v27, %v6427_v37  ;;  %v5841_v31 = vld [vmem:[#allocation3 + $0x414] ss:$8 sps:$4 sm:$0xff]   ;;  %v5812_v27 = vld [vmem:[#allocation3 + $0x3f0] ss:$8 sps:$4 sm:$0xff]   ;;  %v5845_v37 = vld [vmem:[#allocation3 + $0x400] ss:$8 sps:$4 sm:$0xff]  }
  0x71   :  { %1002 = vmatpush2.bf16.msra.mxu1 %v5730_v24  ;;  %1060 = vmatprep.subr.bf16.mxu0 %v5741_v30  ;;  %v5802_v24 = vld [vmem:[#allocation2 + $0x50] ss:$12 sps:$4 sm:$0xff]   ;;  %v5833_v30 = vld [vmem:[#allocation3 + $0x420] ss:$8 sps:$4 sm:$0xff]  }
  0x72   :  { %1003 = vmatprep.subr.bf16.mxu1 %v5738_v29  ;;  %v5808_v29 = vld [vmem:[#allocation3 + $0x304] ss:$8 sps:$4 sm:$0xff]  }
  0x74   :  { %1061 = vmatpush1.bf16.msra.mxu0 %v5739_v33  ;;  %v5839_v33 = vld [vmem:[#allocation3 + $0x410] ss:$8 sps:$4 sm:$0xff]  }
  0x75   :  { %1004 = vmatpush2.bf16.msra.mxu1 %v5736_v32  ;;  %1062 = vmatprep.subr.bf16.mxu0 %v5750_v35  ;;  %v5806_v32 = vld [vmem:[#allocation3 + $0x300] ss:$8 sps:$4 sm:$0xff]  }
  0x76   :  { %1005 = vmatprep.subr.bf16.mxu1 %v5747_v34  ;;  %v5847_v34 = vld [vmem:[#allocation3 + $0x404] ss:$8 sps:$4 sm:$0xff]  }
  0x77   :  { %584 = vmatmul.mubr.bf16.gmra.mxu0 %v4901_v38  ;;  %v6476_v35 = vld [vmem:[#allocation2] sm:$0xff] }
  0x78   :  { %1063 = vmatpush1.bf16.msra.mxu0 %v5748_v40  ;;  %593 = vmatprep.mubr.bf16.mxu0 %v4905_v44  ;;  %v5818_v38 = vld [vmem:[#allocation3 + $0x3e0] ss:$8 sps:$4 sm:$0xff]   ;;  %v5826_v40 = vld [vmem:[#allocation3 + $0x3d4] ss:$8 sps:$4 sm:$0xff]  }
  0x79   :  { %1006 = vmatpush2.bf16.msra.mxu1 %v5745_v36  ;;  %1064 = vmatprep.subr.bf16.mxu0 %v5756_v42  ;;  %v5820_v36 = vld [vmem:[#allocation3 + $0x3e4] ss:$8 sps:$4 sm:$0xff]   ;;  %v5824_v42 = vld [vmem:[#allocation3 + $0x3d0] ss:$8 sps:$4 sm:$0xff]   ;;  %v5830_v44 = vld [vmem:[#allocation3 + $0x3c0] ss:$8 sps:$4 sm:$0xff]  }
  0x7a   :  { %1007 = vmatprep.subr.bf16.mxu1 %v5753_v41  ;;  %v5851_v41 = vld [vmem:[#allocation2 + $0x20] ss:$12 sps:$4 sm:$0xff]  }
  0x7c   :  { %1065 = vmatpush1.bf16.msra.mxu0 %v5754_v45  ;;  %v5838_v45 = vld [vmem:[#allocation3 + $0x3b4] ss:$8 sps:$4 sm:$0xff]  }
  0x7d   :  { %1008 = vmatpush2.bf16.msra.mxu1 %v5751_v43  ;;  %1066 = vmatprep.subr.bf16.mxu0 %v5765_v47  ;;  %v5832_v43 = vld [vmem:[#allocation3 + $0x3c4] ss:$8 sps:$4 sm:$0xff]   ;;  %v5836_v47 = vld [vmem:[#allocation3 + $0x3b0] ss:$8 sps:$4 sm:$0xff]  }
  0x7e   :  { %1009 = vmatprep.subr.bf16.mxu1 %v5762_v46  ;;  %v5855_v46 = vld [vmem:[#allocation2 + $0x38] ss:$12 sps:$4 sm:$0xff]  }
  0x7f   :  { %594 = vmatmul.mubr.bf16.gmra.mxu0 %v4904_v48  ;;  %v5844_v48 = vld [vmem:[#allocation3 + $0x3a4] ss:$8 sps:$4 sm:$0xff]  }
  0x80   :  { %1067 = vmatpush1.bf16.msra.mxu0 %v5763_v52  ;;  %1086 = vmatprep.mubr.bf16.mxu0 %v6317_v0  ;;  %v5850_v52 = vld [vmem:[#allocation3 + $0x394] ss:$8 sps:$4 sm:$0xff]  }
  0x81   :  { %1010 = vmatpush2.bf16.msra.mxu1 %v5760_v49  ;;  %1068 = vmatprep.subr.bf16.mxu0 %v5771_v54  ;;  %v5842_v49 = vld [vmem:[#allocation3 + $0x3a0] ss:$8 sps:$4 sm:$0xff]   ;;  %v5848_v54 = vld [vmem:[#allocation3 + $0x390] ss:$8 sps:$4 sm:$0xff]  }
  0x82   :  { %1011 = vmatprep.subr.bf16.mxu1 %v5768_v53  ;;  %v5856_v53 = vld [vmem:[#allocation2 + $0x50] ss:$12 sps:$4 sm:$0xff]  }
  0x84   :  { %1069 = vmatpush1.bf16.msra.mxu0 %v5769_v56  ;;  %v5852_v56 = vld [vmem:[#allocation3 + $0x380] ss:$8 sps:$4 sm:$0xff]  }
  0x85   :  { %1012 = vmatpush2.bf16.msra.mxu1 %v5766_v55  ;;  %1497 = vmatprep.subr.bf16.mxu0 %v5775_v57  ;;  %v5854_v55 = vld [vmem:[#allocation3 + $0x384] ss:$8 sps:$4 sm:$0xff]   ;;  %v5857_v57 = vld [vmem:[#allocation2 + $0x68] ss:$12 sps:$4 sm:$0xff]  }
  0x86   :  { %1570 = vmatprep.subr.bf16.mxu1 %v5805_v58  ;;  %v5860_v58 = vld [vmem:[#allocation5 + $0x2f4] ss:$8 sps:$4 sm:$0xff]  }
  0x87   :  { %1087 = vmatmul.mubr.bf16.vlgmr.msra.gmra.mxu0 %v5772_v60  ;;  %v5863_v60 = vld [vmem:[#allocation5 + $0x2e4] ss:$8 sps:$4 sm:$0xff]  }
  0x88   :  { %1014 = vmatmul.mubr.bf16.vlgmr.msra.gmra.mxu1 %v4955_v59  ;;  %1498 = vmatpush1.bf16.msra.mxu0 %v5773_v61  ;;  %v5858_v59 = vld [vmem:[#allocation5 + $0x2f0] ss:$8 sps:$4 sm:$0xff]   ;;  %v5861_v61 = vld [vmem:[#allocation5 + $0x2e0] ss:$8 sps:$4 sm:$0xff]  }
  0x89   :  { %1023 = vmatprep.mubr.bf16.mxu1 %v6445_v62  ;;  %1499 = vmatprep.subr.bf16.mxu0 %v5778_v63  ;;  %v5864_v63 = vld [vmem:[#allocation5 + $0x2d0] ss:$8 sps:$4 sm:$0xff]  }
  0x8a   :  { %1096 = vmatprep.mubr.bf16.mxu0 %v6317_v0  ;;  %1571 = vmatpush1.bf16.msra.mxu1 %v5803_v1  ;;  %v5869_v1 = vld [vmem:[#allocation5 + $0x2c4] ss:$8 sps:$4 sm:$0xff]  }
  0x8b   :  { %1572 = vmatprep.subr.bf16.mxu1 %v5811_v2  ;;  %v5867_v2 = vld [vmem:[#allocation5 + $0x2c0] ss:$8 sps:$4 sm:$0xff]  }
  0x8c   :  { %1500 = vmatpush1.bf16.msra.mxu0 %v5776_v3  ;;  %v5872_v3 = vld [vmem:[#allocation5 + $0x2b4] ss:$8 sps:$4 sm:$0xff]  }
  0x8d   :  { %1501 = vmatprep.subr.bf16.mxu0 %v5783_v50  ;;  %v5870_v50 = vld [vmem:[#allocation5 + $0x2b0] ss:$8 sps:$4 sm:$0xff]  }
  0x8e   :  { %1573 = vmatpush1.bf16.msra.mxu1 %v5809_v4  ;;  %v5025_v4 = vcombine.high %v6434_v39, %v6476_v35 }
  0x8f   :  { %1097 = vmatmul.mubr.bf16.gmra.mxu0 %v5784_v6  ;;  %1574 = vmatprep.subr.bf16.mxu1 %v5817_v10  ;;  %v5873_v6 = vld [vmem:[#allocation5 + $0x2a0] ss:$8 sps:$4 sm:$0xff]   ;;  %v5876_v10 = vld [vmem:[#allocation5 + $0x290] ss:$8 sps:$4 sm:$0xff]  }
  0x90   :  { %1024 = vmatmul.mubr.bf16.gmra.mxu1 %v6451_v5  ;;  %1502 = vmatpush1.bf16.msra.mxu0 %v5781_v7  ;;  %v5888_v7 = vld [vmem:[#allocation5 + $0x1f4] ss:$8 sps:$4 sm:$0xff]  }
  0x91   :  { %1033 = vmatprep.mubr.bf16.mxu1 %v6455_v8  ;;  %1503 = vmatprep.subr.bf16.mxu0 %v5787_v9  ;;  %v5886_v9 = vld [vmem:[#allocation5 + $0x1f0] ss:$8 sps:$4 sm:$0xff]  }
  0x92   :  { %1106 = vmatprep.mubr.bf16.mxu0 %v6317_v0  ;;  %1575 = vmatpush1.bf16.msra.mxu1 %v5815_v12  ;;  %v5894_v12 = vld [vmem:[#allocation5 + $0x1e4] ss:$8 sps:$4 sm:$0xff]  }
  0x93   :  { %1576 = vmatprep.subr.bf16.mxu1 %v5823_v51  ;;  %v5881_v51 = vld [vmem:[#allocation5 + $0x284] ss:$8 sps:$4 sm:$0xff]  }
  0x94   :  { %1504 = vmatpush1.bf16.msra.mxu0 %v5785_v11  ;;  %v5024_v11 = vcombine.low %v6434_v39, %v6476_v35  ;;  %v5906_v39 = vld [vmem:[#allocation5 + $0x1c4] ss:$8 sps:$4 sm:$0xff]  }
  0x95   :  { %1505 = vmatprep.subr.bf16.mxu0 %v5792_v13  ;;  %v5892_v13 = vld [vmem:[#allocation5 + $0x1e0] ss:$8 sps:$4 sm:$0xff]  }
  0x96   :  { %1577 = vmatpush1.bf16.msra.mxu1 %v5821_v20  ;;  %v5885_v20 = vld [vmem:[#allocation2 + $0x14] ss:$12 sps:$4 sm:$0xff]  }
  0x97   :  { %1107 = vmatmul.mubr.bf16.gmra.mxu0 %v5793_v16  ;;  %1578 = vmatprep.subr.bf16.mxu1 %v5829_v21  ;;  %v5900_v16 = vld [vmem:[#allocation5 + $0x1d4] ss:$8 sps:$4 sm:$0xff]   ;;  %v5891_v21 = vld [vmem:[#allocation5 + $0x64] ss:$8 sps:$4 sm:$0xff]  }
  0x98   :  { %1034 = vmatmul.mubr.bf16.gmra.mxu1 %v6462_v17  ;;  %1506 = vmatpush1.bf16.msra.mxu0 %v5790_v15  ;;  %v5879_v15 = vld [vmem:[#allocation5 + $0x280] ss:$8 sps:$4 sm:$0xff]  }
  0x99   :  { %1043 = vmatprep.mubr.bf16.mxu1 %v6466_v19  ;;  %1507 = vmatprep.subr.bf16.mxu0 %v5796_v18  ;;  %v5898_v18 = vld [vmem:[#allocation5 + $0x1d0] ss:$8 sps:$4 sm:$0xff]  }
  0x9a   :  { %1116 = vmatprep.mubr.bf16.mxu0 %v6317_v0  ;;  %1579 = vmatpush1.bf16.msra.mxu1 %v5827_v14  ;;  %v5814_v0 = vld [vmem:[#allocation3 + $0x3f4] ss:$8 sps:$4 sm:$0xff]   ;;  %v5910_v14 = vld [vmem:[#allocation5 + $0x1b0] ss:$8 sps:$4 sm:$0xff]  }
  0x9b   :  { %1580 = vmatprep.subr.bf16.mxu1 %v5835_v26  ;;  %v5918_v26 = vld [vmem:[#allocation5 + $0x1a4] ss:$8 sps:$4 sm:$0xff]  }
  0x9c   :  { %1508 = vmatpush1.bf16.msra.mxu0 %v5794_v22  ;;  %v5904_v22 = vld [vmem:[#allocation5 + $0x1c0] ss:$8 sps:$4 sm:$0xff]  }
  0x9d   :  { %1509 = vmatprep.subr.bf16.mxu0 %v5801_v23  ;;  %v5889_v23 = vld [vmem:[#allocation5 + $0x60] ss:$8 sps:$4 sm:$0xff]  }
  0x9e   :  { %1581 = vmatpush1.bf16.msra.mxu1 %v5833_v30  ;;  %v5924_v30 = vld [vmem:[#allocation5 + $0x194] ss:$8 sps:$4 sm:$0xff]  }
  0x9f   :  { %1117 = vmatmul.mubr.bf16.gmra.mxu0 %v5802_v24  ;;  %1582 = vmatprep.subr.bf16.mxu1 %v5841_v31  ;;  %v5912_v24 = vld [vmem:[#allocation5 + $0x1b4] ss:$8 sps:$4 sm:$0xff]   ;;  %v5903_v31 = vld [vmem:[#allocation5 + $0x44] ss:$8 sps:$4 sm:$0xff]  }
  0xa0   :  { %1044 = vmatmul.mubr.bf16.gmra.mxu1 %v6473_v28  ;;  %1510 = vmatpush1.bf16.msra.mxu0 %v5799_v25  ;;  %v5897_v25 = vld [vmem:[#allocation5 + $0x54] ss:$8 sps:$4 sm:$0xff]  }
  0xa1   :  { %1511 = vmatprep.subr.bf16.mxu0 %v5808_v29  ;;  %1602 = vmatprep.mubr.bf16.mxu1 %v6476_v35  ;;  %v5895_v29 = vld [vmem:[#allocation5 + $0x50] ss:$8 sps:$4 sm:$0xff]  }
  0xa2   :  { %1529 = vmatprep.mubr.bf16.mxu0 %v6445_v62  ;;  %1583 = vmatpush1.bf16.msra.mxu1 %v5839_v33  ;;  %v5866_v62 = vld [vmem:[#allocation5 + $0x2d4] ss:$8 sps:$4 sm:$0xff]   ;;  %v5930_v33 = vld [vmem:[#allocation5 + $0x184] ss:$8 sps:$4 sm:$0xff]  }
  0xa3   :  { %1584 = vmatprep.subr.bf16.mxu1 %v5847_v34  ;;  %v5909_v34 = vld [vmem:[#allocation5 + $0x34] ss:$8 sps:$4 sm:$0xff]  }
  0xa4   :  { %1512 = vmatpush1.bf16.msra.mxu0 %v5806_v32  ;;  %v5901_v32 = vld [vmem:[#allocation5 + $0x40] ss:$8 sps:$4 sm:$0xff]  }
  0xa5   :  { %1513 = vmatprep.subr.bf16.mxu0 %v5814_v0  ;;  %v5922_v0 = vld [vmem:[#allocation5 + $0x190] ss:$8 sps:$4 sm:$0xff]  }
  0xa6   :  { %1585 = vmatpush1.bf16.msra.mxu1 %v5845_v37  ;;  %v5936_v37 = vld [vmem:[#allocation5 + $0x274] ss:$8 sps:$4 sm:$0xff]  }
  0xa7   :  { %2208 = vmatprep.subr.bf16.mxu1 %v5888_v7 }
  0xa8   :  { %1514 = vmatpush2.bf16.msra.mxu0 %v5812_v27  ;;  %v5928_v27 = vld [vmem:[#allocation5 + $0x180] ss:$8 sps:$4 sm:$0xff]  }
  0xa9   :  { %1515 = vmatprep.subr.bf16.mxu0 %v5820_v36  ;;  %1603 = vmatmul.mubr.bf16.vlgmr.msra.gmra.mxu1 %v5851_v41  ;;  %v5907_v36 = vld [vmem:[#allocation5 + $0x30] ss:$8 sps:$4 sm:$0xff]   ;;  %v5913_v41 = vld [vmem:[#allocation5 + $0x20] ss:$8 sps:$4 sm:$0xff]  }
  0xaa   :  { %1612 = vmatprep.mubr.bf16.mxu1 %v6476_v35  ;;  %2209 = vmatpush1.bf16.msra.mxu1 %v5886_v9  ;;  %v5973_v9 = vld [vmem:[#allocation5 + $0x210] ss:$8 sps:$4 sm:$0xff]  }
  0xab   :  { %2210 = vmatprep.subr.bf16.mxu1 %v5894_v12  ;;  %v5981_v12 = vld [vmem:[#allocation5 + $0x204] ss:$8 sps:$4 sm:$0xff]  }
  0xac   :  { %1516 = vmatpush2.bf16.msra.mxu0 %v5818_v38  ;;  %v5915_v38 = vld [vmem:[#allocation5 + $0x24] ss:$8 sps:$4 sm:$0xff]  }
  0xad   :  { %1517 = vmatprep.subr.bf16.mxu0 %v5826_v40  ;;  %v5934_v40 = vld [vmem:[#allocation5 + $0x270] ss:$8 sps:$4 sm:$0xff]  }
  0xae   :  { %2211 = vmatpush1.bf16.msra.mxu1 %v5892_v13  ;;  %v5979_v13 = vld [vmem:[#allocation5 + $0x200] ss:$8 sps:$4 sm:$0xff]  }
  0xaf   :  { %2212 = vmatprep.subr.bf16.mxu1 %v5900_v16 }
  0xb0   :  { %1518 = vmatpush2.bf16.msra.mxu0 %v5824_v42  ;;  %v5942_v42 = vld [vmem:[#allocation5 + $0x264] ss:$8 sps:$4 sm:$0xff]  }
  0xb1   :  { %1519 = vmatprep.subr.bf16.mxu0 %v5832_v43  ;;  %1613 = vmatmul.mubr.bf16.gmra.mxu1 %v5855_v46  ;;  %v5921_v43 = vld [vmem:[#allocation5 + $0x14] ss:$8 sps:$4 sm:$0xff]   ;;  %v5927_v46 = vld [vmem:[#allocation5 + $0x4] ss:$8 sps:$4 sm:$0xff]  }
  0xb2   :  { %1622 = vmatprep.mubr.bf16.mxu1 %v6476_v35  ;;  %2213 = vmatpush1.bf16.msra.mxu1 %v5898_v18 }
  0xb3   :  { %2214 = vmatprep.subr.bf16.mxu1 %v5906_v39 }
  0xb4   :  { %1520 = vmatpush2.bf16.msra.mxu0 %v5830_v44  ;;  %v5940_v44 = vld [vmem:[#allocation5 + $0x260] ss:$8 sps:$4 sm:$0xff]  }
  0xb5   :  { %1521 = vmatprep.subr.bf16.mxu0 %v5838_v45  ;;  %v5919_v45 = vld [vmem:[#allocation5 + $0x10] ss:$8 sps:$4 sm:$0xff]  }
  0xb6   :  { %2215 = vmatpush1.bf16.msra.mxu1 %v5904_v22  ;;  %v5976_v22 = vld [vmem:[#allocation5 + $0x80] ss:$8 sps:$4 sm:$0xff]  }
  0xb7   :  { %2216 = vmatprep.subr.bf16.mxu1 %v5912_v24 }
  0xb8   :  { %1522 = vmatpush2.bf16.msra.mxu0 %v5836_v47  ;;  %v5943_v47 = vld [vmem:[#allocation2 + $0x2c] ss:$12 sps:$4 sm:$0xff]  }
  0xb9   :  { %1523 = vmatprep.subr.bf16.mxu0 %v5844_v48  ;;  %1623 = vmatmul.mubr.bf16.gmra.mxu1 %v5856_v53  ;;  %v5925_v48 = vld [vmem:[#allocation5] ss:$8 sps:$4 sm:$0xff]   ;;  %v5947_v53 = vld [vmem:[#allocation5 + $0x250] ss:$8 sps:$4 sm:$0xff]  }
  0xba   :  { %1632 = vmatprep.mubr.bf16.mxu1 %v6476_v35  ;;  %2217 = vmatpush1.bf16.msra.mxu1 %v5910_v14 }
  0xbb   :  { %2218 = vmatprep.subr.bf16.mxu1 %v5918_v26 }
  0xbc   :  { %1524 = vmatpush2.bf16.msra.mxu0 %v5842_v49  ;;  %v5949_v49 = vld [vmem:[#allocation5 + $0x254] ss:$8 sps:$4 sm:$0xff]  }
  0xbd   :  { %1525 = vmatprep.subr.bf16.mxu0 %v5850_v52  ;;  %v5933_v52 = vld [vmem:[#allocation5 + $0xf4] ss:$8 sps:$4 sm:$0xff]  }
  0xc0   :  { %1526 = vmatpush2.bf16.msra.mxu0 %v5848_v54  ;;  %v5931_v54 = vld [vmem:[#allocation5 + $0xf0] ss:$8 sps:$4 sm:$0xff]  }
  0xc1   :  { %1527 = vmatprep.subr.bf16.mxu0 %v5854_v55  ;;  %1633 = vmatmul.mubr.bf16.gmra.mxu1 %v5857_v57  ;;  %v5955_v55 = vld [vmem:[#allocation5 + $0x244] ss:$8 sps:$4 sm:$0xff]   ;;  %v5953_v57 = vld [vmem:[#allocation5 + $0x240] ss:$8 sps:$4 sm:$0xff]  }
  0xc4   :  { %1528 = vmatpush2.bf16.msra.mxu0 %v5852_v56  ;;  %v5939_v56 = vld [vmem:[#allocation5 + $0xe4] ss:$8 sps:$4 sm:$0xff]  }
  0xc5   :  { %2281 = vmatprep.subr.bf16.mxu0 %v5860_v58  ;;  %v5956_v58 = vld [vmem:[#allocation2 + $0x44] ss:$12 sps:$4 sm:$0xff]  }
  0xc7   :  { %1530 = vmatmul.mubr.bf16.vlgmr.msra.gmra.mxu0 %v6451_v5  ;;  %v5875_v5 = vld [vmem:[#allocation5 + $0x2a4] ss:$8 sps:$4 sm:$0xff]  }
  0xc8   :  { %1539 = vmatprep.mubr.bf16.mxu0 %v6455_v8  ;;  %2282 = vmatpush1.bf16.msra.mxu0 %v5858_v59  ;;  %v5878_v8 = vld [vmem:[#allocation5 + $0x294] ss:$8 sps:$4 sm:$0xff]   ;;  %v5937_v59 = vld [vmem:[#allocation5 + $0xe0] ss:$8 sps:$4 sm:$0xff]  }
  0xc9   :  { %2283 = vmatprep.subr.bf16.mxu0 %v5863_v60  ;;  %v5946_v60 = vld [vmem:[#allocation5 + $0xd4] ss:$8 sps:$4 sm:$0xff]  }
  0xcc   :  { %2284 = vmatpush1.bf16.msra.mxu0 %v5861_v61  ;;  %v5962_v61 = vld [vmem:[#allocation5 + $0x234] ss:$8 sps:$4 sm:$0xff]  }
  0xcd   :  { %2285 = vmatprep.subr.bf16.mxu0 %v5866_v62  ;;  %v5944_v62 = vld [vmem:[#allocation5 + $0xd0] ss:$8 sps:$4 sm:$0xff]  }
  0xcf   :  { %1540 = vmatmul.mubr.bf16.gmra.mxu0 %v6462_v17  ;;  %v5884_v17 = vld [vmem:[#allocation5 + $0x74] ss:$8 sps:$4 sm:$0xff]  }
  0xd0   :  { %1549 = vmatprep.mubr.bf16.mxu0 %v6466_v19  ;;  %2286 = vmatpush1.bf16.msra.mxu0 %v5864_v63  ;;  %v5882_v19 = vld [vmem:[#allocation5 + $0x70] ss:$8 sps:$4 sm:$0xff]  }
  0xd1   :  { %2287 = vmatprep.subr.bf16.mxu0 %v5869_v1  ;;  %v5960_v63 = vld [vmem:[#allocation5 + $0x230] ss:$8 sps:$4 sm:$0xff]   ;;  %v5952_v1 = vld [vmem:[#allocation5 + $0xc4] ss:$8 sps:$4 sm:$0xff]  }
  0xd4   :  { %2288 = vmatpush1.bf16.msra.mxu0 %v5867_v2 }
  0xd5   :  { %2289 = vmatprep.subr.bf16.mxu0 %v5872_v3  ;;  %v5968_v3 = vld [vmem:[#allocation5 + $0x224] ss:$8 sps:$4 sm:$0xff]  }
  0xd7   :  { %1550 = vmatmul.mubr.bf16.gmra.mxu0 %v6473_v28  ;;  %v5916_v28 = vld [vmem:[#allocation5 + $0x1a0] ss:$8 sps:$4 sm:$0xff]  }
  0xd8   :  { %1559 = vmatprep.mubr.bf16.mxu0 %v5025_v4  ;;  %2290 = vmatpush1.bf16.msra.mxu0 %v5870_v50  ;;  %v5950_v50 = vld [vmem:[#allocation5 + $0xc0] ss:$8 sps:$4 sm:$0xff]  }
  0xd9   :  { %2291 = vmatprep.subr.bf16.mxu0 %v5875_v5  ;;  %2219 = vmatpush1.bf16.msra.mxu1 %v5916_v28  ;;  %v5966_v4 = vld [vmem:[#allocation5 + $0x220] ss:$8 sps:$4 sm:$0xff]   ;;  %v5969_v5 = vld [vmem:[#allocation2 + $0x5c] ss:$12 sps:$4 sm:$0xff]  }
  0xda   :  { %2220 = vmatprep.subr.bf16.mxu1 %v5924_v30 }
  0xdc   :  { %2292 = vmatpush1.bf16.msra.mxu0 %v5873_v6  ;;  %v5959_v6 = vld [vmem:[#allocation5 + $0xb4] ss:$8 sps:$4 sm:$0xff]  }
  0xdd   :  { %2293 = vmatprep.subr.bf16.mxu0 %v5878_v8  ;;  %2221 = vmatpush1.bf16.msra.mxu1 %v5922_v0  ;;  %v5957_v8 = vld [vmem:[#allocation5 + $0xb0] ss:$8 sps:$4 sm:$0xff]  }
  0xde   :  { %2222 = vmatprep.subr.bf16.mxu1 %v5930_v33 }
  0xdf   :  { %1560 = vmatmul.mubr.bf16.gmra.mxu0 %v5024_v11 }
  0xe0   :  { %2294 = vmatpush1.bf16.msra.mxu0 %v5876_v10  ;;  %2313 = vmatprep.mubr.bf16.mxu0 %v6476_v35  ;;  %v5965_v10 = vld [vmem:[#allocation5 + $0xa4] ss:$8 sps:$4 sm:$0xff]  }
  0xe1   :  { %2295 = vmatprep.subr.bf16.mxu0 %v5881_v51  ;;  %2223 = vmatpush1.bf16.msra.mxu1 %v5928_v27  ;;  %v5963_v51 = vld [vmem:[#allocation5 + $0xa0] ss:$8 sps:$4 sm:$0xff]  }
  0xe2   :  { %2224 = vmatprep.subr.bf16.mxu1 %v5936_v37 }
  0xe4   :  { %2296 = vmatpush1.bf16.msra.mxu0 %v5879_v15  ;;  %v5972_v15 = vld [vmem:[#allocation5 + $0x94] ss:$8 sps:$4 sm:$0xff]  }
  0xe5   :  { %2658 = vmatprep.subr.bf16.mxu0 %v5884_v17  ;;  %2225 = vmatpush2.bf16.msra.mxu1 %v5934_v40  ;;  %v5984_v17 = vld [vmem:[#allocation5 + $0x174] ss:$8 sps:$4 sm:$0xff]  }
  0xe6   :  { %2226 = vmatprep.subr.bf16.mxu1 %v5942_v42 }
  0xe7   :  { %2314 = vmatmul.mubr.bf16.vlgmr.msra.gmra.mxu0 %v5885_v20  ;;  %v5978_v20 = vld [vmem:[#allocation5 + $0x84] ss:$8 sps:$4 sm:$0xff]  }
  0xe8   :  { %2659 = vmatpush1.bf16.msra.mxu0 %v5882_v19  ;;  %2323 = vmatprep.mubr.bf16.mxu0 %v6476_v35  ;;  %v5970_v19 = vld [vmem:[#allocation5 + $0x90] ss:$8 sps:$4 sm:$0xff]  }
  0xe9   :  { %2660 = vmatprep.subr.bf16.mxu0 %v5891_v21  ;;  %2227 = vmatpush2.bf16.msra.mxu1 %v5940_v44 }
  0xea   :  { %2228 = vmatprep.subr.bf16.mxu1 %v5949_v49 }
  0xec   :  { %2661 = vmatpush1.bf16.msra.mxu0 %v5889_v23 }
  0xed   :  { %2662 = vmatprep.subr.bf16.mxu0 %v5897_v25  ;;  %2229 = vmatpush2.bf16.msra.mxu1 %v5947_v53 }
  0xee   :  { %2230 = vmatprep.subr.bf16.mxu1 %v5955_v55 }
  0xef   :  { %2324 = vmatmul.mubr.bf16.gmra.mxu0 %v5943_v47 }
  0xf0   :  { %2663 = vmatpush1.bf16.msra.mxu0 %v5895_v29  ;;  %2333 = vmatprep.mubr.bf16.mxu0 %v6476_v35 }
  0xf1   :  { %2664 = vmatprep.subr.bf16.mxu0 %v5903_v31  ;;  %2231 = vmatpush2.bf16.msra.mxu1 %v5953_v57 }
  0xf2   :  { %2232 = vmatprep.subr.bf16.mxu1 %v5962_v61 }
  0xf4   :  { %2665 = vmatpush1.bf16.msra.mxu0 %v5901_v32 }
  0xf5   :  { %2666 = vmatprep.subr.bf16.mxu0 %v5909_v34  ;;  %2233 = vmatpush2.bf16.msra.mxu1 %v5960_v63 }
  0xf6   :  { %2234 = vmatprep.subr.bf16.mxu1 %v5968_v3 }
  0xf7   :  { %2334 = vmatmul.mubr.bf16.gmra.mxu0 %v5956_v58 }
  0xf8   :  { %2667 = vmatpush1.bf16.msra.mxu0 %v5907_v36  ;;  %2343 = vmatprep.mubr.bf16.mxu0 %v6476_v35  ;;  %v5975_v35 = vld [vmem:[#allocation5 + $0x214] ss:$8 sps:$4 sm:$0xff]  }
  0xf9   :  { %2668 = vmatprep.subr.bf16.mxu0 %v5915_v38  ;;  %2235 = vmatpush2.bf16.msra.mxu1 %v5966_v4 }
  0xfa   :  { %2236 = vmatprep.subr.bf16.mxu1 %v5975_v35 }
  0xfc   :  { %2669 = vmatpush1.bf16.msra.mxu0 %v5913_v41 }
  0xfd   :  { %2670 = vmatprep.subr.bf16.mxu0 %v5921_v43  ;;  %2237 = vmatpush2.bf16.msra.mxu1 %v5973_v9 }
  0xfe   :  { %2238 = vmatprep.subr.bf16.mxu1 %v5981_v12 }
  0xff   :  { %2344 = vmatmul.mubr.bf16.gmra.mxu0 %v5969_v5 }
 0x100   :  { %2671 = vmatpush1.bf16.msra.mxu0 %v5919_v45 }
 0x101   :  { %2672 = vmatprep.subr.bf16.mxu0 %v5927_v46  ;;  %2239 = vmatpush2.bf16.msra.mxu1 %v5979_v13 }
 0x102   :  { %2731 = vmatprep.subr.bf16.mxu1 %v5984_v17 }
 0x104   :  { %2673 = vmatpush1.bf16.msra.mxu0 %v5925_v48 }
 0x105   :  { %2674 = vmatprep.subr.bf16.mxu0 %v5933_v52 }
 0x108   :  { %2675 = vmatpush2.bf16.msra.mxu0 %v5931_v54  ;;  %v6496_v2 = vpop.f32.mrf.mxu1 }
 0x109   :  { %2676 = vmatprep.subr.bf16.mxu0 %v5939_v56 }
 0x10a   :  { %v6498_v7 = vpop.f32.mrf.mxu1 }
 0x10c   :  { %2677 = vmatpush2.bf16.msra.mxu0 %v5937_v59  ;;  %v6500_v11 = vpop.f32.mrf.mxu1 }
 0x10d   :  { %2678 = vmatprep.subr.bf16.mxu0 %v5946_v60  ;;  %v6033_v60 = vld [vmem:[#allocation5 + $0x474] ss:$8 sps:$4 sm:$0xff]  }
 0x10e   :  { %v6502_v16 = vpop.f32.mrf.mxu1 }
 0x110   :  { %2679 = vmatpush2.bf16.msra.mxu0 %v5944_v62  ;;  %v6504_v18 = vpop.f32.mrf.mxu1 }
 0x111   :  { %2680 = vmatprep.subr.bf16.mxu0 %v5952_v1 }
 0x112   :  { %v6506_v39 = vpop.f32.mrf.mxu1 }
 0x114   :  { %2681 = vmatpush2.bf16.msra.mxu0 %v5950_v50  ;;  %v6508_v21 = vpop.f32.mrf.mxu1 }
 0x115   :  { %2682 = vmatprep.subr.bf16.mxu0 %v5959_v6 }
 0x116   :  { %v6510_v23 = vpop.f32.mrf.mxu1 }
 0x118   :  { %2683 = vmatpush2.bf16.msra.mxu0 %v5957_v8  ;;  %v6514_v24 = vpop.f32.mrf.mxu1 }
 0x119   :  { %2684 = vmatprep.subr.bf16.mxu0 %v5965_v10 }
 0x11a   :  { %v6520_v28 = vpop.f32.mrf.mxu1 }
 0x11c   :  { %2685 = vmatpush2.bf16.msra.mxu0 %v5963_v51  ;;  %v6526_v31 = vpop.f32.mrf.mxu1 }
 0x11d   :  { %2686 = vmatprep.subr.bf16.mxu0 %v5972_v15 }
 0x11e   :  { %v6532_v33 = vpop.f32.mrf.mxu1 }
 0x120   :  { %2687 = vmatpush2.bf16.msra.mxu0 %v5970_v19  ;;  %v6538_v36 = vpop.f32.mrf.mxu1 }
 0x121   :  { %2688 = vmatprep.subr.bf16.mxu0 %v5978_v20 }
 0x122   :  { %v6544_v40 = vpop.f32.mrf.mxu1 }
 0x124   :  { %2689 = vmatpush2.bf16.msra.mxu0 %v5976_v22  ;;  %v6550_v43 = vpop.f32.mrf.mxu1 }
 0x125   :  { %3246 = vmatprep.subr.bf16.mxu0 %v6033_v60 }
 0x126   :  { %v6556_v46 = vpop.f32.mrf.mxu1 }
 0x127   :  { %v6512_v14 = vpop.f32.mrf.mxu0 }
 0x129   :  { %v6516_v25 = vpop.f32.mrf.mxu0 }
 0x12b   :  { %v6518_v26 = vpop.f32.mrf.mxu0 }
 0x12d   :  { %v6522_v29 = vpop.f32.mrf.mxu0 }
 0x12f   :  { %v6524_v30 = vpop.f32.mrf.mxu0 }
 0x131   :  { %v6528_v32 = vpop.f32.mrf.mxu0 }
 0x133   :  { %v6530_v0 = vpop.f32.mrf.mxu0 }
 0x135   :  { %v6534_v34 = vpop.f32.mrf.mxu0 }
 0x137   :  { %v6536_v27 = vpop.f32.mrf.mxu0 }
 0x139   :  { %v6540_v37 = vpop.f32.mrf.mxu0 }
 0x13b   :  { %v6542_v38 = vpop.f32.mrf.mxu0 }
 0x13d   :  { %v6546_v41 = vpop.f32.mrf.mxu0 }
 0x13f   :  { %v6548_v42 = vpop.f32.mrf.mxu0 }
 0x141   :  { %v6552_v44 = vpop.f32.mrf.mxu0 }
 0x143   :  { %v6554_v45 = vpop.f32.mrf.mxu0 }
 0x145   :  { %v6558_v47 = vpop.f32.mrf.mxu0 }
 0x147   :  { %v1088_v52 = vpop.f32.mrf.mxu0 }
 0x148   :  { %v1015_v48 = vpop.f32.mrf.mxu1 }
 0x149   :  { %v1090_v55 = vpop.f32.mrf.mxu0 }
 0x14a   :  { %v1017_v49 = vpop.f32.mrf.mxu1 }
 0x14b   :  { %v6564_v58 = vpop.f32.mrf.mxu0 }
 0x14c   :  { %v1019_v53 = vpop.f32.mrf.mxu1 }
 0x14d   :  { %v6570_v62 = vpop.f32.mrf.mxu0 }
 0x14e   :  { %v1021_v54 = vpop.f32.mrf.mxu1 }
 0x14f   :  { %v6574_v1 = vpop.f32.mrf.mxu0 }
 0x150   :  { %v6560_v56 = vpop.f32.mrf.mxu1 }
 0x151   :  { %v6580_v4 = vpop.f32.mrf.mxu0 }
 0x152   :  { %v6562_v57 = vpop.f32.mrf.mxu1 }
 0x153   :  { %v6586_v35 = vpop.f32.mrf.mxu0 }
 0x154   :  { %v6566_v59 = vpop.f32.mrf.mxu1 }
 0x155   :  { %v6590_v9 = vpop.f32.mrf.mxu0 }
 0x156   :  { %v6568_v61 = vpop.f32.mrf.mxu1  ;;  %7080 = vst [vmem:[#allocation16_spill] sm:$0xff] %v6590_v9 }
 0x157   :  { %v6594_v12 = vpop.f32.mrf.mxu0 }
 0x158   :  { %v6572_v63 = vpop.f32.mrf.mxu1  ;;  %7082 = vst [vmem:[#allocation18_spill] sm:$0xff] %v6594_v12 }
 0x159   :  { %7074 = vst [vmem:[#allocation10_spill] sm:$0xff] %v6572_v63  ;;  %v6598_v13 = vpop.f32.mrf.mxu0 }
 0x15a   :  { %v6576_v3 = vpop.f32.mrf.mxu1  ;;  %7084 = vst [vmem:[#allocation20_spill] sm:$0xff] %v6598_v13 }
 0x15b   :  { %7075 = vst [vmem:[#allocation11_spill] sm:$0xff] %v6576_v3  ;;  %v6600_v19 = vpop.f32.mrf.mxu0 }
 0x15c   :  { %v6578_v50 = vpop.f32.mrf.mxu1  ;;  %7085 = vst [vmem:[#allocation21_spill] sm:$0xff] %v6600_v19  ;;  %v639_v19 = vadd.f32 %v6496_v2, %v6512_v14 }
 0x15d   :  { %7076 = vst [vmem:[#allocation12_spill] sm:$0xff] %v6578_v50  ;;  %v6602_v22 = vpop.f32.mrf.mxu0 }
 0x15e   :  { %v6582_v5 = vpop.f32.mrf.mxu1  ;;  %7086 = vst [vmem:[#allocation22_spill] sm:$0xff] %v6602_v22  ;;  %v641_v22 = vadd.f32 %v6498_v7, %v6516_v25  ;;  %v1016_v9 = vadd.f32 %v1015_v48, %v639_v19  ;;  %v645_v7 = vadd.f32 %v6502_v16, %v6522_v29  ;;  %v651_v16 = vadd.f32 %v6506_v39, %v6528_v32 }
 0x15f   :  { %7077 = vst [vmem:[#allocation13_spill] sm:$0xff] %v6582_v5  ;;  %v1661_v5 = vlaneseq }
 0x160   :  { %v6584_v6 = vpop.f32.mrf.mxu1  ;;  %v1018_v2 = vadd.f32 %v1017_v49, %v641_v22  ;;  %v1089_v25 = vadd.f32 %v1088_v52, %v1016_v9 }
 0x161   :  { %7078 = vst [vmem:[#allocation14_spill] sm:$0xff] %v6584_v6  ;;  %v6604_v6 = vpop.f32.mrf.mxu0  ;;  %v6610_v12 = vshrl.u32 %v1661_v5, 7  ;;  %v1659_v5 = vld [vmem:[%s7067_s2] sm:$0x3] }
 0x162   :  { %v6588_v8 = vpop.f32.mrf.mxu1  ;;  %7087 = vst [vmem:[#allocation23_spill] sm:$0xff] %v6604_v6  ;;  %v1091_v29 = vadd.f32 %v1090_v55, %v1018_v2  ;;  %v661_v55 = vadd.f32 %v6520_v28, %v6540_v37  ;;  %v669_v28 = vadd.f32 %v6538_v36, %v6548_v42  ;;  %v6685_v36 = vadd.f32 %v6556_v46, %v6558_v47 }
 0x163   :  { %7079 = vst [vmem:[#allocation15_spill] sm:$0xff] %v6588_v8  ;;  %v6606_v50 = vpop.f32.mrf.mxu0  ;;  %v7073_v6 = vsub.s32 0, %v6610_v12  ;;  %v7094_v63 = vsub.s32 1, %v6610_v12 }
 0x164   :  { %v6592_v10 = vpop.f32.mrf.mxu1  ;;  %7088 = vst [vmem:[#allocation24_spill] sm:$0xff] %v6606_v50  ;;  %v649_v50 = vadd.f32 %v6504_v18, %v6524_v30  ;;  %v655_v18 = vadd.f32 %v6510_v23, %v6534_v34  ;;  %v659_v30 = vadd.f32 %v6514_v24, %v6536_v27  ;;  %v665_v23 = vadd.f32 %v6532_v33, %v6546_v41 }
 0x165   :  { %7081 = vst [vmem:[#allocation17_spill] sm:$0xff] %v6592_v10  ;;  %v1028_v27 = vadd.f32 %v6562_v57, %v651_v16 }
 0x166   :  { %v6596_v51 = vpop.f32.mrf.mxu1  ;;  %v1032_v42 = vadd.f32 %v6568_v61, %v655_v18  ;;  %v7100_v18 = vld [vmem:[#allocation12_spill] sm:$0xff] }
 0x167   :  { %7083 = vst [vmem:[#allocation19_spill] sm:$0xff] %v6596_v51  ;;  %v6612_v51 = vpop.f32.mrf.mxu0 }
 0x168   :  { %7090 = vst [vmem:[#allocation26_spill] sm:$0xff] %v6612_v51 }
 0x169   :  { %v1604_v15 = vpop.f32.mrf.mxu1  ;;  %v6621_v3 = vpop.f32.mrf.mxu0 }
 0x16a   :  { %7092 = vst [vmem:[#allocation28_spill] sm:$0xff] %v6621_v3  ;;  %v6635_v3 = vrot.slane %v1659_v5, %v7073_v6 }
 0x16b   :  { %v1606_v17 = vpop.f32.mrf.mxu1 }
 0x16d   :  { %v1608_v20 = vpop.f32.mrf.mxu1 }
 0x16f   :  { %v1610_v60 = vpop.f32.mrf.mxu1 }
 0x171   :  { %v1614_v8 = vpop.f32.mrf.mxu1 }
 0x173   :  { %v6608_v10 = vpop.f32.mrf.mxu1 }
 0x174   :  { %7089 = vst [vmem:[#allocation25_spill] sm:$0xff] %v6608_v10  ;;  %v1022_v10 = vadd.f32 %v1021_v54, %v645_v7  ;;  %v1026_v54 = vadd.f32 %v6560_v56, %v649_v50 }
 0x175   :  { %v6614_v13 = vpop.f32.mrf.mxu1 }
 0x176   :  { %7091 = vst [vmem:[#allocation27_spill] sm:$0xff] %v6614_v13  ;;  %v643_v13 = vadd.f32 %v6500_v11, %v6518_v26  ;;  %v6641_v11 = vrot.slane %v1659_v5, %v7094_v63  ;;  %v1095_v24 = vadd.f32 %v6570_v62, %v1022_v10  ;;  %v1099_v37 = vadd.f32 %v6574_v1, %v1026_v54 }
 0x177   :  { %v6627_v51 = vpop.f32.mrf.mxu1 }
 0x178   :  { %7093 = vst [vmem:[#allocation29_spill] sm:$0xff] %v6627_v51  ;;  %v1020_v48 = vadd.f32 %v1019_v53, %v643_v13  ;;  %v653_v53 = vadd.f32 %v6508_v21, %v6530_v0  ;;  %v663_v21 = vadd.f32 %v6526_v31, %v6542_v38 }
 0x179   :  { %v6643_v26 = vpop.f32.mrf.mxu1 }
 0x17a   :  { %v1093_v9 = vadd.f32 %v6564_v58, %v1020_v48  ;;  %v1030_v31 = vadd.f32 %v6566_v59, %v653_v53  ;;  %v7099_v48 = vld [vmem:[#allocation16_spill] sm:$0xff] }
 0x17b   :  { %v6665_v34 = vpop.f32.mrf.mxu1  ;;  %v7097_v5 = vld [vmem:[#allocation25_spill] sm:$0xff] }
 0x17c   :  { %v6031_v53 = vld [vmem:[#allocation5 + $0x470] ss:$8 sps:$4 sm:$0xff]  }
 0x17d   :  { %v1628_v1 = vpop.f32.mrf.mxu1  ;;  %v7098_v7 = vld [vmem:[#allocation27_spill] sm:$0xff] }
 0x187   :  { %v1531_v14 = vpop.f32.mrf.mxu0 }
 0x188   :  { %v1605_v19 = vadd.f32 %v1604_v15, %v1531_v14  ;;  %v6681_v15 = vadd.f32 %v6550_v43, %v6554_v45  ;;  %v7096_v45 = vld [vmem:[#allocation11_spill] sm:$0xff] }
 0x189   :  { %v1533_v51 = vpop.f32.mrf.mxu0  ;;  %v6699_v14 = vld [vmem:[#allocation2] sm:$0xff] }
 0x18a   :  { %v1643_v49 = vadd.f32 %v1605_v19, %v1089_v25  ;;  %v1607_v52 = vadd.f32 %v1606_v17, %v1533_v51  ;;  %v671_v51 = vadd.f32 %v6544_v40, %v6552_v44  ;;  %v1101_v17 = vadd.f32 %v6580_v4, %v1028_v27  ;;  %v7095_v44 = vld [vmem:[#allocation10_spill] sm:$0xff] }
 0x18b   :  { %v1535_v63 = vpop.f32.mrf.mxu0  ;;  %v1103_v40 = vadd.f32 %v6586_v35, %v1030_v31  ;;  %v1036_v43 = vadd.f32 %v7095_v44, %v659_v30  ;;  %v1105_v19 = vadd.f32 %v7099_v48, %v1032_v42  ;;  %v1040_v30 = vadd.f32 %v7100_v18, %v663_v21 }
 0x18c   :  { %v6656_v13 = vadd.f32 %v6635_v3, %v1643_v49  ;;  %v1644_v39 = vadd.f32 %v1607_v52, %v1091_v29  ;;  %v1609_v32 = vadd.f32 %v1608_v20, %v1535_v63  ;;  %v1630_v49 = vpop.f32.mrf.mxu1  ;;  %v7101_v63 = vld [vmem:[#allocation29_spill] sm:$0xff] }
 0x18d   :  { %v1537_v0 = vpop.f32.mrf.mxu0 }
 0x18e   :  { %v1672_v56 = vadd.f32 %v6641_v11, %v1644_v39  ;;  %v1645_v58 = vadd.f32 %v1609_v32, %v1093_v9  ;;  %v1611_v50 = vadd.f32 %v1610_v60, %v1537_v0  ;;  %v1687_v33 = vmax.f32 %v6656_v13, 0.0  ;;  %v6039_v13 = vld [vmem:[#allocation5 + $0x464] ss:$8 sps:$4 sm:$0xff]   ;;  %v7104_v0 = vld [vmem:[#allocation13_spill] sm:$0xff] }
 0x18f   :  { %v1541_v38 = vpop.f32.mrf.mxu0  ;;  %v1038_v60 = vadd.f32 %v7096_v45, %v661_v55  ;;  %v7102_v39 = vld [vmem:[#allocation18_spill] sm:$0xff]  ;;  %v7103_v55 = vld [vmem:[#allocation20_spill] sm:$0xff]  ;;  %v1042_v27 = vadd.f32 %v7104_v0, %v665_v23 }
 0x190   :  { %v1688_v41 = vmax.f32 %v1672_v56, 0.0  ;;  %v6675_v62 = vadd.f32 %v6635_v3, %v1645_v58  ;;  %v1646_v10 = vadd.f32 %v1611_v50, %v1095_v24  ;;  %v1615_v57 = vadd.f32 %v1614_v8, %v1541_v38  ;;  %v7105_v38 = vld [vmem:[#allocation14_spill] sm:$0xff] }
 0x191   :  { %v1543_v59 = vpop.f32.mrf.mxu0  ;;  %v1109_v32 = vadd.f32 %v7102_v39, %v1036_v43  ;;  %v1111_v24 = vadd.f32 %v7103_v55, %v1038_v60  ;;  %v7107_v43 = vld [vmem:[#allocation22_spill] sm:$0xff]  ;;  %v7108_v60 = vld [vmem:[#allocation15_spill] sm:$0xff] }
 0x192   :  { %v5416_v20 = vpack.c.bf16 %v1688_v41, %v1687_v33  ;;  %v6690_v8 = vadd.f32 %v6641_v11, %v1646_v10  ;;  %v1647_v22 = vadd.f32 %v1615_v57, %v1099_v37  ;;  %v1617_v46 = vadd.f32 %v7097_v5, %v1543_v59  ;;  %v1634_v59 = vpop.f32.mrf.mxu1 }
 0x193   :  { %v1545_v47 = vpop.f32.mrf.mxu0  ;;  %v1689_v61 = vmax.f32 %v6675_v62, 0.0  ;;  %v1046_v62 = vadd.f32 %v7105_v38, %v669_v28  ;;  %v6045_v28 = vld [vmem:[#allocation5 + $0x454] ss:$8 sps:$4 sm:$0xff]   ;;  %v1115_v45 = vadd.f32 %v7107_v43, %v1042_v27  ;;  %v1048_v5 = vadd.f32 %v7108_v60, %v671_v51  ;;  %v5985_v51 = vld [vmem:[#allocation5 + $0x160] ss:$8 sps:$4 sm:$0xff]  }
 0x194   :  { %v1690_v2 = vmax.f32 %v6690_v8, 0.0  ;;  %v1619_v4 = vadd.f32 %v7098_v7, %v1545_v47  ;;  %v5143_v25 = vcombine.low %v6699_v14, %v5416_v20  ;;  %v6704_v35 = vadd.f32 %v6635_v3, %v1647_v22  ;;  %v7106_v8 = vld [vmem:[#allocation21_spill] sm:$0xff] }
 0x195   :  { %v1648_v16 = vadd.f32 %v1617_v46, %v1101_v17  ;;  %v1547_v29 = vpop.f32.mrf.mxu0  ;;  %v5144_v52 = vcombine.high %v6699_v14, %v5416_v20  ;;  %v6216_v31 = vpack.c.bf16 %v1689_v61, %v1687_v33  ;;  %v5982_v17 = vld [vmem:[#allocation5 + $0x170] ss:$8 sps:$4 sm:$0xff]   ;;  %v6037_v20 = vld [vmem:[#allocation5 + $0x460] ss:$8 sps:$4 sm:$0xff]   ;;  %v1113_v22 = vadd.f32 %v7106_v8, %v1040_v30  ;;  %v5987_v33 = vld [vmem:[#allocation5 + $0x164] ss:$8 sps:$4 sm:$0xff]  }
 0x196   :  { %v1649_v54 = vadd.f32 %v1619_v4, %v1103_v40  ;;  %v1621_v9 = vadd.f32 %v7101_v63, %v1547_v29  ;;  %v1691_v10 = vmax.f32 %v6704_v35, 0.0  ;;  %v6217_v23 = vpack.c.bf16 %v1690_v2, %v1688_v41  ;;  %v5990_v30 = vld [vmem:[#allocation5 + $0x154] ss:$8 sps:$4 sm:$0xff]  }
 0x197   :  { %v1676_v56 = vadd.f32 %v6641_v11, %v1648_v16  ;;  %v1551_v58 = vpop.f32.mrf.mxu0  ;;  %2690 = vmatprep.mubr.bf16.mxu0 %v5144_v52  ;;  %v6043_v52 = vld [vmem:[#allocation5 + $0x450] ss:$8 sps:$4 sm:$0xff]  }
 0x198   :  { %v6714_v50 = vadd.f32 %v6635_v3, %v1649_v54  ;;  %v1650_v37 = vadd.f32 %v1621_v9, %v1105_v19  ;;  %v1625_v21 = vadd.f32 %v6643_v26, %v1551_v58  ;;  %2691 = vmatmul.mubr.bf16.vlgmr.msra.gmra.mxu0 %v5143_v25  ;;  %2240 = vmatprep.mubr.bf16.mxu1 %v6217_v23  ;;  %v1636_v19 = vpop.f32.mrf.mxu1  ;;  %v7111_v63 = vld [vmem:[#allocation24_spill] sm:$0xff] }
 0x199   :  { %v1692_v57 = vmax.f32 %v1676_v56, 0.0  ;;  %v1553_v42 = vpop.f32.mrf.mxu0  ;;  %3247 = vmatpush1.bf16.msra.mxu0 %v6031_v53  ;;  %2241 = vmatmul.mubr.bf16.vlgmr.msra.gmra.mxu1 %v6216_v31  ;;  %v6734_v29 = vpack.c.bf16 %v1691_v10, %v1689_v61  ;;  %v1121_v9 = vadd.f32 %v7111_v63, %v1048_v5  ;;  %v6055_v5 = vld [vmem:[#allocation5 + $0x430] ss:$8 sps:$4 sm:$0xff]  }
 0x19a   :  { %v6721_v40 = vadd.f32 %v6641_v11, %v1650_v37  ;;  %v1651_v44 = vadd.f32 %v1625_v21, %v1109_v32  ;;  %v1627_v26 = vadd.f32 %v6665_v34, %v1553_v42  ;;  %3248 = vmatprep.subr.bf16.mxu0 %v6039_v13  ;;  %v1693_v41 = vmax.f32 %v6714_v50, 0.0  ;;  %v7109_v34 = vld [vmem:[#allocation23_spill] sm:$0xff]  ;;  %2732 = vmatpush1.bf16.msra.mxu1 %v5982_v17  ;;  %v1638_v58 = vpop.f32.mrf.mxu1  ;;  %v7113_v42 = vld [vmem:[#allocation26_spill] sm:$0xff]  ;;  %v6057_v17 = vld [vmem:[#allocation5 + $0x434] ss:$8 sps:$4 sm:$0xff]  }
 0x19b   :  { %v1555_v46 = vpop.f32.mrf.mxu0  ;;  %v1119_v48 = vadd.f32 %v7109_v34, %v1046_v62  ;;  %v6732_v16 = vpack.c.bf16 %v1692_v57, %v1690_v2  ;;  %2733 = vmatprep.subr.bf16.mxu1 %v5987_v33  ;;  %v7112_v2 = vld [vmem:[#allocation19_spill] sm:$0xff] }
 0x19c   :  { %v1694_v47 = vmax.f32 %v6721_v40, 0.0  ;;  %v6729_v7 = vadd.f32 %v6635_v3, %v1651_v44  ;;  %v1652_v4 = vadd.f32 %v1627_v26, %v1111_v24  ;;  %v1629_v25 = vadd.f32 %v1628_v1, %v1555_v46  ;;  %v7110_v1 = vld [vmem:[#allocation17_spill] sm:$0xff]  ;;  %v6051_v32 = vld [vmem:[#allocation5 + $0x444] ss:$8 sps:$4 sm:$0xff]   ;;  %v6049_v21 = vld [vmem:[#allocation5 + $0x440] ss:$8 sps:$4 sm:$0xff]  }
 0x19d   :  { %v1557_v35 = vpop.f32.mrf.mxu0  ;;  %3249 = vmatpush1.bf16.msra.mxu0 %v6037_v20  ;;  %v1050_v54 = vadd.f32 %v7110_v1, %v6681_v15  ;;  %v1052_v13 = vadd.f32 %v7112_v2, %v6685_v36  ;;  %2700 = vmatprep.mubr.bf16.mxu0 %v6732_v16  ;;  %v5988_v36 = vld [vmem:[#allocation5 + $0x150] ss:$8 sps:$4 sm:$0xff]   ;;  %v5993_v62 = vld [vmem:[#allocation5 + $0x144] ss:$8 sps:$4 sm:$0xff]  }
 0x19e   :  { %v6737_v53 = vadd.f32 %v6641_v11, %v1652_v4  ;;  %v1653_v18 = vadd.f32 %v1629_v25, %v1113_v22  ;;  %3250 = vmatprep.subr.bf16.mxu0 %v6045_v28  ;;  %v1631_v39 = vadd.f32 %v1630_v49, %v1557_v35  ;;  %v1695_v55 = vmax.f32 %v6729_v7, 0.0  ;;  %2734 = vmatpush1.bf16.msra.mxu1 %v5985_v51  ;;  %v7114_v40 = vld [vmem:[#allocation28_spill] sm:$0xff]  ;;  %v1640_v28 = vpop.f32.mrf.mxu1  ;;  %v6063_v25 = vld [vmem:[#allocation5 + $0x424] ss:$8 sps:$4 sm:$0xff]  }
 0x19f   :  { %v1561_v61 = vpop.f32.mrf.mxu0  ;;  %v6220_v27 = vpack.c.bf16 %v1694_v47, %v1692_v57  ;;  %v6221_v49 = vpack.c.bf16 %v1693_v41, %v1691_v10  ;;  %2735 = vmatprep.subr.bf16.mxu1 %v5990_v30  ;;  %v1123_v57 = vadd.f32 %v7113_v42, %v1050_v54  ;;  %v1125_v44 = vadd.f32 %v7114_v40, %v1052_v13  ;;  %v5996_v4 = vld [vmem:[#allocation5 + $0x134] ss:$8 sps:$4 sm:$0xff]   ;;  %v6067_v2 = vld [vmem:[#allocation5 + $0x410] ss:$8 sps:$4 sm:$0xff]   ;;  %v6019_v42 = vld [vmem:[#allocation5 + $0x344] ss:$8 sps:$4 sm:$0xff]  }
 0x1a0   :  { %v1696_v24 = vmax.f32 %v6737_v53, 0.0  ;;  %v1635_v0 = vadd.f32 %v1634_v59, %v1561_v61  ;;  %2701 = vmatmul.mubr.bf16.gmra.mxu0 %v6734_v29  ;;  %v6749_v15 = vadd.f32 %v6635_v3, %v1653_v18  ;;  %v1654_v56 = vadd.f32 %v1631_v39, %v1115_v45  ;;  %v5991_v45 = vld [vmem:[#allocation5 + $0x140] ss:$8 sps:$4 sm:$0xff]   ;;  %v5999_v18 = vld [vmem:[#allocation5 + $0x124] ss:$8 sps:$4 sm:$0xff]  }
 0x1a1   :  { %v1563_v37 = vpop.f32.mrf.mxu0  ;;  %3251 = vmatpush1.bf16.msra.mxu0 %v6043_v52  ;;  %2250 = vmatprep.mubr.bf16.mxu1 %v6220_v27  ;;  %v6762_v60 = vpack.c.bf16 %v1695_v55, %v1693_v41  ;;  %v5994_v41 = vld [vmem:[#allocation5 + $0x130] ss:$8 sps:$4 sm:$0xff]   ;;  %v6061_v52 = vld [vmem:[#allocation5 + $0x420] ss:$8 sps:$4 sm:$0xff]   ;;  %v6069_v30 = vld [vmem:[#allocation5 + $0x414] ss:$8 sps:$4 sm:$0xff]  }
 0x1a2   :  { %v1655_v31 = vadd.f32 %v1635_v0, %v1119_v48  ;;  %v1637_v38 = vadd.f32 %v1636_v19, %v1563_v37  ;;  %v1682_v59 = vadd.f32 %v6641_v11, %v1654_v56  ;;  %3252 = vmatprep.subr.bf16.mxu0 %v6051_v32  ;;  %2251 = vmatmul.mubr.bf16.gmra.mxu1 %v6221_v49  ;;  %v1697_v26 = vmax.f32 %v6749_v15, 0.0  ;;  %v6075_v39 = vld [vmem:[#allocation5 + $0x404] ss:$8 sps:$4 sm:$0xff]   ;;  %v6073_v0 = vld [vmem:[#allocation5 + $0x400] ss:$8 sps:$4 sm:$0xff]  }
 0x1a3   :  { %v1565_v23 = vpop.f32.mrf.mxu0  ;;  %v6756_v10 = vpack.c.bf16 %v1696_v24, %v1694_v47  ;;  %2736 = vmatpush1.bf16.msra.mxu1 %v5988_v36  ;;  %v6003_v27 = vld [vmem:[#allocation5 + $0x100] ss:$8 sps:$4 sm:$0xff]   ;;  %v6008_v56 = vld [vmem:[#allocation5 + $0x374] ss:$8 sps:$4 sm:$0xff]   ;;  %v6006_v37 = vld [vmem:[#allocation5 + $0x370] ss:$8 sps:$4 sm:$0xff]  }
 0x1a4   :  { %v1683_v20 = vadd.f32 %v6635_v3, %v1655_v31  ;;  %v1656_v8 = vadd.f32 %v1637_v38, %v1121_v9  ;;  %v1639_v22 = vadd.f32 %v1638_v58, %v1565_v23  ;;  %v1698_v33 = vmax.f32 %v1682_v59, 0.0  ;;  %2737 = vmatprep.subr.bf16.mxu1 %v5993_v62  ;;  %v5997_v9 = vld [vmem:[#allocation5 + $0x120] ss:$8 sps:$4 sm:$0xff]   ;;  %v6009_v58 = vld [vmem:[#allocation2 + $0x8] ss:$12 sps:$4 sm:$0xff]  }
 0x1a5   :  { %v1567_v43 = vpop.f32.mrf.mxu0  ;;  %3253 = vmatpush1.bf16.msra.mxu0 %v6049_v21  ;;  %2710 = vmatprep.mubr.bf16.mxu0 %v6756_v10  ;;  %v6225_v51 = vpack.c.bf16 %v1697_v26, %v1695_v55  ;;  %v6000_v55 = vld [vmem:[#allocation5 + $0x110] ss:$8 sps:$4 sm:$0xff]   ;;  %v6079_v15 = vld [vmem:[#allocation2 + $0x20] ss:$12 sps:$4 sm:$0xff]   ;;  %v6012_v36 = vld [vmem:[#allocation5 + $0x364] ss:$8 sps:$4 sm:$0xff]  }
 0x1a6   :  { %v1684_v46 = vadd.f32 %v6641_v11, %v1656_v8  ;;  %v1657_v7 = vadd.f32 %v1639_v22, %v1123_v57  ;;  %v1641_v47 = vadd.f32 %v1640_v28, %v1567_v43  ;;  %3254 = vmatprep.subr.bf16.mxu0 %v6057_v17  ;;  %v1699_v34 = vmax.f32 %v1683_v20, 0.0  ;;  %v6010_v49 = vld [vmem:[#allocation5 + $0x360] ss:$8 sps:$4 sm:$0xff]   ;;  %v6015_v31 = vld [vmem:[#allocation5 + $0x354] ss:$8 sps:$4 sm:$0xff]  }
 0x1a7   :  { %2738 = vmatpush1.bf16.msra.mxu1 %v5991_v45  ;;  %v6224_v50 = vpack.c.bf16 %v1698_v33, %v1696_v24  ;;  %v6005_v24 = vld [vmem:[#allocation5 + $0x104] ss:$8 sps:$4 sm:$0xff]   ;;  %v6016_v38 = vld [vmem:[#allocation2 + $0x20] ss:$12 sps:$4 sm:$0xff]   ;;  %v6013_v62 = vld [vmem:[#allocation5 + $0x350] ss:$8 sps:$4 sm:$0xff]  }
 0x1a8   :  { %v1700_v48 = vmax.f32 %v1684_v46, 0.0  ;;  %v1685_v19 = vadd.f32 %v6635_v3, %v1657_v7  ;;  %v1658_v35 = vadd.f32 %v1641_v47, %v1125_v44  ;;  %2711 = vmatmul.mubr.bf16.gmra.mxu0 %v6762_v60  ;;  %2739 = vmatprep.subr.bf16.mxu1 %v5996_v4  ;;  %v6771_v63 = vpack.c.bf16 %v1699_v34, %v1697_v26  ;;  %v6083_v21 = vld [vmem:[#allocation2 + $0x38] ss:$12 sps:$4 sm:$0xff]   ;;  %v6084_v59 = vld [vmem:[#allocation2 + $0x50] ss:$12 sps:$4 sm:$0xff]  }
 0x1a9   :  { %3255 = vmatpush1.bf16.msra.mxu0 %v6055_v5  ;;  %2260 = vmatprep.mubr.bf16.mxu1 %v6224_v50  ;;  %v6017_v57 = vld [vmem:[#allocation5 + $0x340] ss:$8 sps:$4 sm:$0xff]   ;;  %v6022_v23 = vld [vmem:[#allocation5 + $0x334] ss:$8 sps:$4 sm:$0xff]   ;;  %v6020_v20 = vld [vmem:[#allocation5 + $0x330] ss:$8 sps:$4 sm:$0xff]  }
 0x1aa   :  { %v1686_v53 = vadd.f32 %v6641_v11, %v1658_v35  ;;  %3256 = vmatprep.subr.bf16.mxu0 %v6063_v25  ;;  %v1701_v1 = vmax.f32 %v1685_v19, 0.0  ;;  %2261 = vmatmul.mubr.bf16.gmra.mxu1 %v6225_v51  ;;  %v6769_v3 = vpack.c.bf16 %v1700_v48, %v1698_v33  ;;  %v6002_v11 = vld [vmem:[#allocation5 + $0x114] ss:$8 sps:$4 sm:$0xff]   ;;  %v6023_v17 = vld [vmem:[#allocation2 + $0x38] ss:$12 sps:$4 sm:$0xff]  }
 0x1ab   :  { %2740 = vmatpush1.bf16.msra.mxu1 %v5994_v41  ;;  %v6026_v8 = vld [vmem:[#allocation5 + $0x324] ss:$8 sps:$4 sm:$0xff]   ;;  %v6024_v22 = vld [vmem:[#allocation5 + $0x320] ss:$8 sps:$4 sm:$0xff]   ;;  %v6085_v40 = vld [vmem:[#allocation2 + $0x68] ss:$12 sps:$4 sm:$0xff]  }
 0x1ac   :  { %v1702_v54 = vmax.f32 %v1686_v53, 0.0  ;;  %2720 = vmatprep.mubr.bf16.mxu0 %v6769_v3  ;;  %2741 = vmatprep.subr.bf16.mxu1 %v5999_v18  ;;  %v6229_v32 = vpack.c.bf16 %v1701_v1, %v1699_v34  ;;  %v6029_v44 = vld [vmem:[#allocation5 + $0x314] ss:$8 sps:$4 sm:$0xff]   ;;  %v6030_v26 = vld [vmem:[#allocation2 + $0x50] ss:$12 sps:$4 sm:$0xff]  }
 0x1ad   :  { %3257 = vmatpush1.bf16.msra.mxu0 %v6061_v52  ;;  %v6027_v33 = vld [vmem:[#allocation5 + $0x310] ss:$8 sps:$4 sm:$0xff]   ;;  %v6036_v28 = vld [vmem:[#allocation5 + $0x304] ss:$8 sps:$4 sm:$0xff]   ;;  %v6034_v43 = vld [vmem:[#allocation5 + $0x300] ss:$8 sps:$4 sm:$0xff]  }
 0x1ae   :  { %v6773_v13 = vpack.c.bf16 %v1702_v54, %v1701_v1  ;;  %3258 = vmatprep.subr.bf16.mxu0 %v6069_v30  ;;  %v6228_v61 = vpack.c.bf16 %v1702_v54, %v1700_v48  ;;  %v6042_v45 = vld [vmem:[#allocation5 + $0x3f4] ss:$8 sps:$4 sm:$0xff]   ;;  %v6040_v5 = vld [vmem:[#allocation5 + $0x3f0] ss:$8 sps:$4 sm:$0xff]   ;;  %v6048_v46 = vld [vmem:[#allocation5 + $0x3e4] ss:$8 sps:$4 sm:$0xff]  }
 0x1af   :  { %2742 = vmatpush1.bf16.msra.mxu1 %v5997_v9  ;;  %v6046_v7 = vld [vmem:[#allocation5 + $0x3e0] ss:$8 sps:$4 sm:$0xff]   ;;  %v6054_v47 = vld [vmem:[#allocation5 + $0x3d4] ss:$8 sps:$4 sm:$0xff]   ;;  %v6052_v4 = vld [vmem:[#allocation5 + $0x3d0] ss:$8 sps:$4 sm:$0xff]  }
 0x1b0   :  { %2721 = vmatmul.mubr.bf16.gmra.mxu0 %v6771_v63  ;;  %2270 = vmatprep.mubr.bf16.mxu1 %v6228_v61  ;;  %v6060_v25 = vld [vmem:[#allocation5 + $0x3c4] ss:$8 sps:$4 sm:$0xff]   ;;  %v6058_v34 = vld [vmem:[#allocation5 + $0x3c0] ss:$8 sps:$4 sm:$0xff]   ;;  %v6066_v48 = vld [vmem:[#allocation5 + $0x3b4] ss:$8 sps:$4 sm:$0xff]   ;;  %v5213_v53 = vcombine.high %v6773_v13, %v6699_v14  ;;  %v5212_v18 = vcombine.low %v6773_v13, %v6699_v14 }
 0x1b1   :  { %3259 = vmatpush1.bf16.msra.mxu0 %v6067_v2  ;;  %2743 = vmatprep.subr.bf16.mxu1 %v6002_v11  ;;  %v6072_v19 = vld [vmem:[#allocation5 + $0x3a4] ss:$8 sps:$4 sm:$0xff]   ;;  %v6070_v35 = vld [vmem:[#allocation5 + $0x3a0] ss:$8 sps:$4 sm:$0xff]   ;;  %v6078_v50 = vld [vmem:[#allocation5 + $0x394] ss:$8 sps:$4 sm:$0xff]   ;;  %v6795_v2 = vpop.f32.mrf.mxu0 }
 0x1b2   :  { %3260 = vmatprep.subr.bf16.mxu0 %v6075_v39  ;;  %3278 = vmatprep.mubr.bf16.mxu0 %v6699_v14  ;;  %v6076_v41 = vld [vmem:[#allocation5 + $0x390] ss:$8 sps:$4 sm:$0xff]   ;;  %v6082_v51 = vld [vmem:[#allocation5 + $0x384] ss:$8 sps:$4 sm:$0xff]   ;;  %v6080_v52 = vld [vmem:[#allocation5 + $0x380] ss:$8 sps:$4 sm:$0xff]  }
 0x1b3   :  { %2271 = vmatmul.mubr.bf16.gmra.mxu1 %v6229_v32  ;;  %v6086_v30 = vld [vmem:[#allocation7 + $0x78] sm:$0xff]   ;;  %v6088_v54 = vld [vmem:[#allocation7 + $0x70] sm:$0xff]   ;;  %v6094_v39 = vld [vmem:[#allocation7 + $0x28] sm:$0xff]  }
 0x1b4   :  { %2744 = vmatpush1.bf16.msra.mxu1 %v6000_v55  ;;  %2763 = vmatprep.mubr.bf16.mxu1 %v6699_v14  ;;  %v6087_v1 = vld [vmem:[#allocation7 + $0x38] sm:$0xff]   ;;  %v6095_v61 = vld [vmem:[#allocation7 + $0xb0] sm:$0xff]   ;;  %v6096_v55 = vld [vmem:[#allocation7 + $0x60] sm:$0xff]  }
 0x1b5   :  { %2745 = vmatprep.subr.bf16.mxu1 %v6005_v24  ;;  %3261 = vmatpush1.bf16.msra.mxu0 %v6073_v0  ;;  %v6091_v9 = vld [vmem:[#allocation7 + $0xb8] sm:$0xff]   ;;  %v6097_v24 = vld [vmem:[#allocation7 + $0xe8] sm:$0xff]   ;;  %v6098_v0 = vld [vmem:[#allocation7 + $0x20] sm:$0xff]  }
 0x1b6   :  { %5432 = vmatprep.subr.bf16.mxu0 %v6086_v30 }
 0x1b8   :  { %2746 = vmatpush1.bf16.msra.mxu1 %v6003_v27  ;;  %3279 = vmatmul.mubr.bf16.vlgmr.msra.gmra.mxu0 %v6079_v15  ;;  %v6099_v27 = vld [vmem:[#allocation7 + $0xa8] sm:$0xff]  }
 0x1b9   :  { %3173 = vmatprep.subr.bf16.mxu1 %v6008_v56  ;;  %3288 = vmatprep.mubr.bf16.mxu0 %v6699_v14  ;;  %v6100_v56 = vld [vmem:[#allocation7 + $0x58] sm:$0xff]  }
 0x1ba   :  { %5433 = vmatpush3.bf16.msra.mxu0 %v6087_v1 }
 0x1bb   :  { %2764 = vmatmul.mubr.bf16.vlgmr.msra.gmra.mxu1 %v6009_v58  ;;  %5434 = vmatprep.subr.bf16.mxu0 %v6088_v54  ;;  %v6101_v58 = vld [vmem:[#allocation7 + $0xe0] sm:$0xff]  }
 0x1bc   :  { %3174 = vmatpush1.bf16.msra.mxu1 %v6006_v37  ;;  %2773 = vmatprep.mubr.bf16.mxu1 %v6699_v14  ;;  %v6102_v37 = vld [vmem:[#allocation7 + $0x18] sm:$0xff]  }
 0x1bd   :  { %3175 = vmatprep.subr.bf16.mxu1 %v6012_v36  ;;  %v6103_v36 = vld [vmem:[#allocation7 + $0xa0] sm:$0xff]  }
 0x1c0   :  { %3176 = vmatpush1.bf16.msra.mxu1 %v6010_v49  ;;  %3289 = vmatmul.mubr.bf16.gmra.mxu0 %v6083_v21  ;;  %v6104_v21 = vld [vmem:[#allocation7 + $0x50] sm:$0xff]  }
 0x1c1   :  { %3177 = vmatprep.subr.bf16.mxu1 %v6015_v31  ;;  %3298 = vmatprep.mubr.bf16.mxu0 %v6699_v14  ;;  %v6105_v31 = vld [vmem:[#allocation7 + $0xd8] sm:$0xff]  }
 0x1c3   :  { %2774 = vmatmul.mubr.bf16.gmra.mxu1 %v6016_v38  ;;  %v6106_v38 = vld [vmem:[#allocation7 + $0x10] sm:$0xff]  }
 0x1c4   :  { %3178 = vmatpush1.bf16.msra.mxu1 %v6013_v62  ;;  %2783 = vmatprep.mubr.bf16.mxu1 %v6699_v14  ;;  %v6107_v62 = vld [vmem:[#allocation7 + $0x98] sm:$0xff]  }
 0x1c5   :  { %3179 = vmatprep.subr.bf16.mxu1 %v6019_v42 }
 0x1c8   :  { %3180 = vmatpush1.bf16.msra.mxu1 %v6017_v57  ;;  %3299 = vmatmul.mubr.bf16.gmra.mxu0 %v6084_v59  ;;  %v6108_v57 = vld [vmem:[#allocation7 + $0x48] sm:$0xff]   ;;  %v6109_v59 = vld [vmem:[#allocation7 + $0xd0] sm:$0xff]  }
 0x1c9   :  { %3181 = vmatprep.subr.bf16.mxu1 %v6022_v23  ;;  %3308 = vmatprep.mubr.bf16.mxu0 %v6699_v14  ;;  %v6110_v23 = vld [vmem:[#allocation7 + $0x8] sm:$0xff]  }
 0x1cb   :  { %2784 = vmatmul.mubr.bf16.gmra.mxu1 %v6023_v17  ;;  %v6111_v17 = vld [vmem:[#allocation7 + $0x90] sm:$0xff]  }
 0x1cc   :  { %3182 = vmatpush1.bf16.msra.mxu1 %v6020_v20  ;;  %2793 = vmatprep.mubr.bf16.mxu1 %v6699_v14  ;;  %v6797_v14 = vpop.f32.mrf.mxu0 }
 0x1cd   :  { %3183 = vmatprep.subr.bf16.mxu1 %v6026_v8  ;;  %v6112_v8 = vld [vmem:[#allocation7 + $0x40] sm:$0xff]  }
 0x1d0   :  { %3184 = vmatpush1.bf16.msra.mxu1 %v6024_v22  ;;  %3309 = vmatmul.mubr.bf16.gmra.mxu0 %v6085_v40  ;;  %v6113_v22 = vld [vmem:[#allocation7 + $0xc8] sm:$0xff]   ;;  %v6114_v40 = vld [vmem:[#allocation7] sm:$0xff]  }
 0x1d1   :  { %3185 = vmatprep.subr.bf16.mxu1 %v6029_v44  ;;  %v6115_v44 = vld [vmem:[#allocation7 + $0x88] sm:$0xff]  }
 0x1d3   :  { %2794 = vmatmul.mubr.bf16.gmra.mxu1 %v6030_v26 }
 0x1d4   :  { %3186 = vmatpush1.bf16.msra.mxu1 %v6027_v33  ;;  %3205 = vmatprep.mubr.bf16.mxu1 %v6732_v16  ;;  %v6064_v16 = vld [vmem:[#allocation5 + $0x3b0] ss:$8 sps:$4 sm:$0xff]   ;;  %v6116_v33 = vld [vmem:[#allocation7 + $0xc0] sm:$0xff]  }
 0x1d5   :  { %3187 = vmatprep.subr.bf16.mxu1 %v6036_v28  ;;  %v6117_v28 = vld [vmem:[#allocation7 + $0x178] sm:$0xff]  }
 0x1d8   :  { %3188 = vmatpush1.bf16.msra.mxu1 %v6034_v43  ;;  %v6118_v43 = vld [vmem:[#allocation7 + $0x80] sm:$0xff]  }
 0x1d9   :  { %3189 = vmatprep.subr.bf16.mxu1 %v6042_v45 }
 0x1dc   :  { %3190 = vmatpush2.bf16.msra.mxu1 %v6040_v5  ;;  %v6121_v5 = vld [vmem:[#allocation7 + $0x1f8] sm:$0xff]  }
 0x1dd   :  { %3191 = vmatprep.subr.bf16.mxu1 %v6048_v46 }
 0x1e0   :  { %3192 = vmatpush2.bf16.msra.mxu1 %v6046_v7 }
 0x1e1   :  { %3193 = vmatprep.subr.bf16.mxu1 %v6054_v47 }
 0x1e4   :  { %3194 = vmatpush2.bf16.msra.mxu1 %v6052_v4 }
 0x1e5   :  { %3195 = vmatprep.subr.bf16.mxu1 %v6060_v25 }
 0x1e8   :  { %3196 = vmatpush2.bf16.msra.mxu1 %v6058_v34 }
 0x1e9   :  { %3197 = vmatprep.subr.bf16.mxu1 %v6066_v48 }
 0x1ec   :  { %3198 = vmatpush2.bf16.msra.mxu1 %v6064_v16 }
 0x1ed   :  { %3199 = vmatprep.subr.bf16.mxu1 %v6072_v19 }
 0x1f0   :  { %3200 = vmatpush2.bf16.msra.mxu1 %v6070_v35 }
 0x1f1   :  { %3201 = vmatprep.subr.bf16.mxu1 %v6078_v50 }
 0x1f4   :  { %3202 = vmatpush2.bf16.msra.mxu1 %v6076_v41 }
 0x1f5   :  { %3203 = vmatprep.subr.bf16.mxu1 %v6082_v51 }
 0x1f8   :  { %3204 = vmatpush2.bf16.msra.mxu1 %v6080_v52 }
 0x1fb   :  { %3206 = vmatmul.mubr.bf16.vlgmr.msra.gmra.mxu1 %v6734_v29  ;;  %v6089_v29 = vld [vmem:[#allocation7 + $0xf8] sm:$0xff]  }
 0x1fc   :  { %3215 = vmatprep.mubr.bf16.mxu1 %v6756_v10  ;;  %v6093_v10 = vld [vmem:[#allocation7 + $0xf0] sm:$0xff]   ;;  %5454 = vmatprep.subr.bf16.mxu1 %v6089_v29 }
 0x1fd   :  { %5455 = vmatpush3.bf16.msra.mxu1 %v6091_v9 }
 0x1fe   :  { %5456 = vmatprep.subr.bf16.mxu1 %v6093_v10 }
 0x201   :  { %5457 = vmatpush3.bf16.msra.mxu1 %v6095_v61 }
 0x202   :  { %5458 = vmatprep.subr.bf16.mxu1 %v6097_v24 }
 0x203   :  { %3216 = vmatmul.mubr.bf16.gmra.mxu1 %v6762_v60  ;;  %v6090_v60 = vld [vmem:[#allocation7 + $0x30] sm:$0xff]  }
 0x204   :  { %3225 = vmatprep.mubr.bf16.mxu1 %v6769_v3  ;;  %v6092_v3 = vld [vmem:[#allocation7 + $0x68] sm:$0xff]   ;;  %5435 = vmatpush3.bf16.msra.mxu0 %v6090_v60 }
 0x205   :  { %5436 = vmatprep.subr.bf16.mxu0 %v6092_v3  ;;  %5459 = vmatpush3.bf16.msra.mxu1 %v6099_v27 }
 0x206   :  { %5460 = vmatprep.subr.bf16.mxu1 %v6101_v58 }
 0x208   :  { %5437 = vmatpush3.bf16.msra.mxu0 %v6094_v39 }
 0x209   :  { %5438 = vmatprep.subr.bf16.mxu0 %v6096_v55  ;;  %5461 = vmatpush3.bf16.msra.mxu1 %v6103_v36 }
 0x20a   :  { %5462 = vmatprep.subr.bf16.mxu1 %v6105_v31 }
 0x20b   :  { %3226 = vmatmul.mubr.bf16.gmra.mxu1 %v6771_v63  ;;  %v6799_v63 = vpop.f32.mrf.mxu0 }
 0x20c   :  { %3235 = vmatprep.mubr.bf16.mxu1 %v5213_v53  ;;  %5439 = vmatpush3.bf16.msra.mxu0 %v6098_v0 }
 0x20d   :  { %v6801_v13 = vpop.f32.mrf.mxu0  ;;  %5440 = vmatprep.subr.bf16.mxu0 %v6100_v56  ;;  %5463 = vmatpush3.bf16.msra.mxu1 %v6107_v62 }
 0x20e   :  { %5464 = vmatprep.subr.bf16.mxu1 %v6109_v59 }
 0x20f   :  { %v6803_v11 = vpop.f32.mrf.mxu0 }
 0x210   :  { %5441 = vmatpush3.bf16.msra.mxu0 %v6102_v37 }
 0x211   :  { %v6805_v32 = vpop.f32.mrf.mxu0  ;;  %5442 = vmatprep.subr.bf16.mxu0 %v6104_v21  ;;  %5465 = vmatpush3.bf16.msra.mxu1 %v6111_v17 }
 0x212   :  { %5466 = vmatprep.subr.bf16.mxu1 %v6113_v22 }
 0x213   :  { %3236 = vmatmul.mubr.bf16.gmra.mxu1 %v5212_v18  ;;  %v6807_v15 = vpop.f32.mrf.mxu0 }
 0x214   :  { %5443 = vmatpush3.bf16.msra.mxu0 %v6106_v38 }
 0x215   :  { %v6809_v49 = vpop.f32.mrf.mxu0  ;;  %5444 = vmatprep.subr.bf16.mxu0 %v6108_v57  ;;  %5467 = vmatpush3.bf16.msra.mxu1 %v6115_v44 }
 0x216   :  { %5468 = vmatprep.subr.bf16.mxu1 %v6116_v33 }
 0x217   :  { %v6811_v42 = vpop.f32.mrf.mxu0 }
 0x218   :  { %5445 = vmatpush3.bf16.msra.mxu0 %v6110_v23 }
 0x219   :  { %v6813_v20 = vpop.f32.mrf.mxu0  ;;  %5446 = vmatprep.subr.bf16.mxu0 %v6112_v8  ;;  %5469 = vmatpush3.bf16.msra.mxu1 %v6118_v43 }
 0x21a   :  { %5498 = vmatprep.subr.bf16.mxu1 %v6121_v5 }
 0x21b   :  { %v6815_v26 = vpop.f32.mrf.mxu0 }
 0x21c   :  { %5447 = vmatpush3.bf16.msra.mxu0 %v6114_v40 }
 0x21d   :  { %v6817_v45 = vpop.f32.mrf.mxu0  ;;  %5476 = vmatprep.subr.bf16.mxu0 %v6117_v28 }
 0x21f   :  { %v6819_v46 = vpop.f32.mrf.mxu0 }
 0x220   :  { %7115 = vst [vmem:[#allocation10_spill] sm:$0xff] %v6819_v46 }
 0x221   :  { %v6821_v7 = vpop.f32.mrf.mxu0 }
 0x222   :  { %7116 = vst [vmem:[#allocation11_spill] sm:$0xff] %v6821_v7 }
 0x223   :  { %v6823_v47 = vpop.f32.mrf.mxu0 }
 0x224   :  { %7117 = vst [vmem:[#allocation25_spill] sm:$0xff] %v6823_v47 }
 0x225   :  { %v6825_v4 = vpop.f32.mrf.mxu0 }
 0x226   :  { %7118 = vst [vmem:[#allocation27_spill] sm:$0xff] %v6825_v4 }
 0x258   :  { %v2692_v48 = vpop.f32.mrf.mxu0 }
 0x259   :  { %v2242_v25 = vpop.f32.mrf.mxu1 }
 0x25a   :  { %v2694_v35 = vpop.f32.mrf.mxu0 }
 0x25b   :  { %v2244_v34 = vpop.f32.mrf.mxu1 }
 0x25c   :  { %v6829_v51 = vpop.f32.mrf.mxu0 }
 0x25d   :  { %v2246_v16 = vpop.f32.mrf.mxu1 }
 0x25e   :  { %v6835_v18 = vpop.f32.mrf.mxu0 }
 0x25f   :  { %v2248_v19 = vpop.f32.mrf.mxu1 }
 0x260   :  { %v6841_v54 = vpop.f32.mrf.mxu0 }
 0x262   :  { %v2252_v50 = vpop.f32.mrf.mxu1  ;;  %v6847_v10 = vpop.f32.mrf.mxu0 }
 0x263   :  { %v2326_v7 = vadd.f32 %v6803_v11, %v2252_v50 }
 0x264   :  { %v6827_v41 = vpop.f32.mrf.mxu1  ;;  %v6853_v39 = vpop.f32.mrf.mxu0 }
 0x266   :  { %v6831_v52 = vpop.f32.mrf.mxu1  ;;  %v6859_v24 = vpop.f32.mrf.mxu0 }
 0x268   :  { %v6833_v53 = vpop.f32.mrf.mxu1  ;;  %v6861_v27 = vpop.f32.mrf.mxu0 }
 0x26a   :  { %v6837_v30 = vpop.f32.mrf.mxu1  ;;  %v6863_v58 = vpop.f32.mrf.mxu0 }
 0x26c   :  { %v6839_v1 = vpop.f32.mrf.mxu1  ;;  %v6865_v36 = vpop.f32.mrf.mxu0 }
 0x26e   :  { %v6843_v29 = vpop.f32.mrf.mxu1  ;;  %v6867_v31 = vpop.f32.mrf.mxu0 }
 0x26f   :  { %7122 = vst [vmem:[#allocation18_spill] sm:$0xff] %v6867_v31 }
 0x270   :  { %v6845_v9 = vpop.f32.mrf.mxu1  ;;  %v6869_v62 = vpop.f32.mrf.mxu0 }
 0x271   :  { %7123 = vst [vmem:[#allocation20_spill] sm:$0xff] %v6869_v62 }
 0x272   :  { %v6873_v59 = vpop.f32.mrf.mxu0 }
 0x273   :  { %v6849_v60 = vpop.f32.mrf.mxu1  ;;  %7124 = vst [vmem:[#allocation13_spill] sm:$0xff] %v6873_v59 }
 0x274   :  { %v6877_v17 = vpop.f32.mrf.mxu0 }
 0x275   :  { %v6851_v3 = vpop.f32.mrf.mxu1  ;;  %7125 = vst [vmem:[#allocation14_spill] sm:$0xff] %v6877_v17 }
 0x276   :  { %7119 = vst [vmem:[#allocation16_spill] sm:$0xff] %v6851_v3  ;;  %v6881_v22 = vpop.f32.mrf.mxu0 }
 0x277   :  { %v6855_v61 = vpop.f32.mrf.mxu1  ;;  %7127 = vst [vmem:[#allocation22_spill] sm:$0xff] %v6881_v22 }
 0x278   :  { %7120 = vst [vmem:[#allocation12_spill] sm:$0xff] %v6855_v61  ;;  %v3280_v44 = vpop.f32.mrf.mxu0 }
 0x279   :  { %v6857_v55 = vpop.f32.mrf.mxu1 }
 0x27a   :  { %7121 = vst [vmem:[#allocation29_spill] sm:$0xff] %v6857_v55  ;;  %v3282_v28 = vpop.f32.mrf.mxu0 }
 0x27b   :  { %v2765_v0 = vpop.f32.mrf.mxu1 }
 0x27c   :  { %v3284_v5 = vpop.f32.mrf.mxu0 }
 0x27d   :  { %v2767_v56 = vpop.f32.mrf.mxu1 }
 0x27e   :  { %v3286_v59 = vpop.f32.mrf.mxu0 }
 0x27f   :  { %v2769_v37 = vpop.f32.mrf.mxu1 }
 0x280   :  { %v3290_v4 = vpop.f32.mrf.mxu0 }
 0x281   :  { %v2771_v21 = vpop.f32.mrf.mxu1 }
 0x282   :  { %v6893_v17 = vpop.f32.mrf.mxu0 }
 0x283   :  { %v2775_v38 = vpop.f32.mrf.mxu1 }
 0x284   :  { %v6897_v22 = vpop.f32.mrf.mxu0 }
 0x285   :  { %v6871_v57 = vpop.f32.mrf.mxu1 }
 0x286   :  { %v6902_v62 = vpop.f32.mrf.mxu0 }
 0x287   :  { %v6875_v23 = vpop.f32.mrf.mxu1  ;;  %7135 = vst [vmem:[#allocation30_spill] sm:$0xff] %v6902_v62 }
 0x288   :  { %v6913_v3 = vpop.f32.mrf.mxu0 }
 0x289   :  { %v6879_v8 = vpop.f32.mrf.mxu1 }
 0x28a   :  { %7126 = vst [vmem:[#allocation21_spill] sm:$0xff] %v6879_v8  ;;  %v7138_v8 = vsub.s32 1, %v6610_v12 }
 0x28b   :  { %v6883_v40 = vpop.f32.mrf.mxu1 }
 0x28c   :  { %7128 = vst [vmem:[#allocation15_spill] sm:$0xff] %v6883_v40 }
 0x28d   :  { %v6885_v33 = vpop.f32.mrf.mxu1 }
 0x28e   :  { %7129 = vst [vmem:[#allocation23_spill] sm:$0xff] %v6885_v33  ;;  %v2316_v33 = vadd.f32 %v6795_v2, %v2242_v25 }
 0x28f   :  { %v6887_v43 = vpop.f32.mrf.mxu1 }
 0x290   :  { %7130 = vst [vmem:[#allocation17_spill] sm:$0xff] %v6887_v43  ;;  %v2318_v43 = vadd.f32 %v6797_v14, %v2244_v34  ;;  %v2693_v40 = vadd.f32 %v2692_v48, %v2316_v33  ;;  %v7137_v14 = vsub.s32 0, %v6610_v12 }
 0x291   :  { %v6889_v6 = vpop.f32.mrf.mxu1 }
 0x292   :  { %7131 = vst [vmem:[#allocation24_spill] sm:$0xff] %v6889_v6  ;;  %v2320_v6 = vadd.f32 %v6799_v63, %v2246_v16  ;;  %v2766_v2 = vadd.f32 %v2765_v0, %v2693_v40  ;;  %v2695_v25 = vadd.f32 %v2694_v35, %v2318_v43  ;;  %v2328_v16 = vadd.f32 %v6805_v32, %v6827_v41 }
 0x293   :  { %v6891_v55 = vpop.f32.mrf.mxu1  ;;  %v2703_v35 = vadd.f32 %v6841_v54, %v2326_v7  ;;  %v2336_v32 = vadd.f32 %v6811_v42, %v6837_v30  ;;  %v2338_v7 = vadd.f32 %v6813_v20, %v6839_v1 }
 0x294   :  { %7132 = vst [vmem:[#allocation19_spill] sm:$0xff] %v6891_v55  ;;  %v3335_v55 = vld [vmem:[%s7069_s4] sm:$0x3]  ;;  %v2768_v63 = vadd.f32 %v2767_v56, %v2695_v25 }
 0x295   :  { %v6895_v47 = vpop.f32.mrf.mxu1  ;;  %v6917_v34 = vrot.slane %v3335_v55, %v7137_v14  ;;  %v6921_v46 = vrot.slane %v3335_v55, %v7138_v8  ;;  %v7140_v14 = vld [vmem:[#allocation21_spill] sm:$0xff] }
 0x296   :  { %7133 = vst [vmem:[#allocation26_spill] sm:$0xff] %v6895_v47  ;;  %v2322_v47 = vadd.f32 %v6801_v13, %v2248_v19  ;;  %v2697_v13 = vadd.f32 %v6829_v51, %v2320_v6  ;;  %v2330_v6 = vadd.f32 %v6807_v15, %v6831_v52  ;;  %v2332_v51 = vadd.f32 %v6809_v49, %v6833_v53 }
 0x297   :  { %v6899_v61 = vpop.f32.mrf.mxu1  ;;  %v2705_v15 = vadd.f32 %v6847_v10, %v2328_v16  ;;  %v2342_v10 = vadd.f32 %v6817_v45, %v6845_v9  ;;  %v7139_v45 = vld [vmem:[#allocation10_spill] sm:$0xff]  ;;  %v7142_v16 = vld [vmem:[#allocation16_spill] sm:$0xff] }
 0x298   :  { %7134 = vst [vmem:[#allocation28_spill] sm:$0xff] %v6899_v61  ;;  %v2699_v19 = vadd.f32 %v6835_v18, %v2322_v47  ;;  %v2770_v0 = vadd.f32 %v2769_v37, %v2697_v13  ;;  %v2340_v37 = vadd.f32 %v6815_v26, %v6843_v29  ;;  %v2715_v26 = vadd.f32 %v6863_v58, %v2338_v7  ;;  %v7141_v13 = vld [vmem:[#allocation30_spill] sm:$0xff] }
 0x299   :  { %v6905_v31 = vpop.f32.mrf.mxu1  ;;  %v2346_v9 = vadd.f32 %v7139_v45, %v6849_v60 }
 0x29a   :  { %7136 = vst [vmem:[#allocation31_spill] sm:$0xff] %v6905_v31  ;;  %v2772_v41 = vadd.f32 %v2771_v21, %v2699_v19  ;;  %v2707_v21 = vadd.f32 %v6853_v39, %v2330_v6  ;;  %v7143_v19 = vld [vmem:[#allocation11_spill] sm:$0xff] }
 0x29c   :  { %v2780_v33 = vadd.f32 %v6875_v23, %v2707_v21  ;;  %v7148_v21 = vld [vmem:[#allocation12_spill] sm:$0xff] }
 0x2bb   :  { %v3207_v61 = vpop.f32.mrf.mxu1 }
 0x2bc   :  { %v3281_v62 = vadd.f32 %v3280_v44, %v3207_v61  ;;  %v6928_v61 = vpop.f32.mrf.mxu0  ;;  %v2778_v44 = vadd.f32 %v6871_v57, %v2705_v15  ;;  %v6123_v15 = vld [vmem:[#allocation7 + $0x1b8] sm:$0xff]  }
 0x2bd   :  { %v3209_v31 = vpop.f32.mrf.mxu1 }
 0x2be   :  { %v3319_v48 = vadd.f32 %v3281_v62, %v2766_v2  ;;  %v3283_v11 = vadd.f32 %v3282_v28, %v3209_v31  ;;  %v2776_v31 = vadd.f32 %v2775_v38, %v2703_v35  ;;  %v6943_v53 = vpop.f32.mrf.mxu0  ;;  %v2709_v62 = vadd.f32 %v6859_v24, %v2332_v51  ;;  %v7144_v35 = vld [vmem:[#allocation15_spill] sm:$0xff] }
 0x2bf   :  { %v3211_v50 = vpop.f32.mrf.mxu1 }
 0x2c0   :  { %v3347_v12 = vadd.f32 %v6917_v34, %v3319_v48  ;;  %v3320_v55 = vadd.f32 %v3283_v11, %v2768_v63  ;;  %v3285_v8 = vadd.f32 %v3284_v5, %v3211_v50  ;;  %v6957_v28 = vpop.f32.mrf.mxu0  ;;  %v6120_v11 = vld [vmem:[#allocation7 + $0x170] sm:$0xff]  }
 0x2c1   :  { %v3213_v47 = vpop.f32.mrf.mxu1 }
 0x2c2   :  { %v3348_v18 = vadd.f32 %v6921_v46, %v3320_v55  ;;  %v3321_v54 = vadd.f32 %v3285_v8, %v2770_v0  ;;  %v3287_v56 = vadd.f32 %v3286_v59, %v3213_v47  ;;  %v3363_v52 = vmax.f32 %v3347_v12, 0.0  ;;  %v7145_v0 = vld [vmem:[#allocation18_spill] sm:$0xff]  ;;  %v3310_v8 = vpop.f32.mrf.mxu0  ;;  %v7146_v47 = vld [vmem:[#allocation20_spill] sm:$0xff] }
 0x2c3   :  { %v3217_v49 = vpop.f32.mrf.mxu1  ;;  %v2713_v59 = vadd.f32 %v6861_v27, %v2336_v32  ;;  %v2719_v60 = vadd.f32 %v7145_v0, %v2342_v10 }
 0x2c4   :  { %v3364_v42 = vmax.f32 %v3348_v18, 0.0  ;;  %v3349_v30 = vadd.f32 %v6917_v34, %v3321_v54  ;;  %v3322_v20 = vadd.f32 %v3287_v56, %v2772_v41  ;;  %v3291_v1 = vadd.f32 %v3290_v4, %v3217_v49 }
 0x2c5   :  { %v3219_v29 = vpop.f32.mrf.mxu1  ;;  %v2717_v4 = vadd.f32 %v6865_v36, %v2340_v37  ;;  %v6230_v5 = vpack.c.bf16 %v3363_v52, %v3363_v52  ;;  %v6119_v36 = vld [vmem:[#allocation7 + $0x138] sm:$0xff]   ;;  %v2786_v50 = vadd.f32 %v7144_v35, %v2713_v59  ;;  %v2723_v41 = vadd.f32 %v7146_v47, %v2346_v9  ;;  %v7147_v52 = vld [vmem:[#allocation23_spill] sm:$0xff]  ;;  %v7157_v35 = vld [vmem:[#allocation26_spill] sm:$0xff] }
 0x2c6   :  { %v3350_v38 = vadd.f32 %v6921_v46, %v3322_v20  ;;  %v3323_v40 = vadd.f32 %v3291_v1, %v2776_v31  ;;  %v3293_v39 = vadd.f32 %v6893_v17, %v3219_v29  ;;  %v3365_v27 = vmax.f32 %v3349_v30, 0.0  ;;  %v6122_v31 = vld [vmem:[#allocation7 + $0x130] sm:$0xff]   ;;  %v7150_v29 = vld [vmem:[#allocation17_spill] sm:$0xff]  ;;  %v6126_v9 = vld [vmem:[#allocation7 + $0x128] sm:$0xff]  }
 0x2c7   :  { %v3221_v24 = vpop.f32.mrf.mxu1  ;;  %v6231_v25 = vpack.c.bf16 %v3364_v42, %v3364_v42  ;;  %v2782_v17 = vadd.f32 %v7140_v14, %v2709_v62  ;;  %v2788_v49 = vadd.f32 %v7147_v52, %v2715_v26  ;;  %v6125_v1 = vld [vmem:[#allocation7 + $0x1f0] sm:$0xff]   ;;  %v7149_v62 = vld [vmem:[#allocation25_spill] sm:$0xff]  ;;  %v2790_v10 = vadd.f32 %v7150_v29, %v2717_v4  ;;  %v6130_v47 = vld [vmem:[#allocation7 + $0x120] sm:$0xff]  }
 0x2c8   :  { %v3366_v58 = vmax.f32 %v3350_v38, 0.0  ;;  %v3295_v43 = vadd.f32 %v6897_v22, %v3221_v24  ;;  %v6963_v2 = vadd.f32 %v6917_v34, %v3323_v40  ;;  %v3324_v57 = vadd.f32 %v3293_v39, %v2778_v44  ;;  %v3312_v44 = vpop.f32.mrf.mxu0  ;;  %v7151_v24 = vld [vmem:[#allocation29_spill] sm:$0xff]  ;;  %v7154_v14 = vld [vmem:[#allocation24_spill] sm:$0xff] }
 0x2c9   :  { %v3223_v23 = vpop.f32.mrf.mxu1  ;;  %v2348_v22 = vadd.f32 %v7143_v19, %v7142_v16  ;;  %3620 = vmatprep.mubr.bf16.mxu0 %v6231_v25  ;;  %v6232_v7 = vpack.c.bf16 %v3365_v27, %v3365_v27  ;;  %v2350_v59 = vadd.f32 %v7149_v62, %v7148_v21  ;;  %v7152_v27 = vld [vmem:[#allocation27_spill] sm:$0xff] }
 0x2ca   :  { %v3325_v63 = vadd.f32 %v3295_v43, %v2780_v33  ;;  %v3297_v48 = vadd.f32 %v7141_v13, %v3223_v23  ;;  %v3352_v12 = vadd.f32 %v6921_v46, %v3324_v57  ;;  %3621 = vmatmul.mubr.bf16.vlgmr.msra.gmra.mxu0 %v6230_v5  ;;  %v3367_v18 = vmax.f32 %v6963_v2, 0.0  ;;  %v7153_v43 = vld [vmem:[#allocation13_spill] sm:$0xff]  ;;  %v6127_v57 = vld [vmem:[#allocation7 + $0x1b0] sm:$0xff]   ;;  %v7160_v21 = vld [vmem:[#allocation31_spill] sm:$0xff] }
 0x2cb   :  { %v3227_v55 = vpop.f32.mrf.mxu1  ;;  %5477 = vmatpush3.bf16.msra.mxu0 %v6119_v36  ;;  %v6233_v37 = vpack.c.bf16 %v3366_v58, %v3366_v58  ;;  %v2352_v58 = vadd.f32 %v7152_v27, %v7151_v24  ;;  %v2725_v5 = vadd.f32 %v7153_v43, %v2348_v22  ;;  %v6128_v36 = vld [vmem:[#allocation7 + $0x160] sm:$0xff]   ;;  %v3314_v22 = vpop.f32.mrf.mxu0  ;;  %v6136_v24 = vld [vmem:[#allocation7 + $0x150] sm:$0xff]   ;;  %v6137_v27 = vld [vmem:[#allocation7 + $0x1d8] sm:$0xff]  }
 0x2cc   :  { %v6973_v6 = vadd.f32 %v6917_v34, %v3325_v63  ;;  %v3326_v51 = vadd.f32 %v3297_v48, %v2782_v17  ;;  %v3301_v32 = vadd.f32 %v6913_v3, %v3227_v55  ;;  %v3368_v54 = vmax.f32 %v3352_v12, 0.0  ;;  %5478 = vmatprep.subr.bf16.mxu0 %v6120_v11  ;;  %v6124_v3 = vld [vmem:[#allocation7 + $0x168] sm:$0xff]   ;;  %v7156_v48 = vld [vmem:[#allocation14_spill] sm:$0xff] }
 0x2cd   :  { %v3229_v56 = vpop.f32.mrf.mxu1  ;;  %3804 = vmatprep.mubr.bf16.mxu1 %v6233_v37  ;;  %v2792_v17 = vadd.f32 %v7154_v14, %v2719_v60  ;;  %v7155_v63 = vld [vmem:[#allocation19_spill] sm:$0xff]  ;;  %v2727_v11 = vadd.f32 %v7156_v48, %v2350_v59  ;;  %v6133_v37 = vld [vmem:[#allocation7 + $0x1e0] sm:$0xff]  }
 0x2ce   :  { %v3354_v42 = vadd.f32 %v6921_v46, %v3326_v51  ;;  %v3327_v30 = vadd.f32 %v3301_v32, %v2786_v50  ;;  %v3303_v20 = vadd.f32 %v6928_v61, %v3229_v56  ;;  %v3369_v38 = vmax.f32 %v6973_v6, 0.0  ;;  %3805 = vmatmul.mubr.bf16.vlgmr.msra.gmra.mxu1 %v6232_v7  ;;  %v6132_v56 = vld [vmem:[#allocation7 + $0x158] sm:$0xff]   ;;  %v6147_v48 = vld [vmem:[#allocation7 + $0x188] sm:$0xff]  }
 0x2cf   :  { %v3231_v40 = vpop.f32.mrf.mxu1  ;;  %5479 = vmatpush3.bf16.msra.mxu0 %v6122_v31  ;;  %5499 = vmatpush3.bf16.msra.mxu1 %v6123_v15  ;;  %v6234_v4 = vpack.c.bf16 %v3368_v54, %v3368_v54  ;;  %v2796_v13 = vadd.f32 %v7155_v63, %v2723_v41  ;;  %v2798_v50 = vadd.f32 %v7157_v35, %v2725_v5  ;;  %v7158_v31 = vld [vmem:[#allocation22_spill] sm:$0xff]  ;;  %v6156_v2 = vld [vmem:[#allocation7 + $0x268] sm:$0xff]  }
 0x2d0   :  { %v3370_v33 = vmax.f32 %v3354_v42, 0.0  ;;  %v6986_v26 = vadd.f32 %v6917_v34, %v3327_v30  ;;  %v3328_v39 = vadd.f32 %v3303_v20, %v2788_v49  ;;  %v3305_v61 = vadd.f32 %v6943_v53, %v3231_v40  ;;  %5480 = vmatprep.subr.bf16.mxu0 %v6124_v3  ;;  %5500 = vmatprep.subr.bf16.mxu1 %v6125_v1  ;;  %v6129_v53 = vld [vmem:[#allocation7 + $0x1e8] sm:$0xff]   ;;  %v3316_v49 = vpop.f32.mrf.mxu0  ;;  %v7159_v42 = vld [vmem:[#allocation28_spill] sm:$0xff]  ;;  %v6134_v40 = vld [vmem:[#allocation7 + $0x118] sm:$0xff]  }
 0x2d1   :  { %v3233_v45 = vpop.f32.mrf.mxu1  ;;  %3983 = vmatprep.mubr.bf16.mxu0 %v6234_v4  ;;  %v2729_v15 = vadd.f32 %v7158_v31, %v2352_v58  ;;  %v2800_v30 = vadd.f32 %v7159_v42, %v2727_v11  ;;  %v6138_v4 = vld [vmem:[#allocation7 + $0x110] sm:$0xff]   ;;  %v6144_v63 = vld [vmem:[#allocation7 + $0x140] sm:$0xff]   ;;  %v6236_v35 = vpack.c.bf16 %v3367_v18, %v3367_v18  ;;  %v6161_v6 = vld [vmem:[#allocation7 + $0x2e8] sm:$0xff]  }
 0x2d2   :  { %v6993_v23 = vadd.f32 %v6921_v46, %v3328_v39  ;;  %v3329_v25 = vadd.f32 %v3305_v61, %v2790_v10  ;;  %v3307_v16 = vadd.f32 %v6957_v28, %v3233_v45  ;;  %v3371_v0 = vmax.f32 %v6986_v26, 0.0  ;;  %v6131_v28 = vld [vmem:[#allocation7 + $0x1a8] sm:$0xff]   ;;  %v6148_v11 = vld [vmem:[#allocation7 + $0x1c0] sm:$0xff]   ;;  %v6157_v18 = vld [vmem:[#allocation7 + $0x2f0] sm:$0xff]  }
 0x2d3   :  { %v3237_v19 = vpop.f32.mrf.mxu1  ;;  %5481 = vmatpush3.bf16.msra.mxu0 %v6126_v9  ;;  %5501 = vmatpush3.bf16.msra.mxu1 %v6127_v57  ;;  %v6235_v7 = vpack.c.bf16 %v3370_v33, %v3370_v33  ;;  %v2802_v62 = vadd.f32 %v7160_v21, %v2729_v15  ;;  %v6139_v9 = vld [vmem:[#allocation7 + $0x198] sm:$0xff]   ;;  %v6167_v15 = vld [vmem:[#allocation7 + $0x2a0] sm:$0xff]   ;;  %v6175_v21 = vld [vmem:[#allocation7 + $0x290] sm:$0xff]  }
 0x2d4   :  { %v3372_v12 = vmax.f32 %v6993_v23, 0.0  ;;  %v3311_v55 = vadd.f32 %v3310_v8, %v3237_v19  ;;  %v7003_v51 = vadd.f32 %v6917_v34, %v3329_v25  ;;  %v3330_v60 = vadd.f32 %v3307_v16, %v2792_v17  ;;  %5482 = vmatprep.subr.bf16.mxu0 %v6128_v36  ;;  %5502 = vmatprep.subr.bf16.mxu1 %v6129_v53  ;;  %v6140_v25 = vld [vmem:[#allocation7 + $0x148] sm:$0xff]   ;;  %v6141_v36 = vld [vmem:[#allocation7 + $0x1d0] sm:$0xff]   ;;  %v6149_v16 = vld [vmem:[#allocation7 + $0x278] sm:$0xff]  }
 0x2d5   :  { %v3239_v32 = vpop.f32.mrf.mxu1  ;;  %4162 = vmatprep.mubr.bf16.mxu1 %v6235_v7  ;;  %v6143_v17 = vld [vmem:[#allocation7 + $0x190] sm:$0xff]   ;;  %v6150_v19 = vld [vmem:[#allocation7 + $0x180] sm:$0xff]   ;;  %v6155_v7 = vld [vmem:[#allocation7 + $0x2b8] sm:$0xff]  }
 0x2d6   :  { %v3331_v41 = vadd.f32 %v3311_v55, %v2796_v13  ;;  %v3313_v54 = vadd.f32 %v3312_v44, %v3239_v32  ;;  %v7007_v8 = vadd.f32 %v6921_v46, %v3330_v60  ;;  %v3373_v59 = vmax.f32 %v7003_v51, 0.0  ;;  %v6135_v44 = vld [vmem:[#allocation7 + $0x1a0] sm:$0xff]   ;;  %v6145_v13 = vld [vmem:[#allocation7 + $0x1c8] sm:$0xff]   ;;  %v6153_v55 = vld [vmem:[#allocation7 + $0x2f8] sm:$0xff]  }
 0x2d7   :  { %v3241_v52 = vpop.f32.mrf.mxu1  ;;  %5483 = vmatpush3.bf16.msra.mxu0 %v6130_v47  ;;  %5503 = vmatpush3.bf16.msra.mxu1 %v6131_v28  ;;  %v6237_v60 = vpack.c.bf16 %v3372_v12, %v3372_v12  ;;  %v6154_v32 = vld [vmem:[#allocation7 + $0x230] sm:$0xff]   ;;  %v6238_v47 = vpack.c.bf16 %v3369_v38, %v3369_v38  ;;  %v6158_v12 = vld [vmem:[#allocation7 + $0x228] sm:$0xff]   ;;  %v6162_v38 = vld [vmem:[#allocation7 + $0x220] sm:$0xff]  }
 0x2d8   :  { %v7011_v20 = vadd.f32 %v6917_v34, %v3331_v41  ;;  %v3332_v3 = vadd.f32 %v3313_v54, %v2798_v50  ;;  %v3315_v1 = vadd.f32 %v3314_v22, %v3241_v52  ;;  %v3374_v29 = vmax.f32 %v7007_v8, 0.0  ;;  %5484 = vmatprep.subr.bf16.mxu0 %v6132_v56  ;;  %5504 = vmatprep.subr.bf16.mxu1 %v6133_v37  ;;  %v6151_v22 = vld [vmem:[#allocation7 + $0x238] sm:$0xff]   ;;  %v6152_v50 = vld [vmem:[#allocation7 + $0x270] sm:$0xff]   ;;  %v6160_v41 = vld [vmem:[#allocation7 + $0x260] sm:$0xff]  }
 0x2d9   :  { %v3243_v10 = vpop.f32.mrf.mxu1  ;;  %v6159_v28 = vld [vmem:[#allocation7 + $0x2b0] sm:$0xff]   ;;  %v6163_v54 = vld [vmem:[#allocation7 + $0x2a8] sm:$0xff]   ;;  %v6164_v56 = vld [vmem:[#allocation7 + $0x258] sm:$0xff]  }
 0x2da   :  { %v7017_v33 = vadd.f32 %v6921_v46, %v3332_v3  ;;  %v3333_v39 = vadd.f32 %v3315_v1, %v2800_v30  ;;  %v3317_v61 = vadd.f32 %v3316_v49, %v3243_v10  ;;  %v3375_v58 = vmax.f32 %v7011_v20, 0.0  ;;  %v6165_v37 = vld [vmem:[#allocation7 + $0x2e0] sm:$0xff]   ;;  %v6166_v31 = vld [vmem:[#allocation7 + $0x218] sm:$0xff]   ;;  %v6168_v8 = vld [vmem:[#allocation7 + $0x250] sm:$0xff]  }
 0x2db   :  { %5485 = vmatpush3.bf16.msra.mxu0 %v6134_v40  ;;  %5505 = vmatpush3.bf16.msra.mxu1 %v6135_v44  ;;  %v6239_v23 = vpack.c.bf16 %v3374_v29, %v3374_v29  ;;  %v6169_v52 = vld [vmem:[#allocation7 + $0x2d8] sm:$0xff]   ;;  %v6170_v49 = vld [vmem:[#allocation7 + $0x210] sm:$0xff]   ;;  %v6172_v30 = vld [vmem:[#allocation7 + $0x248] sm:$0xff]  }
 0x2dc   :  { %v3376_v43 = vmax.f32 %v7017_v33, 0.0  ;;  %v7022_v5 = vadd.f32 %v6917_v34, %v3333_v39  ;;  %v3334_v45 = vadd.f32 %v3317_v61, %v2802_v62  ;;  %5486 = vmatprep.subr.bf16.mxu0 %v6136_v24  ;;  %5506 = vmatprep.subr.bf16.mxu1 %v6137_v27  ;;  %v6142_v34 = vld [vmem:[#allocation7 + $0x108] sm:$0xff]   ;;  %v6171_v42 = vld [vmem:[#allocation7 + $0x298] sm:$0xff]   ;;  %v6173_v3 = vld [vmem:[#allocation7 + $0x2d0] sm:$0xff]   ;;  %v6240_v27 = vpack.c.bf16 %v3371_v0, %v3371_v0 }
 0x2dd   :  { %v6174_v1 = vld [vmem:[#allocation7 + $0x208] sm:$0xff]   ;;  %v6176_v62 = vld [vmem:[#allocation7 + $0x240] sm:$0xff]   ;;  %v6181_v39 = vld [vmem:[#allocation7 + $0x378] sm:$0xff]  }
 0x2de   :  { %v7025_v57 = vadd.f32 %v6921_v46, %v3334_v45  ;;  %v3377_v53 = vmax.f32 %v7022_v5, 0.0  ;;  %v6146_v46 = vld [vmem:[#allocation7 + $0x100] sm:$0xff]   ;;  %v6177_v29 = vld [vmem:[#allocation7 + $0x2c8] sm:$0xff]   ;;  %v6183_v24 = vld [vmem:[#allocation7 + $0x338] sm:$0xff]  }
 0x2df   :  { %5487 = vmatpush3.bf16.msra.mxu0 %v6138_v4  ;;  %5507 = vmatpush3.bf16.msra.mxu1 %v6139_v9  ;;  %v6178_v10 = vld [vmem:[#allocation7 + $0x200] sm:$0xff]   ;;  %v6179_v40 = vld [vmem:[#allocation7 + $0x288] sm:$0xff]   ;;  %v6184_v45 = vld [vmem:[#allocation7 + $0x370] sm:$0xff]   ;;  %v6241_v9 = vpack.c.bf16 %v3376_v43, %v3376_v43 }
 0x2e0   :  { %v3378_v14 = vmax.f32 %v7025_v57, 0.0  ;;  %5488 = vmatprep.subr.bf16.mxu0 %v6140_v25  ;;  %5508 = vmatprep.subr.bf16.mxu1 %v6141_v36  ;;  %v6180_v44 = vld [vmem:[#allocation7 + $0x2c0] sm:$0xff]   ;;  %v6185_v4 = vld [vmem:[#allocation7 + $0x3f8] sm:$0xff]   ;;  %v6186_v25 = vld [vmem:[#allocation7 + $0x330] sm:$0xff]  }
 0x2e1   :  { %v6182_v61 = vld [vmem:[#allocation7 + $0x280] sm:$0xff]   ;;  %v6187_v36 = vld [vmem:[#allocation7 + $0x3b8] sm:$0xff]   ;;  %v6188_v26 = vld [vmem:[#allocation7 + $0x368] sm:$0xff]  }
 0x2e2   :  { %v6189_v0 = vld [vmem:[#allocation7 + $0x3f0] sm:$0xff]   ;;  %v6243_v33 = vpack.c.bf16 %v3378_v14, %v3378_v14  ;;  %v6190_v43 = vld [vmem:[#allocation7 + $0x328] sm:$0xff]   ;;  %v6198_v57 = vld [vmem:[#allocation7 + $0x318] sm:$0xff]  }
 0x2e3   :  { %5489 = vmatpush3.bf16.msra.mxu0 %v6142_v34  ;;  %5509 = vmatpush3.bf16.msra.mxu1 %v6143_v17  ;;  %v6242_v34 = vpack.c.bf16 %v3373_v59, %v3373_v59  ;;  %v6191_v17 = vld [vmem:[#allocation7 + $0x3b0] sm:$0xff]   ;;  %v6193_v51 = vld [vmem:[#allocation7 + $0x3e8] sm:$0xff]   ;;  %v6194_v59 = vld [vmem:[#allocation7 + $0x320] sm:$0xff]  }
 0x2e4   :  { %5490 = vmatprep.subr.bf16.mxu0 %v6144_v63  ;;  %5510 = vmatprep.subr.bf16.mxu1 %v6145_v13  ;;  %v6192_v63 = vld [vmem:[#allocation7 + $0x360] sm:$0xff]   ;;  %v6195_v13 = vld [vmem:[#allocation7 + $0x3a8] sm:$0xff]  }
 0x2e5   :  { %v6199_v14 = vld [vmem:[#allocation7 + $0x3a0] sm:$0xff]  }
 0x2e7   :  { %5491 = vmatpush3.bf16.msra.mxu0 %v6146_v46  ;;  %5511 = vmatpush3.bf16.msra.mxu1 %v6147_v48  ;;  %v6196_v46 = vld [vmem:[#allocation7 + $0x358] sm:$0xff]   ;;  %v6197_v48 = vld [vmem:[#allocation7 + $0x3e0] sm:$0xff]  }
 0x2e8   :  { %5512 = vmatprep.subr.bf16.mxu1 %v6148_v11  ;;  %5520 = vmatprep.subr.bf16.mxu0 %v6149_v16  ;;  %v6200_v11 = vld [vmem:[#allocation7 + $0x350] sm:$0xff]   ;;  %v6201_v16 = vld [vmem:[#allocation7 + $0x3d8] sm:$0xff]  }
 0x2ea   :  { %3984 = vmatmul.mubr.bf16.vlgmr.msra.gmra.mxu0 %v6236_v35  ;;  %v6204_v35 = vld [vmem:[#allocation7 + $0x348] sm:$0xff]  }
 0x2eb   :  { %5513 = vmatpush3.bf16.msra.mxu1 %v6150_v19  ;;  %5521 = vmatpush3.bf16.msra.mxu0 %v6151_v22  ;;  %v6202_v19 = vld [vmem:[#allocation7 + $0x310] sm:$0xff]   ;;  %v6203_v22 = vld [vmem:[#allocation7 + $0x398] sm:$0xff]  }
 0x2ec   :  { %4341 = vmatprep.mubr.bf16.mxu0 %v6237_v60  ;;  %5522 = vmatprep.subr.bf16.mxu0 %v6152_v50  ;;  %v6205_v50 = vld [vmem:[#allocation7 + $0x3d0] sm:$0xff]  }
 0x2ed   :  { %5542 = vmatprep.subr.bf16.mxu1 %v6153_v55  ;;  %v6206_v55 = vld [vmem:[#allocation7 + $0x308] sm:$0xff]   ;;  %v6207_v60 = vld [vmem:[#allocation7 + $0x390] sm:$0xff]  }
 0x2ee   :  { %4163 = vmatmul.mubr.bf16.vlgmr.msra.gmra.mxu1 %v6238_v47  ;;  %v6210_v47 = vld [vmem:[#allocation7 + $0x300] sm:$0xff]  }
 0x2ef   :  { %5523 = vmatpush3.bf16.msra.mxu0 %v6154_v32  ;;  %5543 = vmatpush3.bf16.msra.mxu1 %v6155_v7  ;;  %v6208_v32 = vld [vmem:[#allocation7 + $0x340] sm:$0xff]   ;;  %v6209_v7 = vld [vmem:[#allocation7 + $0x3c8] sm:$0xff]  }
 0x2f0   :  { %4520 = vmatprep.mubr.bf16.mxu1 %v6239_v23  ;;  %5524 = vmatprep.subr.bf16.mxu0 %v6156_v2  ;;  %v6211_v2 = vld [vmem:[#allocation7 + $0x388] sm:$0xff]   ;;  %v6213_v23 = vld [vmem:[#allocation7 + $0x380] sm:$0xff]  }
 0x2f1   :  { %5544 = vmatprep.subr.bf16.mxu1 %v6157_v18  ;;  %v6212_v18 = vld [vmem:[#allocation7 + $0x3c0] sm:$0xff]  }
 0x2f3   :  { %5525 = vmatpush3.bf16.msra.mxu0 %v6158_v12  ;;  %5545 = vmatpush3.bf16.msra.mxu1 %v6159_v28  ;;  %v6244_v12 = vpack.c.bf16 %v3375_v58, %v3375_v58  ;;  %v6245_v28 = vpack.c.bf16 %v3377_v53, %v3377_v53 }
 0x2f4   :  { %5526 = vmatprep.subr.bf16.mxu0 %v6160_v41  ;;  %5546 = vmatprep.subr.bf16.mxu1 %v6161_v6 }
 0x2f7   :  { %5527 = vmatpush3.bf16.msra.mxu0 %v6162_v38  ;;  %5547 = vmatpush3.bf16.msra.mxu1 %v6163_v54  ;;  %v5289_v54 = vld [vmem:[%s7071_s6] ss:$0 sm:$0xff] }
 0x2f8   :  { %5528 = vmatprep.subr.bf16.mxu0 %v6164_v56  ;;  %5548 = vmatprep.subr.bf16.mxu1 %v6165_v37 }
 0x2fb   :  { %5529 = vmatpush3.bf16.msra.mxu0 %v6166_v31  ;;  %5549 = vmatpush3.bf16.msra.mxu1 %v6167_v15 }
 0x2fc   :  { %5530 = vmatprep.subr.bf16.mxu0 %v6168_v8  ;;  %5550 = vmatprep.subr.bf16.mxu1 %v6169_v52 }
 0x2ff   :  { %5531 = vmatpush3.bf16.msra.mxu0 %v6170_v49  ;;  %5551 = vmatpush3.bf16.msra.mxu1 %v6171_v42 }
 0x300   :  { %5532 = vmatprep.subr.bf16.mxu0 %v6172_v30  ;;  %5552 = vmatprep.subr.bf16.mxu1 %v6173_v3 }
 0x303   :  { %5533 = vmatpush3.bf16.msra.mxu0 %v6174_v1  ;;  %5553 = vmatpush3.bf16.msra.mxu1 %v6175_v21 }
 0x304   :  { %5534 = vmatprep.subr.bf16.mxu0 %v6176_v62  ;;  %5554 = vmatprep.subr.bf16.mxu1 %v6177_v29 }
 0x307   :  { %5535 = vmatpush3.bf16.msra.mxu0 %v6178_v10  ;;  %5555 = vmatpush3.bf16.msra.mxu1 %v6179_v40 }
 0x308   :  { %5556 = vmatprep.subr.bf16.mxu1 %v6180_v44  ;;  %5564 = vmatprep.subr.bf16.mxu0 %v6181_v39 }
 0x30a   :  { %4342 = vmatmul.mubr.bf16.vlgmr.msra.gmra.mxu0 %v6240_v27 }
 0x30b   :  { %5557 = vmatpush3.bf16.msra.mxu1 %v6182_v61  ;;  %5565 = vmatpush3.bf16.msra.mxu0 %v6183_v24 }
 0x30c   :  { %4699 = vmatprep.mubr.bf16.mxu0 %v6241_v9  ;;  %5566 = vmatprep.subr.bf16.mxu0 %v6184_v45 }
 0x30d   :  { %5586 = vmatprep.subr.bf16.mxu1 %v6185_v4 }
 0x30e   :  { %4521 = vmatmul.mubr.bf16.vlgmr.msra.gmra.mxu1 %v6242_v34 }
 0x30f   :  { %5567 = vmatpush3.bf16.msra.mxu0 %v6186_v25  ;;  %5587 = vmatpush3.bf16.msra.mxu1 %v6187_v36 }
 0x310   :  { %4878 = vmatprep.mubr.bf16.mxu1 %v6243_v33  ;;  %5568 = vmatprep.subr.bf16.mxu0 %v6188_v26 }
 0x311   :  { %5588 = vmatprep.subr.bf16.mxu1 %v6189_v0 }
 0x313   :  { %5569 = vmatpush3.bf16.msra.mxu0 %v6190_v43  ;;  %5589 = vmatpush3.bf16.msra.mxu1 %v6191_v17 }
 0x314   :  { %5570 = vmatprep.subr.bf16.mxu0 %v6192_v63  ;;  %5590 = vmatprep.subr.bf16.mxu1 %v6193_v51 }
 0x317   :  { %5571 = vmatpush3.bf16.msra.mxu0 %v6194_v59  ;;  %5591 = vmatpush3.bf16.msra.mxu1 %v6195_v13 }
 0x318   :  { %5572 = vmatprep.subr.bf16.mxu0 %v6196_v46  ;;  %5592 = vmatprep.subr.bf16.mxu1 %v6197_v48 }
 0x31b   :  { %5573 = vmatpush3.bf16.msra.mxu0 %v6198_v57  ;;  %5593 = vmatpush3.bf16.msra.mxu1 %v6199_v14 }
 0x31c   :  { %5574 = vmatprep.subr.bf16.mxu0 %v6200_v11  ;;  %5594 = vmatprep.subr.bf16.mxu1 %v6201_v16 }
 0x31f   :  { %5575 = vmatpush3.bf16.msra.mxu0 %v6202_v19  ;;  %5595 = vmatpush3.bf16.msra.mxu1 %v6203_v22 }
 0x320   :  { %5576 = vmatprep.subr.bf16.mxu0 %v6204_v35  ;;  %5596 = vmatprep.subr.bf16.mxu1 %v6205_v50 }
 0x323   :  { %5577 = vmatpush3.bf16.msra.mxu0 %v6206_v55  ;;  %5597 = vmatpush3.bf16.msra.mxu1 %v6207_v60 }
 0x324   :  { %5578 = vmatprep.subr.bf16.mxu0 %v6208_v32  ;;  %5598 = vmatprep.subr.bf16.mxu1 %v6209_v7 }
 0x327   :  { %5579 = vmatpush3.bf16.msra.mxu0 %v6210_v47  ;;  %5599 = vmatpush3.bf16.msra.mxu1 %v6211_v2 }
 0x328   :  { %5600 = vmatprep.subr.bf16.mxu1 %v6212_v18 }
 0x32a   :  { %4700 = vmatmul.mubr.bf16.vlgmr.msra.gmra.mxu0 %v6244_v12 }
 0x32b   :  { %5601 = vmatpush3.bf16.msra.mxu1 %v6213_v23 }
 0x32e   :  { %4879 = vmatmul.mubr.bf16.vlgmr.msra.gmra.mxu1 %v6245_v28 }
 0x38a   :  { %v5448_v41 = vpop.f32.mrf.mxu0 }
 0x38c   :  { %v5449_v6 = vpop.f32.mrf.mxu0 }
 0x38d   :  { %v5450_v38 = vadd.f32 %v5449_v6, %v5448_v41 }
 0x38e   :  { %v5451_v56 = vpop.f32.mrf.mxu0  ;;  %v5470_v37 = vpop.f32.mrf.mxu1 }
 0x38f   :  { %v3634_v58 = vadd.f32 %v5450_v38, %v5289_v54 }
 0x390   :  { %v5452_v20 = vpop.f32.mrf.mxu0  ;;  %v5471_v31 = vpop.f32.mrf.mxu1 }
 0x391   :  { %v5472_v15 = vadd.f32 %v5471_v31, %v5470_v37 }
 0x392   :  { %v5473_v8 = vpop.f32.mrf.mxu1 }
 0x393   :  { %v3812_v52 = vadd.f32 %v5472_v15, %v3634_v58 }
 0x394   :  { %v5474_v49 = vpop.f32.mrf.mxu1 }
 0x3aa   :  { %v5492_v5 = vpop.f32.mrf.mxu0 }
 0x3ac   :  { %v5493_v42 = vpop.f32.mrf.mxu0 }
 0x3ad   :  { %v5494_v45 = vadd.f32 %v5493_v42, %v5492_v5 }
 0x3ae   :  { %v5495_v53 = vpop.f32.mrf.mxu0  ;;  %v5514_v30 = vpop.f32.mrf.mxu1 }
 0x3af   :  { %v3991_v9 = vadd.f32 %v5494_v45, %v3812_v52 }
 0x3b0   :  { %v5496_v3 = vpop.f32.mrf.mxu0  ;;  %v5515_v1 = vpop.f32.mrf.mxu1 }
 0x3b1   :  { %v5516_v4 = vadd.f32 %v5515_v1, %v5514_v30 }
 0x3b2   :  { %v5517_v21 = vpop.f32.mrf.mxu1 }
 0x3b3   :  { %v4170_v34 = vadd.f32 %v5516_v4, %v3991_v9 }
 0x3b4   :  { %v5518_v62 = vpop.f32.mrf.mxu1 }
 0x3ca   :  { %v5536_v29 = vpop.f32.mrf.mxu0 }
 0x3cc   :  { %v5537_v10 = vpop.f32.mrf.mxu0 }
 0x3cd   :  { %v5538_v25 = vadd.f32 %v5537_v10, %v5536_v29 }
 0x3ce   :  { %v5539_v40 = vpop.f32.mrf.mxu0  ;;  %v5558_v44 = vpop.f32.mrf.mxu1 }
 0x3cf   :  { %v4349_v33 = vadd.f32 %v5538_v25, %v4170_v34 }
 0x3d0   :  { %v5540_v39 = vpop.f32.mrf.mxu0  ;;  %v5559_v61 = vpop.f32.mrf.mxu1 }
 0x3d1   :  { %v5560_v26 = vadd.f32 %v5559_v61, %v5558_v44 }
 0x3d2   :  { %v5561_v24 = vpop.f32.mrf.mxu1 }
 0x3d3   :  { %v4528_v51 = vadd.f32 %v5560_v26, %v4349_v33 }
 0x3d4   :  { %v5562_v27 = vpop.f32.mrf.mxu1 }
 0x3ea   :  { %v5580_v36 = vpop.f32.mrf.mxu0 }
 0x3ec   :  { %v5581_v0 = vpop.f32.mrf.mxu0 }
 0x3ed   :  { %v5582_v43 = vadd.f32 %v5581_v0, %v5580_v36 }
 0x3ee   :  { %v5583_v17 = vpop.f32.mrf.mxu0  ;;  %v5602_v63 = vpop.f32.mrf.mxu1 }
 0x3ef   :  { %v4707_v46 = vadd.f32 %v5582_v43, %v4528_v51 }
 0x3f0   :  { %v5584_v59 = vpop.f32.mrf.mxu0  ;;  %v5603_v13 = vpop.f32.mrf.mxu1 }
 0x3f1   :  { %v5604_v48 = vadd.f32 %v5603_v13, %v5602_v63 }
 0x3f2   :  { %v5605_v57 = vpop.f32.mrf.mxu1 }
 0x3f3   :  { %v4886_v14 = vadd.f32 %v5604_v48, %v4707_v46 }
 0x3f4   :  { %v5606_v11 = vpop.f32.mrf.mxu1 }
 0x3f5   :  { %v4887_v16 = vmax.f32 %v4886_v14, 0.0 }
 0x3f7   :  { %4888 = vst [vmem:[%s7072_s7] sm:$0xff] %v4887_v16 }
 0x3f8   :  { %4893 = vsyncpa [#allocation4], 1 }
 0x3f9   :  { %4894 = vsyncpa [#allocation6], 1 }

</bundles_post_ra>
